<compile_context>
chip_gen: v5e
topology: v5e:2x2
jax: 0.10.0
libtpu: 0.0.40
codegen_flags: <defaults>
</compile_context>

<pallas_src>
import functools

import jax
import jax.numpy as jnp
from jax.experimental import pallas as pl
from jax.experimental.pallas import tpu as pltpu


_VMEM_LIMIT_BYTES = 48 * 1024 * 1024   # > default scoped limit, < v7x 64 MiB phys.


# ----------------------------------------------------------------------------
# In-kernel helpers (trace-time Python, shared by all kernels)
# ----------------------------------------------------------------------------

def _wpad(x, p):
    """Zero-pad the W axis (axis 1) of an (R, W, C) array by p on each side."""
    z = jnp.zeros((x.shape[0], p, x.shape[2]), x.dtype)
    return jnp.concatenate([z, x, z], axis=1)


def _conv3(xw, w_ref):
    """3x3 'valid' convolution via kw-folded MXU matmuls.

    xw    : (Rin, W + 2, C) bf16, already zero-padded by 1 in W.
    w_ref : (3, 3*C, Cout) bf16 (HWIO weight with kw folded into channels).
    Returns (Rout * W, Cout) f32 with Rout = Rin - 2.
    """
    rin, wp, c = xw.shape
    w = wp - 2
    rout = rin - 2
    # kw-shifted copies folded into the channel (lane) axis: contraction 3*C.
    xcat = jnp.concatenate([xw[:, kw:kw + w, :] for kw in range(3)], axis=-1)
    acc = None
    for kh in range(3):
        d = jnp.dot(xcat[kh:kh + rout].reshape(rout * w, 3 * c), w_ref[kh],
                    preferred_element_type=jnp.float32)
        acc = d if acc is None else acc + d
    return acc


def _halo_window(xt_ref, xm_ref, xb_ref, halo, TH):
    """Assemble the (TH + 2*halo, W, C) input row window for this row tile.

    The top/bottom halo blocks are fetched with edge-clamped block indices;
    window rows that fall outside the image are zeroed here so they reproduce
    the conv's zero padding.
    """
    j = pl.program_id(1)
    H = pl.num_programs(1) * TH
    xin = jnp.concatenate([xt_ref[0], xm_ref[0], xb_ref[0]], axis=0)
    r = (jax.lax.broadcasted_iota(jnp.int32, (TH + 2 * halo, 1, 1), 0)
         + (j * TH - halo))                      # global row index per window row
    return jnp.where((r >= 0) & (r < H), xin, 0.0)


# ----------------------------------------------------------------------------
# Kernels
# ----------------------------------------------------------------------------

def _first_kernel(xt_ref, xm_ref, xb_ref, w_ref, b_ref, o_ref, *, TH, W):
    """9x9 Conv(4->64) + folded-BN bias + ReLU for one TH-row tile.

    The 4th input channel (per-pixel max over RGB) is built in-kernel; the 81
    conv taps are folded into the MXU contraction via full im2col (depth 324).
    """
    K, P = 9, 4
    xin = _halo_window(xt_ref, xm_ref, xb_ref, P, TH)             # (TH+8, W, 3) f32
    xin = jnp.concatenate([jnp.max(xin, axis=-1, keepdims=True), xin], axis=-1)
    xw = _wpad(xin.astype(jnp.bfloat16), P)                       # (TH+8, W+8, 4)
    xcat = jnp.concatenate([xw[:, kw:kw + W, :] for kw in range(K)], axis=-1)
    xfull = jnp.concatenate([xcat[kh:kh + TH] for kh in range(K)], axis=-1)
    acc = jnp.dot(xfull.reshape(TH * W, K * K * 4), w_ref[...],
                  preferred_element_type=jnp.float32)
    y = jnp.maximum(acc + b_ref[0], 0.0)
    o_ref[0] = y.reshape(TH, W, -1).astype(o_ref.dtype)


def _single_kernel(xt_ref, xm_ref, xb_ref, w_ref, b_ref, o_ref, *, TH, W):
    """Single 3x3 Conv(64->64) + folded-BN bias + ReLU for one TH-row tile.

    (Only used when the number of pairable middle layers is odd.)
    """
    xin = _halo_window(xt_ref, xm_ref, xb_ref, 2, TH)[1:TH + 3]   # rows [r0-1, r0+TH+1)
    y = _conv3(_wpad(xin.astype(jnp.bfloat16), 1), w_ref)         # (TH*W, Cout) f32
    y = jnp.maximum(y + b_ref[0], 0.0)
    o_ref[0] = y.reshape(TH, W, -1).astype(o_ref.dtype)


def _pair_kernel(xt_ref, xm_ref, xb_ref, wa_ref, ba_ref, wb_ref, bb_ref, o_ref,
                 *, TH, W, final):
    """Fused [3x3 Conv + BN + ReLU] -> [3x3 Conv + (BN+ReLU | Sigmoid)].

    The 64-channel intermediate never leaves VMEM: it is computed on an
    expanded (TH+2)-row window, its out-of-image rows are zeroed (they are the
    second conv's zero padding) and it is consumed immediately.
    """
    j = pl.program_id(1)
    H = pl.num_programs(1) * TH
    xin = _halo_window(xt_ref, xm_ref, xb_ref, 2, TH).astype(jnp.bfloat16)

    # ---- conv A -> intermediate rows [r0-1, r0+TH+1) -----------------------
    ya = _conv3(_wpad(xin, 1), wa_ref)                            # ((TH+2)*W, Cm)
    cm = ya.shape[-1]
    ya = jnp.maximum(ya + ba_ref[0], 0.0).reshape(TH + 2, W, cm)
    u = jax.lax.broadcasted_iota(jnp.int32, (TH + 2, 1, 1), 0) + (j * TH - 1)
    ya = jnp.where((u >= 0) & (u < H), ya, 0.0).astype(jnp.bfloat16)

    # ---- conv B -------------------------------------------------------------
    yb = _conv3(_wpad(ya, 1), wb_ref)                             # (TH*W, Cout)
    if final:
        out = jax.nn.sigmoid(yb)                  # final conv: no bias / no BN
    else:
        out = jnp.maximum(yb + bb_ref[0], 0.0)
    o_ref[0] = out.reshape(TH, W, -1).astype(o_ref.dtype)


# ----------------------------------------------------------------------------
# pallas_call plumbing
# ----------------------------------------------------------------------------

def _halo_specs(H, W, C, TH, halo):
    """Three BlockSpec views of the same (N, H, W, C) array: halo-row block
    above the body, the TH-row body block, and the halo-row block below.
    Halo block indices are clamped at the image edges (the kernel zeroes the
    out-of-image rows)."""
    rpb = TH // halo          # halo row-blocks per body row-block
    nb = H // halo            # total halo row-blocks
    top = pl.BlockSpec((1, halo, W, C),
                       lambda n, j: (n, jnp.maximum(j * rpb - 1, 0), 0, 0))
    mid = pl.BlockSpec((1, TH, W, C), lambda n, j: (n, j, 0, 0))
    bot = pl.BlockSpec((1, halo, W, C),
                       lambda n, j: (n, jnp.minimum((j + 1) * rpb, nb - 1), 0, 0))
    return [top, mid, bot]


def _full_spec(shape):
    return pl.BlockSpec(shape, lambda n, j: (0,) * len(shape))


def _compiler_params():
    return pltpu.CompilerParams(
        dimension_semantics=("parallel", "parallel"),
        vmem_limit_bytes=_VMEM_LIMIT_BYTES)


def _first_layer(x, w, b, *, block_h):
    N, H, W, C = x.shape
    cout = w.shape[-1]
    TH = block_h
    kernel = functools.partial(_first_kernel, TH=TH, W=W)
    return pl.pallas_call(
        kernel,
        out_shape=jax.ShapeDtypeStruct((N, H, W, cout), jnp.bfloat16),
        grid_spec=pltpu.PrefetchScalarGridSpec(
            num_scalar_prefetch=0,
            grid=(N, H // TH),
            in_specs=_halo_specs(H, W, C, TH, 4) + [_full_spec(w.shape),
                                                    _full_spec(b.shape)],
            out_specs=pl.BlockSpec((1, TH, W, cout), lambda n, j: (n, j, 0, 0)),
        ),
        compiler_params=_compiler_params(),
    )(x, x, x, w, b)


def _single_layer(x, w, b, *, block_h):
    N, H, W, C = x.shape
    cout = w.shape[-1]
    TH = block_h
    kernel = functools.partial(_single_kernel, TH=TH, W=W)
    return pl.pallas_call(
        kernel,
        out_shape=jax.ShapeDtypeStruct((N, H, W, cout), jnp.bfloat16),
        grid_spec=pltpu.PrefetchScalarGridSpec(
            num_scalar_prefetch=0,
            grid=(N, H // TH),
            in_specs=_halo_specs(H, W, C, TH, 2) + [_full_spec(w.shape),
                                                    _full_spec(b.shape)],
            out_specs=pl.BlockSpec((1, TH, W, cout), lambda n, j: (n, j, 0, 0)),
        ),
        compiler_params=_compiler_params(),
    )(x, x, x, w, b)


def _pair_layer(x, wa, ba, wb, bb, *, block_h, final):
    N, H, W, C = x.shape
    cout = wb.shape[-1]
    TH = block_h
    out_dtype = jnp.float32 if final else jnp.bfloat16
    kernel = functools.partial(_pair_kernel, TH=TH, W=W, final=final)
    return pl.pallas_call(
        kernel,
        out_shape=jax.ShapeDtypeStruct((N, H, W, cout), out_dtype),
        grid_spec=pltpu.PrefetchScalarGridSpec(
            num_scalar_prefetch=0,
            grid=(N, H // TH),
            in_specs=_halo_specs(H, W, C, TH, 2) + [
                _full_spec(wa.shape), _full_spec(ba.shape),
                _full_spec(wb.shape), _full_spec(bb.shape)],
            out_specs=pl.BlockSpec((1, TH, W, cout), lambda n, j: (n, j, 0, 0)),
        ),
        compiler_params=_compiler_params(),
    )(x, x, x, wa, ba, wb, bb)


# ----------------------------------------------------------------------------
# Parameters / forward / reference
# ----------------------------------------------------------------------------

def init_params(key, num_layers=5):
    """Deterministic parameters in canonical HWIO layout plus BN stats."""
    def conv_w(k, K, cin, cout):
        std = (2.0 / (K * K * cin)) ** 0.5
        return std * jax.random.normal(k, (K, K, cin, cout), jnp.float32)

    def bn_params(k, c):
        kg, kb = jax.random.split(k)
        return dict(gamma=1.0 + 0.1 * jax.random.normal(kg, (c,), jnp.float32),
                    beta=0.1 * jax.random.normal(kb, (c,), jnp.float32),
                    mean=jnp.zeros((c,), jnp.float32),    # fresh running stats
                    var=jnp.ones((c,), jnp.float32),
                    eps=1e-3)

    keys = jax.random.split(key, 2 * (num_layers + 2))
    params = [dict(w=conv_w(keys[0], 9, 4, 64), bn=bn_params(keys[1], 64))]
    for i in range(num_layers):
        params.append(dict(w=conv_w(keys[2 + 2 * i], 3, 64, 64),
                           bn=bn_params(keys[3 + 2 * i], 64)))
    params.append(dict(w=conv_w(keys[2 + 2 * num_layers], 3, 64, 4), bn=None))
    return params


def _fold_bn(bn):
    scale = bn['gamma'] / jnp.sqrt(bn['var'] + bn['eps'])
    bias = bn['beta'] - bn['mean'] * scale
    return scale, bias


def _prep_conv_bn(p):
    """Fold the BN scale into the conv weight; return (w_bf16, bias_f32)."""
    scale, bias = _fold_bn(p['bn'])
    K, _, cin, cout = p['w'].shape
    w = p['w'] * scale                                 # per-output-channel scale
    if K == 9:
        w = w.reshape(K * K * cin, cout)               # full im2col weight
    else:
        w = w.reshape(K, K * cin, cout)                # kw folded
    return w.astype(jnp.bfloat16), bias.reshape(1, cout).astype(jnp.float32)


def _pick_block_h(H, W, budget_bytes=32 << 20):
    """Largest row-tile height (multiple of 4 dividing H) whose in-kernel
    temporaries for the widest kernel (fused 3x3 pair, 64 channels) fit a
    conservative VMEM budget (~30 B per output pixel per mid-channel: bf16
    kw-folded windows for both convs + f32 pre-activations + the
    double-buffered input/output pipeline blocks)."""
    cands = [t for t in (256, 128, 64, 32, 16, 8, 4) if H % t == 0]
    if not cands:
        raise ValueError("image height must be a multiple of 4")
    for th in cands:
        if 30 * th * W * 64 <= budget_bytes:
            return th
    # TODO(synk): very wide images would additionally need W tiling.
    return cands[-1]


def decomnet_forward(x_nchw, params, *, block_h=None):
    """x_nchw: (N, 3, H, W) as in PyTorch.  Returns (R, I) in NCHW, f32."""
    N, _, H, W = x_nchw.shape
    assert H % 4 == 0, "H must be a multiple of 4 (9x9 halo row blocks)"
    assert W % 8 == 0, "W must be a multiple of 8 (sublane tiling)"
    if block_h is None:
        block_h = _pick_block_h(H, W)
    assert H % block_h == 0 and block_h % 4 == 0

    x = jnp.transpose(x_nchw, (0, 2, 3, 1)).astype(jnp.float32)    # NHWC, C=3

    # First layer: 9x9 Conv + BN + ReLU (builds the max-channel in-kernel).
    w0, b0 = _prep_conv_bn(params[0])
    h = _first_layer(x, w0, b0, block_h=block_h)                   # (N,H,W,64) bf16

    mids, pfin = params[1:-1], params[-1]
    assert len(mids) >= 1, "num_layers must be >= 1"
    # Fuse the middle 3x3 layers in pairs (intermediate stays in VMEM); the
    # last one is fused with the final 3x3 Conv + Sigmoid instead.
    i, n_pairable = 0, len(mids) - 1
    while i + 1 < n_pairable:
        wa, ba = _prep_conv_bn(mids[i])
        wb, bb = _prep_conv_bn(mids[i + 1])
        h = _pair_layer(h, wa, ba, wb, bb, block_h=block_h, final=False)
        i += 2
    if i < n_pairable:                                  # odd count: one single
        wa, ba = _prep_conv_bn(mids[i])
        h = _single_layer(h, wa, ba, block_h=block_h)
    wa, ba = _prep_conv_bn(mids[-1])
    w6 = pfin['w'].reshape(3, 3 * pfin['w'].shape[2], -1).astype(jnp.bfloat16)
    b6 = jnp.zeros((1, w6.shape[-1]), jnp.float32)      # unused (final: sigmoid)
    out = _pair_layer(h, wa, ba, w6, b6, block_h=block_h, final=True)  # f32
    out = jnp.transpose(out, (0, 3, 1, 2))                             # -> NCHW
    return out[:, 0:3, :, :], out[:, 3:4, :, :]


def ref_forward(x_nchw, params):
    """Pure-JAX reference (lax.conv, f32) for correctness checking."""
    x = jnp.transpose(x_nchw, (0, 2, 3, 1))
    h = jnp.concatenate([jnp.max(x, axis=-1, keepdims=True), x], axis=-1)
    for p in params:
        K = p['w'].shape[0]
        pad = (K - 1) // 2
        h = jax.lax.conv_general_dilated(
            h, p['w'], (1, 1), [(pad, pad), (pad, pad)],
            dimension_numbers=("NHWC", "HWIO", "NHWC"),
            precision=jax.lax.Precision.HIGHEST)
        if p['bn'] is not None:
            s, b = _fold_bn(p['bn'])
            h = jnp.maximum(h * s + b, 0.0)
        else:
            h = jax.nn.sigmoid(h)
    out = jnp.transpose(h, (0, 3, 1, 2))
    return out[:, 0:3, :, :], out[:, 3:4, :, :]


if __name__ == "__main__":
    key = jax.random.PRNGKey(0)
    k_in, k_par = jax.random.split(key)
    N, C, H, W = 2, 3, 16, 16
    x = jax.random.uniform(k_in, (N, C, H, W), dtype=jnp.float32)
    params = init_params(k_par, num_layers=5)

    # block_h=8 -> 2 row tiles per image: exercises the halo / border paths.
    R, I = decomnet_forward(x, params, block_h=8)
    jax.block_until_ready((R, I))

    # Sanity check against the pure-JAX f32 reference (kernels use bf16 matmul
    # inputs + bf16 stored intermediates with f32 accumulation, hence the
    # loose tolerance).
    R_ref, I_ref = ref_forward(x, params)
    assert R.shape == (N, 3, H, W) and I.shape == (N, 1, H, W)
    err = max(float(jnp.max(jnp.abs(R - R_ref))),
              float(jnp.max(jnp.abs(I - I_ref))))
    assert err < 4e-2, f"max abs error {err}"

    print("KERNEL_OK")
</pallas_src>

<mosaic_0001>
module attributes {stable_mosaic.version = 11 : i64} {
  func.func @_first_kernel(%arg0: i32, %arg1: i32, %arg2: memref<1x4x16x3xf32, #tpu.memory_space<vmem>>, %arg3: memref<1x8x16x3xf32, #tpu.memory_space<vmem>>, %arg4: memref<1x4x16x3xf32, #tpu.memory_space<vmem>>, %arg5: memref<324x64xbf16, #tpu.memory_space<vmem>>, %arg6: memref<1x64xf32, #tpu.memory_space<vmem>>, %arg7: memref<1x8x16x64xbf16, #tpu.memory_space<vmem>>) attributes {dimension_semantics = [#tpu.dimension_semantics<parallel>, #tpu.dimension_semantics<parallel>], iteration_bounds = array<i64: 2, 2>, scalar_prefetch = 0 : i64, scratch_operands = 0 : i64, tpu.core_type = #tpu.core_type<tc>, window_params = [{transform_indices = @transform_0, window_bounds = array<i64: 1, 4, 16, 3>}, {transform_indices = @transform_1, window_bounds = array<i64: 1, 8, 16, 3>}, {transform_indices = @transform_2, window_bounds = array<i64: 1, 4, 16, 3>}, {pipeline_mode = #tpu.pipeline_mode<synchronous>, transform_indices = @transform_3, window_bounds = array<i64: 324, 64>}, {pipeline_mode = #tpu.pipeline_mode<synchronous>, transform_indices = @transform_4, window_bounds = array<i64: 1, 64>}, {transform_indices = @transform_5, window_bounds = array<i64: 1, 8, 16, 64>}]} {
    %c0 = arith.constant 0 : index
    %c0_0 = arith.constant 0 : index
    %c0_1 = arith.constant 0 : index
    %c0_2 = arith.constant 0 : index
    %0 = vector.load %arg2[%c0, %c0_0, %c0_1, %c0_2] : memref<1x4x16x3xf32, #tpu.memory_space<vmem>>, vector<1x4x16x3xf32>
    %1 = vector.shape_cast %0 : vector<1x4x16x3xf32> to vector<4x16x3xf32>
    %c0_3 = arith.constant 0 : index
    %c0_4 = arith.constant 0 : index
    %c0_5 = arith.constant 0 : index
    %c0_6 = arith.constant 0 : index
    %2 = vector.load %arg3[%c0_3, %c0_4, %c0_5, %c0_6] : memref<1x8x16x3xf32, #tpu.memory_space<vmem>>, vector<1x8x16x3xf32>
    %3 = vector.shape_cast %2 : vector<1x8x16x3xf32> to vector<8x16x3xf32>
    %c0_7 = arith.constant 0 : index
    %c0_8 = arith.constant 0 : index
    %c0_9 = arith.constant 0 : index
    %c0_10 = arith.constant 0 : index
    %4 = vector.load %arg4[%c0_7, %c0_8, %c0_9, %c0_10] : memref<1x4x16x3xf32, #tpu.memory_space<vmem>>, vector<1x4x16x3xf32>
    %5 = vector.shape_cast %4 : vector<1x4x16x3xf32> to vector<4x16x3xf32>
    %6 = tpu.concatenate %1, %3, %5 in 0 : vector<4x16x3xf32>, vector<8x16x3xf32>, vector<4x16x3xf32> -> vector<16x16x3xf32>
    %7 = tpu.iota {dimensions = array<i32: 0>} : vector<16x1x1xi32>
    %c8_i32 = arith.constant 8 : i32
    %8 = arith.muli %arg1, %c8_i32 : i32
    %c4_i32 = arith.constant 4 : i32
    %9 = arith.subi %8, %c4_i32 : i32
    %10 = vector.broadcast %9 : i32 to vector<16x1x1xi32>
    %11 = arith.addi %7, %10 : vector<16x1x1xi32>
    %c0_i32 = arith.constant 0 : i32
    %12 = vector.broadcast %c0_i32 : i32 to vector<16x1x1xi32>
    %13 = arith.cmpi sge, %11, %12 : vector<16x1x1xi32>
    %c16_i32 = arith.constant 16 : i32
    %14 = vector.broadcast %c16_i32 : i32 to vector<16x1x1xi32>
    %15 = arith.cmpi slt, %11, %14 : vector<16x1x1xi32>
    %16 = arith.andi %13, %15 : vector<16x1x1xi1>
    %cst = arith.constant 0.000000e+00 : f32
    %17 = vector.shape_cast %16 : vector<16x1x1xi1> to vector<16x1x1xi1>
    %18 = vector.broadcast %17 : vector<16x1x1xi1> to vector<16x16x3xi1>
    %19 = vector.broadcast %cst : f32 to vector<16x16x3xf32>
    %20 = arith.select %18, %6, %19 : vector<16x16x3xi1>, vector<16x16x3xf32>
    %cst_11 = arith.constant dense<0xFF800000> : vector<16x16xf32>
    %21 = vector.multi_reduction <maximumf>, %20, %cst_11 [2] : vector<16x16x3xf32> to vector<16x16xf32>
    %22 = vector.shape_cast %21 : vector<16x16xf32> to vector<16x16x1xf32>
    %23 = tpu.concatenate %22, %20 in 2 : vector<16x16x1xf32>, vector<16x16x3xf32> -> vector<16x16x4xf32>
    %24 = arith.truncf %23 : vector<16x16x4xf32> to vector<16x16x4xbf16>
    %cst_12 = arith.constant 0.000000e+00 : bf16
    %25 = vector.broadcast %cst_12 : bf16 to vector<16x4x4xbf16>
    %26 = tpu.concatenate %25, %24, %25 in 1 : vector<16x4x4xbf16>, vector<16x16x4xbf16>, vector<16x4x4xbf16> -> vector<16x24x4xbf16>
    %27 = vector.extract_strided_slice %26 {offsets = [0, 0, 0], sizes = [16, 16, 4], strides = [1, 1, 1]} : vector<16x24x4xbf16> to vector<16x16x4xbf16>
    %28 = vector.extract_strided_slice %26 {offsets = [0, 1, 0], sizes = [16, 16, 4], strides = [1, 1, 1]} : vector<16x24x4xbf16> to vector<16x16x4xbf16>
    %29 = vector.extract_strided_slice %26 {offsets = [0, 2, 0], sizes = [16, 16, 4], strides = [1, 1, 1]} : vector<16x24x4xbf16> to vector<16x16x4xbf16>
    %30 = vector.extract_strided_slice %26 {offsets = [0, 3, 0], sizes = [16, 16, 4], strides = [1, 1, 1]} : vector<16x24x4xbf16> to vector<16x16x4xbf16>
    %31 = vector.extract_strided_slice %26 {offsets = [0, 4, 0], sizes = [16, 16, 4], strides = [1, 1, 1]} : vector<16x24x4xbf16> to vector<16x16x4xbf16>
    %32 = vector.extract_strided_slice %26 {offsets = [0, 5, 0], sizes = [16, 16, 4], strides = [1, 1, 1]} : vector<16x24x4xbf16> to vector<16x16x4xbf16>
    %33 = vector.extract_strided_slice %26 {offsets = [0, 6, 0], sizes = [16, 16, 4], strides = [1, 1, 1]} : vector<16x24x4xbf16> to vector<16x16x4xbf16>
    %34 = vector.extract_strided_slice %26 {offsets = [0, 7, 0], sizes = [16, 16, 4], strides = [1, 1, 1]} : vector<16x24x4xbf16> to vector<16x16x4xbf16>
    %35 = vector.extract_strided_slice %26 {offsets = [0, 8, 0], sizes = [16, 16, 4], strides = [1, 1, 1]} : vector<16x24x4xbf16> to vector<16x16x4xbf16>
    %36 = tpu.concatenate %27, %28, %29, %30, %31, %32, %33, %34, %35 in 2 : vector<16x16x4xbf16>, vector<16x16x4xbf16>, vector<16x16x4xbf16>, vector<16x16x4xbf16>, vector<16x16x4xbf16>, vector<16x16x4xbf16>, vector<16x16x4xbf16>, vector<16x16x4xbf16>, vector<16x16x4xbf16> -> vector<16x16x36xbf16>
    %37 = vector.extract_strided_slice %36 {offsets = [0, 0, 0], sizes = [8, 16, 36], strides = [1, 1, 1]} : vector<16x16x36xbf16> to vector<8x16x36xbf16>
    %38 = vector.extract_strided_slice %36 {offsets = [1, 0, 0], sizes = [8, 16, 36], strides = [1, 1, 1]} : vector<16x16x36xbf16> to vector<8x16x36xbf16>
    %39 = vector.extract_strided_slice %36 {offsets = [2, 0, 0], sizes = [8, 16, 36], strides = [1, 1, 1]} : vector<16x16x36xbf16> to vector<8x16x36xbf16>
    %40 = vector.extract_strided_slice %36 {offsets = [3, 0, 0], sizes = [8, 16, 36], strides = [1, 1, 1]} : vector<16x16x36xbf16> to vector<8x16x36xbf16>
    %41 = vector.extract_strided_slice %36 {offsets = [4, 0, 0], sizes = [8, 16, 36], strides = [1, 1, 1]} : vector<16x16x36xbf16> to vector<8x16x36xbf16>
    %42 = vector.extract_strided_slice %36 {offsets = [5, 0, 0], sizes = [8, 16, 36], strides = [1, 1, 1]} : vector<16x16x36xbf16> to vector<8x16x36xbf16>
    %43 = vector.extract_strided_slice %36 {offsets = [6, 0, 0], sizes = [8, 16, 36], strides = [1, 1, 1]} : vector<16x16x36xbf16> to vector<8x16x36xbf16>
    %44 = vector.extract_strided_slice %36 {offsets = [7, 0, 0], sizes = [8, 16, 36], strides = [1, 1, 1]} : vector<16x16x36xbf16> to vector<8x16x36xbf16>
    %45 = vector.extract_strided_slice %36 {offsets = [8, 0, 0], sizes = [8, 16, 36], strides = [1, 1, 1]} : vector<16x16x36xbf16> to vector<8x16x36xbf16>
    %46 = tpu.concatenate %37, %38, %39, %40, %41, %42, %43, %44, %45 in 2 : vector<8x16x36xbf16>, vector<8x16x36xbf16>, vector<8x16x36xbf16>, vector<8x16x36xbf16>, vector<8x16x36xbf16>, vector<8x16x36xbf16>, vector<8x16x36xbf16>, vector<8x16x36xbf16>, vector<8x16x36xbf16> -> vector<8x16x324xbf16>
    %47 = vector.shape_cast %46 : vector<8x16x324xbf16> to vector<128x324xbf16>
    %c0_13 = arith.constant 0 : index
    %c0_14 = arith.constant 0 : index
    %48 = vector.load %arg5[%c0_13, %c0_14] : memref<324x64xbf16, #tpu.memory_space<vmem>>, vector<324x64xbf16>
    %cst_15 = arith.constant dense<0.000000e+00> : vector<128x64xf32>
    %49 = tpu.matmul %47, %48, %cst_15 {dimension_numbers = #tpu.dot_dimension_numbers<[1], [0], [0], [1], [0, 0, 1, 1], [], []>} : vector<128x324xbf16>, vector<324x64xbf16>, vector<128x64xf32> -> vector<128x64xf32>
    %c0_16 = arith.constant 0 : index
    %c0_17 = arith.constant 0 : index
    %50 = vector.load %arg6[%c0_16, %c0_17] : memref<1x64xf32, #tpu.memory_space<vmem>>, vector<1x64xf32>
    %51 = vector.shape_cast %50 : vector<1x64xf32> to vector<64xf32>
    %52 = vector.shape_cast %51 : vector<64xf32> to vector<1x64xf32>
    %53 = vector.broadcast %52 : vector<1x64xf32> to vector<128x64xf32>
    %54 = arith.addf %49, %53 : vector<128x64xf32>
    %cst_18 = arith.constant 0.000000e+00 : f32
    %55 = vector.broadcast %cst_18 : f32 to vector<128x64xf32>
    %56 = arith.maximumf %54, %55 : vector<128x64xf32>
    %57 = vector.shape_cast %56 : vector<128x64xf32> to vector<8x16x64xf32>
    %58 = arith.truncf %57 : vector<8x16x64xf32> to vector<8x16x64xbf16>
    %c0_19 = arith.constant 0 : index
    %c0_20 = arith.constant 0 : index
    %c0_21 = arith.constant 0 : index
    %c0_22 = arith.constant 0 : index
    %59 = vector.load %arg7[%c0_19, %c0_20, %c0_21, %c0_22] : memref<1x8x16x64xbf16, #tpu.memory_space<vmem>>, vector<1x8x16x64xbf16>
    %60 = vector.shape_cast %59 : vector<1x8x16x64xbf16> to vector<8x16x64xbf16>
    %61 = vector.shape_cast %58 : vector<8x16x64xbf16> to vector<1x8x16x64xbf16>
    tpu.vector_store %arg7[%c0_19, %c0_20, %c0_21, %c0_22], %61 {strides = array<i32>} : memref<1x8x16x64xbf16, #tpu.memory_space<vmem>>, vector<1x8x16x64xbf16>,
    return
  }
  func.func @transform_0(%arg0: i32, %arg1: i32) -> (i32, i32, i32, i32) {
    %c2_i32 = arith.constant 2 : i32
    %0 = arith.muli %arg1, %c2_i32 : i32
    %c1_i32 = arith.constant 1 : i32
    %1 = arith.subi %0, %c1_i32 : i32
    %c0_i32 = arith.constant 0 : i32
    %2 = arith.maxsi %1, %c0_i32 : i32
    %c0_i32_0 = arith.constant 0 : i32
    %c0_i32_1 = arith.constant 0 : i32
    %c0_i32_2 = arith.constant 0 : i32
    return %arg0, %2, %c0_i32_0, %c0_i32_1 : i32, i32, i32, i32
  }
  func.func @transform_1(%arg0: i32, %arg1: i32) -> (i32, i32, i32, i32) {
    %c0_i32 = arith.constant 0 : i32
    %c0_i32_0 = arith.constant 0 : i32
    %c0_i32_1 = arith.constant 0 : i32
    return %arg0, %arg1, %c0_i32, %c0_i32_0 : i32, i32, i32, i32
  }
  func.func @transform_2(%arg0: i32, %arg1: i32) -> (i32, i32, i32, i32) {
    %c1_i32 = arith.constant 1 : i32
    %0 = arith.addi %arg1, %c1_i32 : i32
    %c2_i32 = arith.constant 2 : i32
    %1 = arith.muli %0, %c2_i32 : i32
    %c3_i32 = arith.constant 3 : i32
    %2 = arith.minsi %1, %c3_i32 : i32
    %c0_i32 = arith.constant 0 : i32
    %c0_i32_0 = arith.constant 0 : i32
    %c0_i32_1 = arith.constant 0 : i32
    return %arg0, %2, %c0_i32, %c0_i32_0 : i32, i32, i32, i32
  }
  func.func @transform_3(%arg0: i32, %arg1: i32) -> (i32, i32) {
    %c0_i32 = arith.constant 0 : i32
    %c0_i32_0 = arith.constant 0 : i32
    %c0_i32_1 = arith.constant 0 : i32
    return %c0_i32, %c0_i32_0 : i32, i32
  }
  func.func @transform_4(%arg0: i32, %arg1: i32) -> (i32, i32) {
    %c0_i32 = arith.constant 0 : i32
    %c0_i32_0 = arith.constant 0 : i32
    %c0_i32_1 = arith.constant 0 : i32
    return %c0_i32, %c0_i32_0 : i32, i32
  }
  func.func @transform_5(%arg0: i32, %arg1: i32) -> (i32, i32, i32, i32) {
    %c0_i32 = arith.constant 0 : i32
    %c0_i32_0 = arith.constant 0 : i32
    %c0_i32_1 = arith.constant 0 : i32
    return %arg0, %arg1, %c0_i32, %c0_i32_0 : i32, i32, i32, i32
  }
}

</mosaic_0001>

<bundles_post_ra>
// kernel: tpu_custom_call.1
= control target key start
LH: loop header
LB: loop body
LE: loop exit
PB: predicated region body
PF: predicated region fallthrough
CT: control target
= control target key end

     0   :  { %s5807_s0 = inlined_call_operand.vmem [shape: f32[2,16,16,3], index: 0, kind: input, shape index: {}]   ;;  %s5808_s1 = inlined_call_operand.vmem [shape: f32[2,16,16,3], index: 1, kind: input, shape index: {}]   ;;  %s5809_s2 = inlined_call_operand.vmem [shape: f32[2,16,16,3], index: 2, kind: input, shape index: {}]   ;;  %s5810_s3 = inlined_call_operand.vmem [shape: bf16[324,64], index: 3, kind: input, shape index: {}]   ;;  %s5811_s4 = inlined_call_operand.vmem [shape: f32[1,64], index: 4, kind: input, shape index: {}]   ;;  %s5812_s5 = inlined_call_operand.hbm [shape: bf16[2,16,16,64], index: 5, kind: output, shape index: {}]  }
   0x1   :  { %5996 = sst [smem:[#allocation113_spill]] %s5807_s0 }
   0x2   :  { %10 = vsyncpa [#allocation3], 0 }
   0x3   :  { %12 = vsyncpa [#allocation3 + $0x1], 0  ;;  %s3575_s18 = smov 0   ;;  %s3577_s19 = smov 0  }
   0x4   :  { %s3579_s20 = smov 0   ;;  %s3581_s21 = smov 0  }
   0x5   :  { %s3583_s22 = smov 0   ;;  %s3585_s23 = smov 0  }
   0x6   :  { %s3587_s24 = smov 0   ;;  %s3589_s25 = smov 0  }
   0x7 LB: > { %s3093_s26 = sadd.s32 4294967295, %s3527_s25   ;;  %s3094_s27 = sadd.s32 4294967294, %s3527_s25   ;;  %s3527_s25 = sphi %s3589_s25, %s18_s25   ;;  %s3523_s24 = sphi %s3587_s24, %s6333_s24   ;;  %s3519_s23 = sphi %s3585_s23, %s6332_s23   ;;  %s3515_s22 = sphi %s3583_s22, %s6331_s22   ;;  %s3511_s21 = sphi %s3581_s21, %s6330_s21   ;;  %s3507_s20 = sphi %s3579_s20, %s6329_s20   ;;  %s3503_s19 = sphi %s3577_s19, %s6328_s19   ;;  %s3499_s18 = sphi %s3575_s18, %s6327_s18  }
   0x8   : > { %s27_s28 = sadd.s32 1, %s3519_s23  ;;  %s30_s29 = sadd.s32 1, %s3523_s24 }
   0x9   : > { %p28_p0 = scmp.ge.s32.totalorder %s27_s28, 2  ;;  %p191_p1 = scmp.ne.s32.totalorder %s3507_s20, %s3503_s19 }
   0xa   : > { %p192_p2 = scmp.eq.s32.totalorder %s3093_s26, 3  ;;  %p197_p5 = scmp.ne.s32.totalorder %s3503_s19, %s3499_s18 }
   0xb   : > { %s6335_s28 = smov (%p28_p0, %s27_s28), 0  ;;  %s6337_s29 = smov (!%p28_p0, %s30_s29), %s3523_s24 }
   0xc   : > { %s177_s30 = ssub.s32 %s3519_s23, %s6335_s28  ;;  %p3626_p3 = por %p192_p2, %p191_p1 }
   0xd   : > { %p32_p4 = scmp.ge.s32.totalorder %s6337_s29, 2  ;;  %p198_p6 = scmp.eq.s32.totalorder %s3094_s27, 3 }
   0xe   : > { %p3103_p7 = scmp.ge.s32.totalorder %s3527_s25, 1  ;;  %p280_p9 = scmp.lt.s32.totalorder %s3527_s25, 5 }
   0xf   : > { %s6339_s29 = smov (%p32_p4, %s6337_s29), 0  ;;  %p3635_p8 = por %p198_p6, %p197_p5 }
  0x10   : > { %s176_s8 = ssub.s32 %s3523_s24, %s6339_s29  ;;  %s181_s9 = sadd.s32 1, %s3507_s20 }
  0x11   : > { %s178_s10 = sor.u32 %s177_s30, %s176_s8  ;;  %p281_p10 = pnand %p3103_p7, %p280_p9 }
  0x12   : > { %p179_p11 = scmp.eq.s32.totalorder %s178_s10, 0 }
  0x13   : > { %284 = sbr.rel (%p281_p10) target bundleno = 1179 (0x49b), region = 40 }
  0x14   : > { %s3644_s11 = scalar_select %p179_p11, %s3507_s20, %s181_s9  }
  0x18   : > { %p346_p12 = scmp.lt.s32.totalorder %s3515_s22, 1  ;;  %s3111_s12 = sshll.u32 %s3511_s21, 3  ;;  %vm554_vm5 = vcmask 23552  }
  0x19   : > { %p363_p13 = scmp.lt.s32.totalorder %s3111_s12, 15  ;;  %s3121_s13 = sadd.s32 4294967292, %s3111_s12 }
  0x1a   : > { %s347_s14 = scalar_select %p346_p12, %s3515_s22, 1  ;;  %v3649_v0 = vstv %s3121_s13 }
  0x1b   : > { %s6341_s12 = smov (!%p363_p13, %s3111_s12), 15  ;;  %v430_v1 = vadd.s32 4, %v3649_v0  ;;  %s3105_s16 = sshll.u32 %s3511_s21, 1  ;;  %v431_v2 = vadd.s32 5, %v3649_v0  ;;  %v427_v7 = vadd.s32 1, %v3649_v0  ;;  %v428_v10 = vadd.s32 2, %v3649_v0 }
  0x1c   : > { %s3652_s15 = sshll.u32 %s347_s14, 5  ;;  %s3112_s17 = sshll.u32 %s6341_s12, 1  ;;  %v429_v13 = vadd.s32 3, %v3649_v0  ;;  %vm442_vm7 = vcmp.ge.s32.totalorder %v3649_v0, 0  ;;  %vm458_vm8 = vcmp.lt.s32.totalorder %v3649_v0, 16  ;;  %v432_v19 = vadd.s32 6, %v3649_v0 }
  0x1d   : > { %vm446_vm0 = vcmp.ge.s32.totalorder %v430_v1, 0  ;;  %vm462_vm1 = vcmp.lt.s32.totalorder %v430_v1, 16  ;;  %s3106_s26 = sadd.s32 4294967295, %s3105_s16  ;;  %s367_s27 = sadd.s32 %s3112_s17, %s3652_s15  ;;  %vm447_vm3 = vcmp.ge.s32.totalorder %v431_v2, 0  ;;  %vm463_vm4 = vcmp.lt.s32.totalorder %v431_v2, 16  ;;  %vm3696_vm13 = vmand %vm442_vm7, %vm458_vm8 }
  0x1e   : > { %p343_p0 = scmp.gt.s32.totalorder %s3106_s26, 0  ;;  %s3114_s30 = sshll.u32 %s367_s27, 3  ;;  %vm3657_vm2 = vmand %vm446_vm0, %vm462_vm1  ;;  %vm443_vm9 = vcmp.ge.s32.totalorder %v427_v7, 0  ;;  %vm459_vm10 = vcmp.lt.s32.totalorder %v427_v7, 16  ;;  %vm444_vm11 = vcmp.ge.s32.totalorder %v428_v10, 0  ;;  %vm460_vm12 = vcmp.lt.s32.totalorder %v428_v10, 16 }
  0x1f   : > { %s3664_s10 = scalar_lea.vmem %s5808_s1, %s3114_s30  ;;  %s3222_s12 = sadd.s32 2, %s3105_s16  ;;  %vm479_vm6 = vmand %vm447_vm3, %vm463_vm4  ;;  %vm445_vm14 = vcmp.ge.s32.totalorder %v429_v13, 0  ;;  %vm461_vm15 = vcmp.lt.s32.totalorder %v429_v13, 16  ;;  %vm448_vm3 = vcmp.ge.s32.totalorder %v432_v19, 0  ;;  %vm464_vm4 = vcmp.lt.s32.totalorder %v432_v19, 16 }
  0x20   : > { %v400_v4 = vld [vmem:[%s3664_s10] sm:$0xff]  ;;  %s6343_s26 = smov (!%p343_p0, %s3106_s26), 0  ;;  %v403_v5 = vld [vmem:[%s3664_s10 + $0x18] sm:$0xff]  ;;  %v402_v8 = vld [vmem:[%s3664_s10 + $0x10] sm:$0xff]  ;;  %p373_p1 = scmp.lt.s32.totalorder %s3222_s12, 3  ;;  %v433_v26 = vadd.s32 7, %v3649_v0 }
  0x21   : > { %v3670_v6 = vsel %vm3657_vm2, %v400_v4, 0.0  ;;  %s3107_s13 = sshll.u32 %s6343_s26, 2  ;;  %v3677_v11 = vsel %vm479_vm6, %v403_v5, 0.0  ;;  %v3679_v12 = vsel %vm479_vm6, %v402_v8, 0.0  ;;  %v401_v15 = vld [vmem:[%s3664_s10 + $0x8] sm:$0xff]  ;;  %vm3702_vm0 = vmand %vm443_vm9, %vm459_vm10  ;;  %s6007_s0 = sld [smem:[#allocation113_spill]] }
  0x22   : > { %v579_v9 = vsel %vm554_vm5, %v3670_v6, -inf  ;;  %p348_p2 = scmp.lt.s32.totalorder %s3107_s13, 15  ;;  %v3377_v14 = vpack.i.bf16 %v3677_v11, %v3679_v12  ;;  %v3689_v16 = vsel %vm3657_vm2, %v401_v15, 0.0  ;;  %s6347_s12 = smov (!%p373_p1, %s3222_s12), 3  ;;  %vm3706_vm1 = vmand %vm444_vm11, %vm460_vm12  ;;  %v405_v27 = vld [vmem:[%s3664_s10 + $0x28] sm:$0xff]  ;;  %v404_v44 = vld [vmem:[%s3664_s10 + $0x20] sm:$0xff] }
  0x23   : > { %580 = vmax.xlane.f32.xlu2 %v579_v9  ;;  %v3372_v17 = vpack.i.bf16 %v3689_v16, %v3670_v6  ;;  %vm3713_vm2 = vmand %vm445_vm14, %vm461_vm15  ;;  %v434_v45 = vadd.s32 8, %v3649_v0  ;;  %s3116_s8 = sshll.u32 %s6347_s12, 2  ;;  %vm449_vm7 = vcmp.ge.s32.totalorder %v433_v26, 0  ;;  %vm465_vm8 = vcmp.lt.s32.totalorder %v433_v26, 16  ;;  %v409_v54 = vld [vmem:[%s3664_s10 + $0x48] sm:$0xff]  ;;  %v408_v55 = vld [vmem:[%s3664_s10 + $0x40] sm:$0xff] }
  0x24   : > { %s6345_s13 = smov (!%p348_p2, %s3107_s13), 15  ;;  %vm3743_vm6 = vmand %vm448_vm3, %vm464_vm4  ;;  %p3786_p4 = scmp.lt.s32.totalorder %s3116_s8, 15  ;;  %v406_v56 = vld [vmem:[%s3664_s10 + $0x30] sm:$0xff]  ;;  %v407_v59 = vld [vmem:[%s3664_s10 + $0x38] sm:$0xff]  ;;  %v435_v4 = vadd.s32 9, %v3649_v0  ;;  %v437_v7 = vadd.s32 11, %v3649_v0 }
  0x25   : > { %s3108_s14 = sshll.u32 %s6345_s13, 1  ;;  %v3774_v50 = vsel %vm3743_vm6, %v405_v27, 0.0  ;;  %v3778_v51 = vsel %vm3743_vm6, %v404_v44, 0.0  ;;  %vm481_vm9 = vmand %vm449_vm7, %vm465_vm8  ;;  %vm450_vm10 = vcmp.ge.s32.totalorder %v434_v45, 0  ;;  %vm466_vm11 = vcmp.lt.s32.totalorder %v434_v45, 16  ;;  %v411_v5 = vld [vmem:[%s3664_s10 + $0x58] sm:$0xff] }
  0x26   : > { %s352_s16 = sadd.s32 %s3652_s15, %s3108_s14  ;;  %v3382_v53 = vpack.i.bf16 %v3774_v50, %v3778_v51  ;;  %vm482_vm12 = vmand %vm450_vm10, %vm466_vm11  ;;  %v3802_v63 = vsel %vm481_vm9, %v406_v56, 0.0  ;;  %v3806_v2 = vsel %vm481_vm9, %v407_v59, 0.0  ;;  %s6349_s8 = smov (!%p3786_p4, %s3116_s8), 15  ;;  %vm467_vm14 = vcmp.lt.s32.totalorder %v435_v4, 16  ;;  %v410_v13 = vld [vmem:[%s3664_s10 + $0x50] sm:$0xff]  ;;  %v415_v20 = vld [vmem:[%s3664_s10 + $0x78] sm:$0xff] }
  0x27   : > { %s3110_s17 = sshll.u32 %s352_s16, 3  ;;  %v3798_v61 = vsel %vm482_vm12, %v409_v54, 0.0  ;;  %v3800_v62 = vsel %vm482_vm12, %v408_v55, 0.0  ;;  %v3387_v3 = vpack.i.bf16 %v3806_v2, %v3802_v63  ;;  %s3117_s12 = sshll.u32 %s6349_s8, 1  ;;  %v436_v10 = vadd.s32 10, %v3649_v0  ;;  %v414_v22 = vld [vmem:[%s3664_s10 + $0x70] sm:$0xff] }
  0x28   : > { %s354_s30 = scalar_lea.vmem %s6007_s0, %s3110_s17  ;;  %v3392_v1 = vpack.i.bf16 %v3798_v61, %v3800_v62  ;;  %v588_v15 = vsel %vm554_vm5, %v3677_v11, -inf  ;;  %s382_s13 = sadd.s32 %s3117_s12, %s3652_s15  ;;  %v412_v27 = vld [vmem:[%s3664_s10 + $0x60] sm:$0xff]  ;;  %v438_v56 = vadd.s32 12, %v3649_v0  ;;  %v594_v59 = vsel %vm554_vm5, %v3774_v50, -inf }
  0x29   : > { %v394_v23 = vld [vmem:[%s354_s30 + $0x10] sm:$0xff]  ;;  %v392_v24 = vld [vmem:[%s354_s30] sm:$0xff]  ;;  %v395_v31 = vld [vmem:[%s354_s30 + $0x18] sm:$0xff]  ;;  %vm452_vm3 = vcmp.ge.s32.totalorder %v436_v10, 0  ;;  %vm468_vm4 = vcmp.lt.s32.totalorder %v436_v10, 16  ;;  %s3119_s14 = sshll.u32 %s382_s13, 3 }
  0x2a   : > { %v396_v25 = vld [vmem:[%s354_s30 + $0x20] sm:$0xff]  ;;  %v3721_v28 = vsel %vm3702_vm0, %v394_v23, 0.0  ;;  %v3725_v29 = vsel %vm3696_vm13, %v392_v24, 0.0  ;;  %v393_v32 = vld [vmem:[%s354_s30 + $0x8] sm:$0xff]  ;;  %v3739_v37 = vsel %vm3702_vm0, %v395_v31, 0.0  ;;  %v399_v38 = vld [vmem:[%s354_s30 + $0x38] sm:$0xff]  ;;  %s3846_s17 = scalar_lea.vmem %s5809_s2, %s3119_s14 }
  0x2b   : > { %v3729_v30 = vsel %vm3706_vm1, %v396_v25, 0.0  ;;  %v397_v33 = vld [vmem:[%s354_s30 + $0x28] sm:$0xff]  ;;  %v561_v34 = vsel %vm554_vm5, %v3721_v28, -inf  ;;  %v555_v35 = vsel %vm554_vm5, %v3725_v29, -inf  ;;  %v398_v39 = vld [vmem:[%s354_s30 + $0x30] sm:$0xff]  ;;  %v3357_v41 = vpack.i.bf16 %v3739_v37, %v3721_v28  ;;  %vm484_vm6 = vmand %vm452_vm3, %vm468_vm4  ;;  %s5981_s26 = smov 4  }
  0x2c   : > { %v567_v36 = vsel %vm554_vm5, %v3729_v30, -inf  ;;  %562 = vmax.xlane.f32.xlu1 %v561_v34  ;;  %556 = vmax.xlane.f32.xlu0 %v555_v35  ;;  %v3751_v42 = vsel %vm3696_vm13, %v393_v32, 0.0  ;;  %v3755_v43 = vsel %vm3706_vm1, %v397_v33, 0.0  ;;  %v3766_v48 = vsel %vm3713_vm2, %v399_v38, 0.0  ;;  %v413_v34 = vld [vmem:[%s3664_s10 + $0x68] sm:$0xff]  ;;  %v418_v40 = vld [vmem:[%s3846_s17 + $0x10] sm:$0xff] }
  0x2d   : > { %568 = vmax.xlane.f32.xlu2 %v567_v36  ;;  %v3352_v46 = vpack.i.bf16 %v3751_v42, %v3725_v29  ;;  %v3362_v47 = vpack.i.bf16 %v3755_v43, %v3729_v30  ;;  %v3770_v49 = vsel %vm3713_vm2, %v398_v39, 0.0  ;;  %v564_v57 = vsel %vm554_vm5, %v3739_v37, -inf  ;;  %s3529_s10 = smov 1   ;;  %s3531_s27 = smov 8  }
  0x2e   : > { %v3367_v52 = vpack.i.bf16 %v3766_v48, %v3770_v49  ;;  %v558_v58 = vsel %vm554_vm5, %v3751_v42, -inf  ;;  %v570_v60 = vsel %vm554_vm5, %v3755_v43, -inf  ;;  %vm451_vm13 = vcmp.ge.s32.totalorder %v435_v4, 0  ;;  %s3532_s30 = smov 12   ;;  %s5988_s8 = smov 16  }
  0x2f   : > { %vm483_vm15 = vmand %vm451_vm13, %vm467_vm14  ;;  %v576_v8 = vsel %vm554_vm5, %v3766_v48, -inf  ;;  %v573_v9 = vsel %vm554_vm5, %v3770_v49, -inf  ;;  %vm453_vm0 = vcmp.ge.s32.totalorder %v437_v7, 0  ;;  %vm469_vm1 = vcmp.lt.s32.totalorder %v437_v7, 16  ;;  %v416_v7 = vld [vmem:[%s3846_s17] sm:$0xff]  ;;  %s3534_s9 = smov 20  }
  0x30   : > { %v3824_v18 = vsel %vm483_vm15, %v411_v5, 0.0  ;;  %v3826_v19 = vsel %vm483_vm15, %v410_v13, 0.0  ;;  %vm485_vm2 = vmand %vm453_vm0, %vm469_vm1  ;;  %v439_v31 = vadd.s32 13, %v3649_v0  ;;  %v585_v32 = vsel %vm554_vm5, %v3679_v12, -inf  ;;  %v421_v13 = vld [vmem:[%s3846_s17 + $0x28] sm:$0xff]  ;;  %s5982_s12 = smov 24  }
  0x31   : > { %v3397_v21 = vpack.i.bf16 %v3824_v18, %v3826_v19  ;;  %v3832_v23 = vsel %vm485_vm2, %v415_v20, 0.0  ;;  %v3834_v24 = vsel %vm485_vm2, %v414_v22, 0.0  ;;  %v582_v33 = vsel %vm554_vm5, %v3689_v16, -inf  ;;  %s5984_s13 = smov 28   ;;  %s3537_s14 = smov 32  }
  0x32   : > { %v3407_v25 = vpack.i.bf16 %v3832_v23, %v3834_v24  ;;  %v3840_v26 = vsel %vm554_vm5, %v3834_v24, -inf  ;;  %v597_v35 = vsel %vm554_vm5, %v3802_v63, -inf  ;;  %v3856_v36 = vsel %vm484_vm6, %v413_v34, 0.0  ;;  %s5994_s15 = smov 124   ;;  %s5992_s16 = smov 108  }
  0x33   : > { %vm455_vm7 = vcmp.ge.s32.totalorder %v439_v31, 0  ;;  %vm471_vm8 = vcmp.lt.s32.totalorder %v439_v31, 16  ;;  %v3858_v38 = vsel %vm484_vm6, %v412_v27, 0.0  ;;  %v3862_v39 = vsel %vm554_vm5, %v3856_v36, -inf  ;;  %v420_v27 = vld [vmem:[%s3846_s17 + $0x20] sm:$0xff]  ;;  %s6317_s0 = smov 124  }
  0x34   : > { %565 = vmax.xlane.f32.xlu1 %v564_v57  ;;  %559 = vmax.xlane.f32.xlu0 %v558_v58  ;;  %vm3865_vm9 = vmand %vm455_vm7, %vm471_vm8  ;;  %v3402_v45 = vpack.i.bf16 %v3856_v36, %v3858_v38  ;;  %v417_v57 = vld [vmem:[%s3846_s17 + $0x8] sm:$0xff]  ;;  %vm454_vm10 = vcmp.ge.s32.totalorder %v438_v56, 0  ;;  %vm470_vm11 = vcmp.lt.s32.totalorder %v438_v56, 16  ;;  %v440_v58 = vadd.s32 14, %v3649_v0 }
  0x35   : > { %571 = vmax.xlane.f32.xlu2 %v570_v60  ;;  %v3873_v54 = vsel %vm3865_vm9, %v418_v40, 0.0  ;;  %vm486_vm12 = vmand %vm454_vm10, %vm470_vm11  ;;  %v591_v60 = vsel %vm554_vm5, %v3778_v51, -inf  ;;  %v606_v4 = vsel %vm554_vm5, %v3798_v61, -inf  ;;  %v603_v34 = vsel %vm554_vm5, %v3800_v62, -inf  ;;  %v419_v40 = vld [vmem:[%s3846_s17 + $0x18] sm:$0xff] }
  0x36   : > { %v633_v55 = vsel %vm554_vm5, %v3873_v54, -inf  ;;  %v3886_v5 = vsel %vm486_vm12, %v417_v57, 0.0  ;;  %vm456_vm13 = vcmp.ge.s32.totalorder %v440_v58, 0  ;;  %vm472_vm14 = vcmp.lt.s32.totalorder %v440_v58, 16 }
  0x37   : > { %vm488_vm15 = vmand %vm456_vm13, %vm472_vm14  ;;  %v615_v56 = vsel %vm554_vm5, %v3858_v38, -inf  ;;  %v549_v57 = vsel %vm3865_vm9, %v419_v40, 0.0  ;;  %v609_v44 = vsel %vm554_vm5, %v3826_v19, -inf  ;;  %vm940_vm3 = vcmask 1041408  }
  0x38   : > { %v3898_v20 = vsel %vm488_vm15, %v421_v13, 0.0  ;;  %v550_v31 = vsel %vm488_vm15, %v420_v27, 0.0  ;;  %v636_v58 = vsel %vm554_vm5, %v549_v57, -inf  ;;  %v612_v13 = vsel %vm554_vm5, %v3824_v18, -inf  ;;  %v422_v27 = vld [vmem:[%s3846_s17 + $0x30] sm:$0xff] }
  0x39   : > { %v642_v22 = vsel %vm554_vm5, %v3898_v20, -inf  ;;  %vm990_vm4 = vsmask.f32 7424  ;;  %vm1215_vm6 = vcmask 1046528   ;;  %vm1296_vm7 = vsmask.f32 6400 }
  0x3a   : > { %vm1473_vm8 = vcmask 1045504   ;;  %vm1554_vm9 = vsmask.f32 5376  ;;  %vm2006_vm10 = vcmask 31744   ;;  %vm2039_vm11 = vcmask 64512  }
  0x3b   : > { %vm1699_vm13 = vcmask 1044480   ;;  %vm1780_vm14 = vsmask.f32 4352  ;;  %vm1925_vm15 = vcmask 1043456  }
  0x3c   : > { %577 = vmax.xlane.f32.xlu1 %v576_v8  ;;  %574 = vmax.xlane.f32.xlu0 %v573_v9  ;;  %v630_v8 = vsel %vm554_vm5, %v3886_v5, -inf  ;;  %v3891_v9 = vsel %vm486_vm12, %v416_v7, 0.0  ;;  %vm2072_vm12 = vcmask 97280  }
  0x3d   : > { %589 = vmax.xlane.f32.xlu2 %v588_v15  ;;  %v627_v10 = vsel %vm554_vm5, %v3891_v9, -inf  ;;  %v3412_v15 = vpack.i.bf16 %v3886_v5, %v3891_v9 }
  0x44   : > { %586 = vmax.xlane.f32.xlu1 %v585_v32  ;;  %583 = vmax.xlane.f32.xlu0 %v582_v33  ;;  %v3422_v32 = vpack.i.bf16 %v3898_v20, %v550_v31  ;;  %v639_v33 = vsel %vm554_vm5, %v550_v31, -inf }
  0x45   : > { %598 = vmax.xlane.f32.xlu2 %v597_v35  ;;  %v600_v35 = vsel %vm554_vm5, %v3806_v2, -inf }
  0x4c   : > { %595 = vmax.xlane.f32.xlu1 %v594_v59  ;;  %592 = vmax.xlane.f32.xlu0 %v591_v60  ;;  %v3417_v59 = vpack.i.bf16 %v549_v57, %v3873_v54  ;;  %v441_v60 = vadd.s32 15, %v3649_v0  ;;  %v624_v54 = vsel %vm554_vm5, %v3832_v23, -inf }
  0x4d   : > { %607 = vmax.xlane.f32.xlu2 %v606_v4  ;;  %v423_v4 = vld [vmem:[%s3846_s17 + $0x38] sm:$0xff]  ;;  %s3540_s17 = smov 36  }
  0x4e   : > { %vm457_vm0 = vcmp.ge.s32.totalorder %v441_v60, 0  ;;  %vm473_vm1 = vcmp.lt.s32.totalorder %v441_v60, 16 }
  0x4f   : > { %vm489_vm2 = vmand %vm457_vm0, %vm473_vm1  ;;  %vm2105_vm0 = vcmask 130048   ;;  %vm2138_vm1 = vcmask 162816  }
  0x50   : > { %v553_v7 = vsel %vm489_vm2, %v423_v4, 0.0  ;;  %v552_v31 = vsel %vm489_vm2, %v422_v27, 0.0  ;;  %vm2171_vm2 = vcmask 195584  }
  0x51   : > { %v648_v20 = vsel %vm554_vm5, %v553_v7, -inf  ;;  %v645_v0 = vsel %vm554_vm5, %v552_v31, -inf  ;;  %vm779_vm5 = vcmask 7168  }
  0x54   : > { %604 = vmax.xlane.f32.xlu1 %v603_v34  ;;  %601 = vmax.xlane.f32.xlu0 %v600_v35  ;;  %v3427_v34 = vpack.i.bf16 %v553_v7, %v552_v31 }
  0x55   : > { %616 = vmax.xlane.f32.xlu2 %v615_v56 }
  0x5c   : > { %613 = vmax.xlane.f32.xlu1 %v612_v13  ;;  %610 = vmax.xlane.f32.xlu0 %v609_v44 }
  0x5d   : > { %625 = vmax.xlane.f32.xlu2 %v624_v54 }
  0x64   : > { %622 = vmax.xlane.f32.xlu1 %v3840_v26  ;;  %619 = vmax.xlane.f32.xlu0 %v3862_v39 }
  0x65   : > { %634 = vmax.xlane.f32.xlu2 %v633_v55 }
  0x6c   : > { %631 = vmax.xlane.f32.xlu1 %v630_v8  ;;  %628 = vmax.xlane.f32.xlu0 %v627_v10 }
  0x6d   : > { %643 = vmax.xlane.f32.xlu2 %v642_v22 }
  0x74   : > { %640 = vmax.xlane.f32.xlu1 %v639_v33  ;;  %637 = vmax.xlane.f32.xlu0 %v636_v58 }
  0x7c   : > { %649 = vmax.xlane.f32.xlu1 %v648_v20  ;;  %646 = vmax.xlane.f32.xlu0 %v645_v0 }
  0x85   : > { %3353 = vrot.lane.b32.xlu2 %v3352_v46, %s3529_s10 }
  0x8d   : > { %3368 = vrot.lane.b32.xlu2 %v3367_v52, %s3529_s10 }
  0x90   : > { %3358 = vrot.lane.b32.xlu0 %v3357_v41, %s3529_s10 }
  0x95   : > { %3363 = vrot.lane.b32.xlu1 %v3362_v47, %s3529_s10  ;;  %3378 = vrot.lane.b32.xlu2 %v3377_v14, %s3529_s10 }
  0x96   : > { %v3944_v26 = vpop.xlane.xlu2 %580 }
  0x98   : > { %3373 = vrot.lane.b32.xlu0 %v3372_v17, %s3529_s10 }
  0x9d   : > { %3383 = vrot.lane.b32.xlu1 %v3382_v53, %s3529_s10  ;;  %3393 = vrot.lane.b32.xlu2 %v3392_v1, %s3529_s10 }
  0x9f   : > { %v3955_v28 = vpop.xlane.xlu1 %562  ;;  %v557_v29 = vpop.xlane.xlu0 %556 }
  0xa0   : > { %3388 = vrot.lane.b32.xlu0 %v3387_v3, %s3529_s10  ;;  %v3960_v11 = vpop.xlane.xlu2 %568 }
  0xa5   : > { %3398 = vrot.lane.b32.xlu1 %v3397_v21, %s3529_s10  ;;  %3408 = vrot.lane.b32.xlu2 %v3407_v25, %s3529_s10 }
  0xa7   : > { %v3968_v6 = vpop.xlane.xlu1 %565  ;;  %v560_v12 = vpop.xlane.xlu0 %559 }
  0xa8   : > { %3403 = vrot.lane.b32.xlu0 %v3402_v45, %s3529_s10  ;;  %v3973_v14 = vpop.xlane.xlu2 %571 }
  0xad   : > { %3413 = vrot.lane.b32.xlu1 %v3412_v15, %s3529_s10  ;;  %3423 = vrot.lane.b32.xlu2 %v3422_v32, %s3529_s10 }
  0xaf   : > { %v578_v16 = vpop.xlane.xlu1 %577  ;;  %v575_v17 = vpop.xlane.xlu0 %574 }
  0xb0   : > { %3418 = vrot.lane.b32.xlu0 %v3417_v59, %s3529_s10  ;;  %v590_v30 = vpop.xlane.xlu2 %589 }
  0xb5   : > { %3428 = vrot.lane.b32.xlu1 %v3427_v34, %s3529_s10  ;;  %s3541_s10 = smov 72  }
  0xb7   : > { %v3978_v37 = vpop.xlane.xlu0 %583  ;;  %v587_v42 = vpop.xlane.xlu1 %586 }
  0xb8   : > { %v3980_v41 = vpop.xlane.xlu2 %598 }
  0xbf   : > { %v3982_v43 = vpop.xlane.xlu0 %592  ;;  %v3986_v47 = vpop.xlane.xlu1 %595 }
  0xc0   : > { %v3984_v46 = vpop.xlane.xlu2 %607 }
  0xc7   : > { %v3988_v48 = vpop.xlane.xlu0 %601  ;;  %v3992_v50 = vpop.xlane.xlu1 %604 }
  0xc8   : > { %v3990_v49 = vpop.xlane.xlu2 %616 }
  0xcf   : > { %v3996_v52 = vpop.xlane.xlu0 %610  ;;  %v3998_v53 = vpop.xlane.xlu1 %613 }
  0xd0   : > { %v3994_v51 = vpop.xlane.xlu2 %625 }
  0xd7   : > { %v4002_v62 = vpop.xlane.xlu0 %619  ;;  %v4006_v1 = vpop.xlane.xlu1 %622 }
  0xd8   : > { %v4000_v61 = vpop.xlane.xlu2 %634 }
  0xdf   : > { %v4008_v2 = vpop.xlane.xlu0 %628  ;;  %v4010_v21 = vpop.xlane.xlu1 %631 }
  0xe0   : > { %v4004_v63 = vpop.xlane.xlu2 %643 }
  0xe7   : > { %v4014_v45 = vpop.xlane.xlu0 %637  ;;  %v4024_v56 = vpop.xlane.xlu1 %640 }
  0xe8   : > { %v3354_v3 = vpop.permute.xlu2 %3353 }
  0xe9   : > { %v3356_v18 = vunpack.i.h.bf16 %v3354_v3  ;;  %v3355_v19 = vunpack.i.l.bf16 %v3354_v3 }
  0xeb   : > { %v780_v23 = vsel %vm779_vm5, %v557_v29, %v3355_v19  ;;  %v781_v24 = vsel %vm779_vm5, %v560_v12, %v3356_v18 }
  0xec   : > { %v812_v25 = vpack.c.bf16 %v780_v23, %v780_v23  ;;  %v813_v36 = vpack.c.bf16 %v781_v24, %v781_v24 }
  0xee   : > { %v876_v38 = vunpack.c.l.b16 %v812_v25  ;;  %v877_v39 = vunpack.c.l.b16 %v813_v36 }
  0xef   : > { %v4036_v20 = vpop.xlane.xlu0 %646  ;;  %v4056_v25 = vpop.xlane.xlu1 %649 }
  0xf0   : > { %v908_v55 = vpack.c.b16 %v877_v39, %v876_v38  ;;  %v3369_v5 = vpop.permute.xlu2 %3368 }
  0xf1   : > { %v3371_v8 = vunpack.i.h.bf16 %v3369_v5  ;;  %v3370_v9 = vunpack.i.l.bf16 %v3369_v5 }
  0xf2   : > { %v924_v10 = vrot.slane %v908_v55, 6 }
  0xf3   : > { %v787_v15 = vsel %vm779_vm5, %v578_v16, %v3371_v8  ;;  %v786_v22 = vsel %vm779_vm5, %v575_v17, %v3370_v9 }
  0xf4   : > { %v4019_v32 = vsel %vm940_vm3, 0, %v924_v10  ;;  %v4022_v33 = vsel %vm940_vm3, %v924_v10, 0  ;;  %v819_v35 = vpack.c.bf16 %v787_v15, %v787_v15  ;;  %v818_v40 = vpack.c.bf16 %v786_v22, %v786_v22 }
  0xf5   : > { %6015 = vst [vmem:[#allocation5_spill] sm:$0xff] %v4019_v32  ;;  %v4027_v57 = vshll.u32 %v4019_v32, 16  ;;  %v4030_v58 = vshll.u32 %v4022_v33, 16  ;;  %v4033_v4 = vshrl.u32 %v4019_v32, 16 }
  0xf6   : > { %6016 = vst [vmem:[#allocation6_spill] sm:$0xff] %v4022_v33  ;;  %v883_v59 = vunpack.c.l.b16 %v819_v35  ;;  %v882_v60 = vunpack.c.l.b16 %v818_v40 }
  0xf7   : > { %6017 = vst [vmem:[#allocation7_spill] sm:$0xff] %v4027_v57  ;;  %v995_v7 = vrot.slane %v4027_v57, 1  ;;  %v999_v0 = vrot.slane %v4030_v58, 1 }
  0xf8   : > { %6018 = vst [vmem:[#allocation8_spill] sm:$0xff] %v4030_v58  ;;  %v911_v13 = vpack.c.b16 %v883_v59, %v882_v60  ;;  %v3379_v44 = vpop.permute.xlu2 %3378 }
  0xf9   : > { %6019 = vst [vmem:[#allocation9_spill] sm:$0xff] %v4033_v4  ;;  %v3381_v27 = vunpack.i.h.bf16 %v3379_v44  ;;  %v3380_v54 = vunpack.i.l.bf16 %v3379_v44  ;;  %v996_v31 = vor.u32 %v995_v7, %v4033_v4 }
  0xfa   : > { %v927_v34 = vrot.slane %v911_v13, 6 }
  0xfb   : > { %v791_v29 = vsel %vm779_vm5, %v590_v30, %v3381_v27  ;;  %v790_v12 = vsel %vm779_vm5, %v587_v42, %v3380_v54  ;;  %v1000_v16 = vsel %vm990_vm4, %v996_v31, %v999_v0 }
  0xfc   : > { %v4044_v17 = vsel %vm940_vm3, 0, %v927_v34  ;;  %v4047_v3 = vsel %vm940_vm3, %v927_v34, 0  ;;  %v823_v18 = vpack.c.bf16 %v791_v29, %v791_v29  ;;  %v822_v19 = vpack.c.bf16 %v790_v12, %v790_v12  ;;  %1151 = vrot.lane.b32.xlu0 %v1000_v16, %s5981_s26 }
  0xfd   : > { %6020 = vst [vmem:[#allocation10_spill] sm:$0xff] %v4044_v17  ;;  %v4051_v23 = vshll.u32 %v4044_v17, 16  ;;  %v4054_v42 = vshll.u32 %v4047_v3, 16  ;;  %v4059_v36 = vshrl.u32 %v4044_v17, 16 }
  0xfe   : > { %v887_v24 = vunpack.c.l.b16 %v823_v18  ;;  %v886_v30 = vunpack.c.l.b16 %v822_v19 }
  0xff   : > { %6021 = vst [vmem:[#allocation11_spill] sm:$0xff] %v4051_v23  ;;  %v1025_v38 = vrot.slane %v4051_v23, 1  ;;  %v1029_v22 = vrot.slane %v4054_v42, 1 }
 0x100   : > { %6022 = vst [vmem:[#allocation12_spill] sm:$0xff] %v4054_v42  ;;  %v913_v39 = vpack.c.b16 %v887_v24, %v886_v30  ;;  %v3394_v55 = vpop.permute.xlu2 %3393 }
 0x101   : > { %6023 = vst [vmem:[#allocation13_spill] sm:$0xff] %v4059_v36  ;;  %v3396_v5 = vunpack.i.h.bf16 %v3394_v55  ;;  %v3395_v8 = vunpack.i.l.bf16 %v3394_v55  ;;  %v1026_v9 = vor.u32 %v1025_v38, %v4059_v36 }
 0x102   : > { %v929_v10 = vrot.slane %v913_v39, 6  ;;  %v3359_v15 = vpop.permute.xlu0 %3358 }
 0x103   : > { %v797_v35 = vsel %vm779_vm5, %v3984_v46, %v3396_v5  ;;  %v796_v40 = vsel %vm779_vm5, %v3992_v50, %v3395_v8  ;;  %v3361_v59 = vunpack.i.h.bf16 %v3359_v15  ;;  %v3360_v60 = vunpack.i.l.bf16 %v3359_v15 }
 0x104   : > { %v4069_v7 = vsel %vm940_vm3, 0, %v929_v10  ;;  %v829_v13 = vpack.c.bf16 %v797_v35, %v797_v35  ;;  %v828_v44 = vpack.c.bf16 %v796_v40, %v796_v40  ;;  %v1030_v31 = vsel %vm990_vm4, %v1026_v9, %v1029_v22 }
 0x105   : > { %6024 = vst [vmem:[#allocation14_spill] sm:$0xff] %v4069_v7  ;;  %v783_v27 = vsel %vm779_vm5, %v3968_v6, %v3361_v59  ;;  %v782_v54 = vsel %vm779_vm5, %v3955_v28, %v3360_v60  ;;  %1157 = vrot.lane.b32.xlu0 %v1030_v31, %s5981_s26  ;;  %v4078_v50 = vsel %vm940_vm3, %v929_v10, 0  ;;  %v4081_v16 = vshll.u32 %v4069_v7, 16 }
 0x106   : > { %v893_v0 = vunpack.c.l.b16 %v829_v13  ;;  %v892_v46 = vunpack.c.l.b16 %v828_v44  ;;  %v815_v34 = vpack.c.bf16 %v783_v27, %v783_v27  ;;  %v814_v29 = vpack.c.bf16 %v782_v54, %v782_v54  ;;  %6025 = vst [vmem:[#allocation15_spill] sm:$0xff] %v4078_v50 }
 0x107   : > { %v3364_v12 = vpop.permute.xlu1 %3363  ;;  %6026 = vst [vmem:[#allocation16_spill] sm:$0xff] %v4081_v16  ;;  %v4086_v10 = vshll.u32 %v4078_v50, 16  ;;  %v4095_v13 = vshrl.u32 %v4069_v7, 16 }
 0x108   : > { %v916_v18 = vpack.c.b16 %v893_v0, %v892_v46  ;;  %v879_v6 = vunpack.c.l.b16 %v815_v34  ;;  %v878_v19 = vunpack.c.l.b16 %v814_v29  ;;  %v3366_v24 = vunpack.i.h.bf16 %v3364_v12  ;;  %v3409_v28 = vpop.permute.xlu2 %3408 }
 0x109   : > { %v3365_v30 = vunpack.i.l.bf16 %v3364_v12  ;;  %v3411_v38 = vunpack.i.h.bf16 %v3409_v28  ;;  %v3410_v39 = vunpack.i.l.bf16 %v3409_v28  ;;  %6027 = vst [vmem:[#allocation17_spill] sm:$0xff] %v4086_v10 }
 0x10a   : > { %v932_v55 = vrot.slane %v916_v18, 6  ;;  %v909_v5 = vpack.c.b16 %v879_v6, %v878_v19  ;;  %v785_v8 = vsel %vm779_vm5, %v3973_v14, %v3366_v24  ;;  %v3374_v9 = vpop.permute.xlu0 %3373  ;;  %6028 = vst [vmem:[#allocation18_spill] sm:$0xff] %v4095_v13 }
 0x10b   : > { %v817_v15 = vpack.c.bf16 %v785_v8, %v785_v8  ;;  %v784_v22 = vsel %vm779_vm5, %v3960_v11, %v3365_v30  ;;  %v803_v35 = vsel %vm779_vm5, %v3994_v51, %v3411_v38  ;;  %v802_v40 = vsel %vm779_vm5, %v4006_v1, %v3410_v39 }
 0x10c   : > { %v925_v59 = vrot.slane %v909_v5, 6  ;;  %v816_v60 = vpack.c.bf16 %v784_v22, %v784_v22  ;;  %v835_v27 = vpack.c.bf16 %v803_v35, %v803_v35  ;;  %v834_v54 = vpack.c.bf16 %v802_v40, %v802_v40 }
 0x10d   : > { %v881_v44 = vunpack.c.l.b16 %v817_v15  ;;  %v3376_v31 = vunpack.i.h.bf16 %v3374_v9  ;;  %v4099_v0 = vsel %vm940_vm3, 0, %v932_v55  ;;  %v3375_v46 = vunpack.i.l.bf16 %v3374_v9 }
 0x10e   : > { %v880_v11 = vunpack.c.l.b16 %v816_v60  ;;  %v4103_v1 = vsel %vm940_vm3, 0, %v925_v59  ;;  %v899_v34 = vunpack.c.l.b16 %v835_v27  ;;  %v898_v29 = vunpack.c.l.b16 %v834_v54 }
 0x10f   : > { %v789_v12 = vsel %vm779_vm5, %v3978_v37, %v3376_v31  ;;  %v3384_v18 = vpop.permute.xlu1 %3383  ;;  %v788_v24 = vsel %vm779_vm5, %v3944_v26, %v3375_v46  ;;  %v4112_v37 = vsel %vm940_vm3, %v932_v55, 0  ;;  %v4117_v27 = vsel %vm940_vm3, %v925_v59, 0 }
 0x110   : > { %v910_v6 = vpack.c.b16 %v881_v44, %v880_v11  ;;  %v821_v19 = vpack.c.bf16 %v789_v12, %v789_v12  ;;  %v3386_v28 = vunpack.i.h.bf16 %v3384_v18  ;;  %v3424_v30 = vpop.permute.xlu2 %3423  ;;  %v919_v38 = vpack.c.b16 %v899_v34, %v898_v29 }
 0x111   : > { %v820_v39 = vpack.c.bf16 %v788_v24, %v788_v24  ;;  %v3385_v5 = vunpack.i.l.bf16 %v3384_v18  ;;  %v3426_v8 = vunpack.i.h.bf16 %v3424_v30  ;;  %v3425_v35 = vunpack.i.l.bf16 %v3424_v30 }
 0x112   : > { %v926_v9 = vrot.slane %v910_v6, 6  ;;  %v885_v15 = vunpack.c.l.b16 %v821_v19  ;;  %v793_v22 = vsel %vm779_vm5, %v3986_v47, %v3386_v28  ;;  %v3389_v40 = vpop.permute.xlu0 %3388  ;;  %v4122_v11 = vshrl.u32 %v4103_v1, 16 }
 0x113   : > { %v884_v60 = vunpack.c.l.b16 %v820_v39  ;;  %v825_v44 = vpack.c.bf16 %v793_v22, %v793_v22  ;;  %v792_v26 = vsel %vm779_vm5, %v3982_v43, %v3385_v5  ;;  %v809_v31 = vsel %vm779_vm5, %v4004_v63, %v3426_v8 }
 0x114   : > { %v824_v54 = vpack.c.bf16 %v792_v26, %v792_v26  ;;  %6029 = vst [vmem:[#allocation19_spill] sm:$0xff] %v4122_v11  ;;  %v4125_v47 = vsel %vm940_vm3, 0, %v926_v9  ;;  %v935_v55 = vrot.slane %v919_v38, 6  ;;  %v841_v12 = vpack.c.bf16 %v809_v31, %v809_v31 }
 0x115   : > { %v912_v46 = vpack.c.b16 %v885_v15, %v884_v60  ;;  %v889_v34 = vunpack.c.l.b16 %v825_v44  ;;  %v808_v43 = vsel %vm779_vm5, %v4024_v56, %v3425_v35  ;;  %v3391_v59 = vunpack.i.h.bf16 %v3389_v40 }
 0x116   : > { %v888_v29 = vunpack.c.l.b16 %v824_v54  ;;  %v840_v6 = vpack.c.bf16 %v808_v43, %v808_v43  ;;  %v3390_v19 = vunpack.i.l.bf16 %v3389_v40  ;;  %v4130_v63 = vshll.u32 %v4103_v1, 16 }
 0x117   : > { %v928_v18 = vrot.slane %v912_v46, 6  ;;  %v905_v28 = vunpack.c.l.b16 %v841_v12  ;;  %v795_v30 = vsel %vm779_vm5, %v3988_v48, %v3391_v59  ;;  %v4135_v38 = vshll.u32 %v4117_v27, 16  ;;  %v3399_v39 = vpop.permute.xlu1 %3398 }
 0x118   : > { %6030 = vst [vmem:[#allocation20_spill] sm:$0xff] %v4130_v63  ;;  %v914_v24 = vpack.c.b16 %v889_v34, %v888_v29  ;;  %v4138_v5 = vsel %vm940_vm3, %v926_v9, 0  ;;  %v4141_v56 = vsel %vm940_vm3, 0, %v935_v55  ;;  %v904_v8 = vunpack.c.l.b16 %v840_v6 }
 0x119   : > { %6031 = vst [vmem:[#allocation21_spill] sm:$0xff] %v4135_v38  ;;  %v827_v15 = vpack.c.bf16 %v795_v30, %v795_v30  ;;  %v4144_v22 = vsel %vm940_vm3, %v935_v55, 0  ;;  %v4147_v35 = vsel %vm940_vm3, 0, %v928_v18  ;;  %v794_v48 = vsel %vm779_vm5, %v3980_v41, %v3390_v19 }
 0x11a   : > { %6032 = vst [vmem:[#allocation22_spill] sm:$0xff] %v4141_v56  ;;  %v1005_v40 = vrot.slane %v4130_v63, 1  ;;  %v3404_v60 = vpop.permute.xlu0 %3403  ;;  %v930_v44 = vrot.slane %v914_v24, 6  ;;  %v826_v26 = vpack.c.bf16 %v794_v48, %v794_v48  ;;  %v3401_v54 = vunpack.i.h.bf16 %v3399_v39 }
 0x11b   : > { %6033 = vst [vmem:[#allocation23_spill] sm:$0xff] %v4144_v22  ;;  %v891_v9 = vunpack.c.l.b16 %v827_v15  ;;  %v922_v31 = vpack.c.b16 %v905_v28, %v904_v8  ;;  %v1009_v34 = vrot.slane %v4135_v38, 1  ;;  %v3400_v55 = vunpack.i.l.bf16 %v3399_v39 }
 0x11c   : > { %6034 = vst [vmem:[#allocation24_spill] sm:$0xff] %v4147_v35  ;;  %v1006_v46 = vor.u32 %v1005_v40, %v4122_v11  ;;  %v4155_v29 = vsel %vm940_vm3, %v928_v18, 0  ;;  %v890_v12 = vunpack.c.l.b16 %v826_v26  ;;  %v799_v41 = vsel %vm779_vm5, %v3998_v53, %v3401_v54 }
 0x11d   : > { %6035 = vst [vmem:[#allocation25_spill] sm:$0xff] %v4155_v29  ;;  %v3406_v43 = vunpack.i.h.bf16 %v3404_v60  ;;  %v831_v6 = vpack.c.bf16 %v799_v41, %v799_v41  ;;  %v798_v19 = vsel %vm779_vm5, %v3996_v52, %v3400_v55  ;;  %v3405_v24 = vunpack.i.l.bf16 %v3404_v60 }
 0x11e   : > { %v1010_v59 = vsel %vm990_vm4, %v1006_v46, %v1009_v34  ;;  %v4163_v28 = vsel %vm940_vm3, 0, %v930_v44  ;;  %v4166_v30 = vsel %vm940_vm3, %v930_v44, 0  ;;  %v915_v18 = vpack.c.b16 %v891_v9, %v890_v12 }
 0x11f   : > { %6036 = vst [vmem:[#allocation26_spill] sm:$0xff] %v4163_v28  ;;  %1153 = vrot.lane.b32.xlu2 %v1010_v59, %s5981_s26  ;;  %v830_v39 = vpack.c.bf16 %v798_v19, %v798_v19  ;;  %v4169_v8 = vrot.slane %v922_v31, 6  ;;  %v895_v53 = vunpack.c.l.b16 %v831_v6  ;;  %v801_v15 = vsel %vm779_vm5, %v4002_v62, %v3406_v43  ;;  %v3414_v62 = vpop.permute.xlu1 %3413 }
 0x120   : > { %6037 = vst [vmem:[#allocation27_spill] sm:$0xff] %v4166_v30  ;;  %v800_v52 = vsel %vm779_vm5, %v3990_v49, %v3405_v24  ;;  %v931_v48 = vrot.slane %v915_v18, 6  ;;  %v833_v60 = vpack.c.bf16 %v801_v15, %v801_v15  ;;  %v4176_v44 = vshrl.u32 %v4125_v47, 16 }
 0x121   : > { %v894_v40 = vunpack.c.l.b16 %v830_v39  ;;  %v832_v26 = vpack.c.bf16 %v800_v52, %v800_v52  ;;  %v4179_v9 = vshll.u32 %v4125_v47, 16  ;;  %v4182_v54 = vshll.u32 %v4138_v5, 16 }
 0x122   : > { %6038 = vst [vmem:[#allocation28_spill] sm:$0xff] %v4176_v44  ;;  %v4185_v31 = vshll.u32 %v4147_v35, 16  ;;  %v4188_v46 = vsel %vm940_vm3, 0, %v931_v48  ;;  %v897_v34 = vunpack.c.l.b16 %v833_v60  ;;  %v4191_v55 = vshrl.u32 %v4147_v35, 16  ;;  %v3419_v12 = vpop.permute.xlu0 %3418 }
 0x123   : > { %6039 = vst [vmem:[#allocation29_spill] sm:$0xff] %v4179_v9  ;;  %v917_v49 = vpack.c.b16 %v895_v53, %v894_v40  ;;  %v896_v41 = vunpack.c.l.b16 %v832_v26  ;;  %v1015_v43 = vrot.slane %v4179_v9, 1  ;;  %v1019_v59 = vrot.slane %v4182_v54, 1 }
 0x124   : > { %6040 = vst [vmem:[#allocation30_spill] sm:$0xff] %v4182_v54  ;;  %v1035_v6 = vrot.slane %v4185_v31, 1  ;;  %v4197_v24 = vshll.u32 %v4155_v29, 16  ;;  %v3416_v18 = vunpack.i.h.bf16 %v3414_v62  ;;  %v3415_v39 = vunpack.i.l.bf16 %v3414_v62 }
 0x125   : > { %6041 = vst [vmem:[#allocation31_spill] sm:$0xff] %v4185_v31  ;;  %v933_v19 = vrot.slane %v917_v49, 6  ;;  %v918_v15 = vpack.c.b16 %v897_v34, %v896_v41  ;;  %v1016_v53 = vor.u32 %v1015_v43, %v4176_v44  ;;  %v3421_v40 = vunpack.i.h.bf16 %v3419_v12 }
 0x126   : > { %6042 = vst [vmem:[#allocation32_spill] sm:$0xff] %v4191_v55  ;;  %v1036_v52 = vor.u32 %v1035_v6, %v4191_v55  ;;  %v4202_v60 = vsel %vm940_vm3, %v931_v48, 0  ;;  %v1039_v51 = vrot.slane %v4197_v24, 1  ;;  %v805_v49 = vsel %vm779_vm5, %v4010_v21, %v3416_v18 }
 0x127   : > { %6043 = vst [vmem:[#allocation33_spill] sm:$0xff] %v4197_v24  ;;  %v4205_v26 = vsel %vm940_vm3, 0, %v933_v19  ;;  %v934_v14 = vrot.slane %v918_v15, 6  ;;  %v1020_v62 = vsel %vm990_vm4, %v1016_v53, %v1019_v59  ;;  %v837_v34 = vpack.c.bf16 %v805_v49, %v805_v49 }
 0x128   : > { %6044 = vst [vmem:[#allocation34_spill] sm:$0xff] %v4205_v26  ;;  %v804_v41 = vsel %vm779_vm5, %v4008_v2, %v3415_v39  ;;  %1155 = vrot.lane.b32.xlu1 %v1020_v62, %s5981_s26  ;;  %v1040_v48 = vsel %vm990_vm4, %v1036_v52, %v1039_v51  ;;  %v807_v6 = vsel %vm779_vm5, %v4014_v45, %v3421_v40  ;;  %v3420_v31 = vunpack.i.l.bf16 %v3419_v12  ;;  %v3429_v40 = vpop.permute.xlu1 %3428 }
 0x129   : > { %v836_v43 = vpack.c.bf16 %v804_v41, %v804_v41  ;;  %v4218_v24 = vsel %vm940_vm3, %v933_v19, 0  ;;  %v4221_v21 = vsel %vm940_vm3, 0, %v934_v14  ;;  %1159 = vrot.lane.b32.xlu2 %v1040_v48, %s5981_s26  ;;  %v901_v59 = vunpack.c.l.b16 %v837_v34 }
 0x12a   : > { %6045 = vst [vmem:[#allocation35_spill] sm:$0xff] %v4218_v24  ;;  %v839_v18 = vpack.c.bf16 %v807_v6, %v807_v6  ;;  %v4225_v2 = vsel %vm940_vm3, %v934_v14, 0  ;;  %v806_v51 = vsel %vm779_vm5, %v4000_v61, %v3420_v31  ;;  %v6048_v45 = vrot.slane %v4081_v16, 1 }
 0x12b   : > { %6046 = vst [vmem:[#allocation36_spill] sm:$0xff] %v4221_v21  ;;  %v900_v39 = vunpack.c.l.b16 %v836_v43  ;;  %v838_v15 = vpack.c.bf16 %v806_v51, %v806_v51  ;;  %v4233_v53 = vshll.u32 %v4163_v28, 16  ;;  %v4236_v52 = vshll.u32 %v4166_v30, 16 }
 0x12c   : > { %6047 = vst [vmem:[#allocation37_spill] sm:$0xff] %v4225_v2  ;;  %v1046_v12 = vor.u32 %v6048_v45, %v4095_v13  ;;  %v903_v19 = vunpack.c.l.b16 %v839_v18  ;;  %v6051_v14 = vrot.slane %v4086_v10, 1  ;;  %v4242_v61 = vshrl.u32 %v4163_v28, 16 }
 0x12d   : > { %6049 = vst [vmem:[#allocation38_spill] sm:$0xff] %v4233_v53  ;;  %v920_v49 = vpack.c.b16 %v901_v59, %v900_v39  ;;  %v4245_v31 = vshll.u32 %v4188_v46, 16  ;;  %v902_v34 = vunpack.c.l.b16 %v838_v15  ;;  %v1055_v41 = vrot.slane %v4233_v53, 1 }
 0x12e   : > { %6050 = vst [vmem:[#allocation39_spill] sm:$0xff] %v4236_v52  ;;  %v1050_v62 = vsel %vm990_vm4, %v1046_v12, %v6051_v14  ;;  %v4249_v48 = vshrl.u32 %v4188_v46, 16  ;;  %v4252_v43 = vshll.u32 %v4202_v60, 16  ;;  %v3431_v18 = vunpack.i.h.bf16 %v3429_v40 }
 0x12f   : > { %6052 = vst [vmem:[#allocation40_spill] sm:$0xff] %v4242_v61  ;;  %v936_v6 = vrot.slane %v920_v49, 6  ;;  %v1065_v59 = vrot.slane %v4245_v31, 1  ;;  %v3430_v39 = vunpack.i.l.bf16 %v3429_v40  ;;  %v921_v51 = vpack.c.b16 %v903_v19, %v902_v34 }
 0x130   : > { %6053 = vst [vmem:[#allocation41_spill] sm:$0xff] %v4245_v31  ;;  %v1056_v45 = vor.u32 %v1055_v41, %v4242_v61  ;;  %v1059_v12 = vrot.slane %v4236_v52, 1  ;;  %v1069_v15 = vrot.slane %v4252_v43, 1  ;;  %1161 = vrot.lane.b32.xlu1 %v1050_v62, %s5981_s26  ;;  %v811_v49 = vsel %vm779_vm5, %v4056_v25, %v3431_v18 }
 0x131   : > { %6054 = vst [vmem:[#allocation42_spill] sm:$0xff] %v4249_v48  ;;  %v4259_v14 = vsel %vm940_vm3, 0, %v936_v6  ;;  %v1066_v53 = vor.u32 %v1065_v59, %v4249_v48  ;;  %v4266_v31 = vshrl.u32 %v4099_v0, 16  ;;  %v937_v19 = vrot.slane %v921_v51, 6 }
 0x132   : > { %6055 = vst [vmem:[#allocation43_spill] sm:$0xff] %v4252_v43  ;;  %v1060_v40 = vsel %vm990_vm4, %v1056_v45, %v1059_v12  ;;  %v843_v34 = vpack.c.bf16 %v811_v49, %v811_v49  ;;  %v810_v41 = vsel %vm779_vm5, %v4036_v20, %v3430_v39  ;;  %v4274_v59 = vshll.u32 %v4099_v0, 16 }
 0x133   : > { %6056 = vst [vmem:[#allocation44_spill] sm:$0xff] %v4259_v14  ;;  %1163 = vrot.lane.b32.xlu0 %v1060_v40, %s5981_s26  ;;  %v1070_v43 = vsel %vm990_vm4, %v1066_v53, %v1069_v15  ;;  %v842_v62 = vpack.c.bf16 %v810_v41, %v810_v41  ;;  %v4277_v25 = vshll.u32 %v4112_v37, 16  ;;  %v4280_v18 = vsel %vm940_vm3, %v936_v6, 0 }
 0x134   : > { %6057 = vst [vmem:[#allocation45_spill] sm:$0xff] %v4266_v31  ;;  %v4283_v51 = vsel %vm940_vm3, 0, %v937_v19  ;;  %v4286_v45 = vsel %vm940_vm3, %v937_v19, 0  ;;  %1165 = vrot.lane.b32.xlu2 %v1070_v43, %s5981_s26  ;;  %v907_v20 = vunpack.c.l.b16 %v843_v34  ;;  %v1075_v39 = vrot.slane %v4274_v59, 1 }
 0x135   : > { %6058 = vst [vmem:[#allocation46_spill] sm:$0xff] %v4274_v59  ;;  %v906_v53 = vunpack.c.l.b16 %v842_v62  ;;  %v4291_v12 = vshrl.u32 %v4205_v26, 16  ;;  %v4294_v15 = vshll.u32 %v4205_v26, 16  ;;  %v1079_v6 = vrot.slane %v4277_v25, 1 }
 0x136   : > { %6059 = vst [vmem:[#allocation47_spill] sm:$0xff] %v4277_v25  ;;  %v4298_v49 = vshll.u32 %v4218_v24, 16  ;;  %v4301_v19 = vshll.u32 %v4221_v21, 16  ;;  %v4304_v43 = vshll.u32 %v4225_v2, 16  ;;  %v1076_v34 = vor.u32 %v1075_v39, %v4266_v31 }
 0x137   : > { %6060 = vst [vmem:[#allocation48_spill] sm:$0xff] %v4280_v18  ;;  %v923_v40 = vpack.c.b16 %v907_v20, %v906_v53  ;;  %v1085_v41 = vrot.slane %v4294_v15, 1  ;;  %v4309_v62 = vshrl.u32 %v4221_v21, 16  ;;  %v4314_v48 = vshrl.u32 %v4141_v56, 16 }
 0x138   : > { %6061 = vst [vmem:[#allocation49_spill] sm:$0xff] %v4283_v51  ;;  %v1089_v59 = vrot.slane %v4298_v49, 1  ;;  %v1095_v25 = vrot.slane %v4301_v19, 1  ;;  %v4317_v52 = vshll.u32 %v4141_v56, 16  ;;  %v1080_v20 = vsel %vm990_vm4, %v1076_v34, %v1079_v6 }
 0x139   : > { %6062 = vst [vmem:[#allocation50_spill] sm:$0xff] %v4286_v45  ;;  %v939_v61 = vrot.slane %v923_v40, 6  ;;  %v1086_v53 = vor.u32 %v1085_v41, %v4291_v12  ;;  %v1099_v39 = vrot.slane %v4304_v43, 1  ;;  %1167 = vrot.lane.b32.xlu1 %v1080_v20, %s5981_s26  ;;  %v4329_v31 = vshll.u32 %v4259_v14, 16 }
 0x13a   : > { %6063 = vst [vmem:[#allocation51_spill] sm:$0xff] %v4291_v12  ;;  %v4333_v40 = vsel %vm940_vm3, 0, %v4169_v8  ;;  %v4337_v34 = vshrl.u32 %v4259_v14, 16  ;;  %vm2204_vm5 = vcmask 228352  }
 0x13b   : > { %6064 = vst [vmem:[#allocation52_spill] sm:$0xff] %v4294_v15  ;;  %v1096_v15 = vor.u32 %v1095_v25, %v4309_v62  ;;  %v1090_v6 = vsel %vm990_vm4, %v1086_v53, %v1089_v59  ;;  %v1115_v20 = vrot.slane %v4329_v31, 1  ;;  %v4351_v59 = vshll.u32 %v4283_v51, 16 }
 0x13c   : > { %6065 = vst [vmem:[#allocation53_spill] sm:$0xff] %v4298_v49  ;;  %v1105_v49 = vrot.slane %v4317_v52, 1  ;;  %1169 = vrot.lane.b32.xlu0 %v1090_v6, %s5981_s26  ;;  %v4354_v53 = vshll.u32 %v4286_v45, 16 }
 0x13d   : > { %6066 = vst [vmem:[#allocation54_spill] sm:$0xff] %v4301_v19  ;;  %v4326_v19 = vshll.u32 %v4144_v22, 16  ;;  %v1100_v25 = vsel %vm990_vm4, %v1096_v15, %v1099_v39  ;;  %v4359_v39 = vshll.u32 %v4333_v40, 16 }
 0x13e   : > { %6067 = vst [vmem:[#allocation55_spill] sm:$0xff] %v4304_v43  ;;  %v1106_v41 = vor.u32 %v1105_v49, %v4314_v48  ;;  %v4347_v43 = vsel %vm940_vm3, 0, %v939_v61  ;;  %1171 = vrot.lane.b32.xlu2 %v1100_v25, %s5981_s26  ;;  %v1116_v49 = vor.u32 %v1115_v20, %v4337_v34  ;;  %v1125_v25 = vrot.slane %v4351_v59, 1 }
 0x13f   : > { %6068 = vst [vmem:[#allocation56_spill] sm:$0xff] %v4309_v62  ;;  %v1109_v15 = vrot.slane %v4326_v19, 1  ;;  %v4371_v62 = vsel %vm940_vm3, %v939_v61, 0  ;;  %v4375_v20 = vshll.u32 %v4347_v43, 16  ;;  %v1129_v12 = vrot.slane %v4354_v53, 1 }
 0x140   : > { %6069 = vst [vmem:[#allocation57_spill] sm:$0xff] %v4314_v48  ;;  %v4368_v48 = vsel %vm940_vm3, %v4169_v8, 0  ;;  %v4383_v8 = vshrl.u32 %v4333_v40, 16 }
 0x141   : > { %6070 = vst [vmem:[#allocation58_spill] sm:$0xff] %v4317_v52  ;;  %v4344_v52 = vshll.u32 %v4280_v18, 16  ;;  %v1145_v61 = vrot.slane %v4375_v20, 1 }
 0x142   : > { %6071 = vst [vmem:[#allocation59_spill] sm:$0xff] %v4326_v19  ;;  %v1110_v19 = vsel %vm990_vm4, %v1106_v41, %v1109_v15  ;;  %v4388_v15 = vshll.u32 %v4368_v48, 16 }
 0x143   : > { %6072 = vst [vmem:[#allocation60_spill] sm:$0xff] %v4329_v31  ;;  %v1119_v6 = vrot.slane %v4344_v52, 1  ;;  %v4363_v31 = vshrl.u32 %v4283_v51, 16  ;;  %1173 = vrot.lane.b32.xlu1 %v1110_v19, %s5981_s26 }
 0x144   : > { %6073 = vst [vmem:[#allocation61_spill] sm:$0xff] %v4333_v40 }
 0x145   : > { %6074 = vst [vmem:[#allocation62_spill] sm:$0xff] %v4337_v34  ;;  %v1120_v34 = vsel %vm990_vm4, %v1116_v49, %v1119_v6  ;;  %v4391_v49 = vshrl.u32 %v4347_v43, 16  ;;  %v4394_v6 = vshll.u32 %v4371_v62, 16 }
 0x146   : > { %6075 = vst [vmem:[#allocation63_spill] sm:$0xff] %v4344_v52  ;;  %v1126_v52 = vor.u32 %v1125_v25, %v4363_v31  ;;  %1175 = vrot.lane.b32.xlu0 %v1120_v34, %s5981_s26 }
 0x147   : > { %6076 = vst [vmem:[#allocation64_spill] sm:$0xff] %v4347_v43  ;;  %v1146_v25 = vor.u32 %v1145_v61, %v4391_v49  ;;  %v1220_v61 = vrot.slane %v4117_v27, 1 }
 0x148   : > { %6077 = vst [vmem:[#allocation65_spill] sm:$0xff] %v4351_v59  ;;  %v1135_v59 = vrot.slane %v4359_v39, 1  ;;  %v1130_v41 = vsel %vm990_vm4, %v1126_v52, %v1129_v12  ;;  %v1149_v52 = vrot.slane %v4394_v6, 1  ;;  %v1216_v12 = vrot.slane %v4019_v32, 1 }
 0x149   : > { %6078 = vst [vmem:[#allocation66_spill] sm:$0xff] %v4354_v53  ;;  %1177 = vrot.lane.b32.xlu2 %v1130_v41, %s5981_s26  ;;  %v1222_v41 = vrot.slane %v4125_v47, 1 }
 0x14a   : > { %6079 = vst [vmem:[#allocation67_spill] sm:$0xff] %v4359_v39  ;;  %v1136_v19 = vor.u32 %v1135_v59, %v4383_v8  ;;  %v1217_v39 = vrot.slane %v4022_v33, 1  ;;  %v1219_v59 = vrot.slane %v4103_v1, 1 }
 0x14b   : > { %6080 = vst [vmem:[#allocation68_spill] sm:$0xff] %v4363_v31  ;;  %v1150_v31 = vsel %vm990_vm4, %v1146_v25, %v1149_v52  ;;  %v1226_v25 = vrot.slane %v4047_v3, 1  ;;  %v1228_v52 = vrot.slane %v4147_v35, 1 }
 0x14c   : > { %6081 = vst [vmem:[#allocation69_spill] sm:$0xff] %v4368_v48  ;;  %v1218_v34 = vsel %vm1215_vm6, %v1216_v12, %v1217_v39  ;;  %v1229_v12 = vrot.slane %v4155_v29, 1 }
 0x14d   : > { %6082 = vst [vmem:[#allocation70_spill] sm:$0xff] %v4371_v62 }
 0x14e   : > { %6083 = vst [vmem:[#allocation71_spill] sm:$0xff] %v4375_v20  ;;  %v1139_v20 = vrot.slane %v4388_v15, 1  ;;  %1181 = vrot.lane.b32.xlu0 %v1150_v31, %s5981_s26 }
 0x14f   : > { %6084 = vst [vmem:[#allocation72_spill] sm:$0xff] %v4383_v8 }
 0x150   : > { %6085 = vst [vmem:[#allocation73_spill] sm:$0xff] %v4388_v15  ;;  %v1140_v53 = vsel %vm990_vm4, %v1136_v19, %v1139_v20  ;;  %v1223_v20 = vrot.slane %v4138_v5, 1  ;;  %v1225_v19 = vrot.slane %v4044_v17, 1  ;;  %v1232_v17 = vrot.slane %v4078_v50, 1 }
 0x151   : > { %6086 = vst [vmem:[#allocation74_spill] sm:$0xff] %v4391_v49  ;;  %1179 = vrot.lane.b32.xlu1 %v1140_v53, %s5981_s26  ;;  %1264 = vrot.lane.b32.xlu2 %v1218_v34, %s3531_s27  ;;  %v1221_v53 = vsel %vm1215_vm6, %v1219_v59, %v1220_v61  ;;  %v1231_v34 = vrot.slane %v4069_v7, 1  ;;  %v1234_v59 = vrot.slane %v4163_v28, 1  ;;  %v1235_v61 = vrot.slane %v4166_v30, 1  ;;  %s6323_s26 = smov 52  }
 0x152   : > { %6087 = vst [vmem:[#allocation75_spill] sm:$0xff] %v4394_v6  ;;  %v1224_v31 = vsel %vm1215_vm6, %v1222_v41, %v1223_v20  ;;  %v1227_v39 = vsel %vm1215_vm6, %v1225_v19, %v1226_v25  ;;  %v1230_v41 = vsel %vm1215_vm6, %v1228_v52, %v1229_v12  ;;  %v1237_v25 = vrot.slane %v4188_v46, 1 }
 0x153   : > { %v1233_v20 = vsel %vm1215_vm6, %v1231_v34, %v1232_v17  ;;  %v1236_v19 = vsel %vm1215_vm6, %v1234_v59, %v1235_v61  ;;  %v1243_v52 = vrot.slane %v4205_v26, 1  ;;  %v1244_v12 = vrot.slane %v4218_v24, 1 }
 0x154   : > { %v1246_v61 = vrot.slane %v4221_v21, 1  ;;  %vm2237_vm4 = vcmask 261120  }
 0x155   : > { %v1245_v59 = vsel %vm1215_vm6, %v1243_v52, %v1244_v12  ;;  %v1258_v12 = vrot.slane %v4333_v40, 1 }
 0x156   : > { %1268 = vrot.lane.b32.xlu0 %v1224_v31, %s3531_s27  ;;  %v1240_v31 = vrot.slane %v4099_v0, 1 }
 0x159   : > { %1266 = vrot.lane.b32.xlu1 %v1221_v53, %s3531_s27  ;;  %1270 = vrot.lane.b32.xlu2 %v1227_v39, %s3531_s27  ;;  %v1238_v53 = vrot.slane %v4202_v60, 1  ;;  %v1241_v39 = vrot.slane %v4112_v37, 1 }
 0x15b   : > { %v1239_v17 = vsel %vm1215_vm6, %v1237_v25, %v1238_v53  ;;  %v1242_v34 = vsel %vm1215_vm6, %v1240_v31, %v1241_v39  ;;  %v1252_v25 = vrot.slane %v4259_v14, 1  ;;  %v1253_v53 = vrot.slane %v4280_v18, 1 }
 0x15c   : > { %v1306_v14 = vrot.slane %v4122_v11, 1 }
 0x15d   : > { %v1254_v52 = vsel %vm1215_vm6, %v1252_v25, %v1253_v53  ;;  %v1262_v25 = vrot.slane %v4371_v62, 1  ;;  %v1297_v53 = vrot.slane %v4033_v4, 1  ;;  %v1315_v4 = vrot.slane %v4176_v44, 1 }
 0x15e   : > { %1274 = vrot.lane.b32.xlu0 %v1233_v20, %s3531_s27  ;;  %v1249_v20 = vrot.slane %v4141_v56, 1  ;;  %v1312_v56 = vrot.slane %v4135_v38, 2  ;;  %v4492_v38 = vshrl.u32 %v4047_v3, 16  ;;  %v4495_v44 = vshrl.u32 %v4155_v29, 16 }
 0x160   : > { %6091 = vst [vmem:[#allocation79_spill] sm:$0xff] %v4492_v38 }
 0x161   : > { %1272 = vrot.lane.b32.xlu1 %v1230_v41, %s3531_s27  ;;  %1276 = vrot.lane.b32.xlu2 %v1236_v19, %s3531_s27  ;;  %v1247_v41 = vrot.slane %v4225_v2, 1  ;;  %v1250_v19 = vrot.slane %v4144_v22, 1  ;;  %6092 = vst [vmem:[#allocation80_spill] sm:$0xff] %v4495_v44 }
 0x163   : > { %v1248_v31 = vsel %vm1215_vm6, %v1246_v61, %v1247_v41  ;;  %v1251_v39 = vsel %vm1215_vm6, %v1249_v20, %v1250_v19  ;;  %v4463_v61 = vshrl.u32 %v4022_v33, 16  ;;  %v4466_v41 = vshrl.u32 %v4117_v27, 16 }
 0x164   : > { %v4469_v20 = vshrl.u32 %v4138_v5, 16  ;;  %v1261_v19 = vrot.slane %v4347_v43, 1  ;;  %v1307_v43 = vrot.slane %v4130_v63, 2 }
 0x165   : > { %6088 = vst [vmem:[#allocation76_spill] sm:$0xff] %v4463_v61  ;;  %v1302_v40 = vrot.slane %v4463_v61, 1 }
 0x166   : > { %1280 = vrot.lane.b32.xlu0 %v1242_v34, %s3531_s27  ;;  %v1255_v34 = vrot.slane %v4283_v51, 1  ;;  %6089 = vst [vmem:[#allocation77_spill] sm:$0xff] %v4466_v41  ;;  %v1303_v51 = vrot.slane %v4030_v58, 2 }
 0x167   : > { %6090 = vst [vmem:[#allocation78_spill] sm:$0xff] %v4469_v20 }
 0x168   : > { %v1304_v63 = vor.u32 %v1303_v51, %v1302_v40  ;;  %v1325_v51 = vrot.slane %v4051_v23, 2  ;;  %v1329_v40 = vrot.slane %v4492_v38, 1 }
 0x169   : > { %1278 = vrot.lane.b32.xlu1 %v1239_v17, %s3531_s27  ;;  %1282 = vrot.lane.b32.xlu2 %v1245_v59, %s3531_s27  ;;  %v1259_v17 = vrot.slane %v4368_v48, 1  ;;  %v1256_v59 = vrot.slane %v4286_v45, 1 }
 0x16e   : > { %1286 = vrot.lane.b32.xlu0 %v1251_v39, %s3531_s27  ;;  %v1260_v39 = vsel %vm1215_vm6, %v1258_v12, %v1259_v17  ;;  %v1316_v12 = vrot.slane %v4179_v9, 2  ;;  %v1320_v17 = vrot.slane %v4469_v20, 1  ;;  %v1308_v9 = vor.u32 %v1307_v43, %v1306_v14 }
 0x16f   : > { %v1338_v43 = vrot.slane %v4495_v44, 1  ;;  %v6099_v44 = vld [vmem:[#allocation38_spill] sm:$0xff] }
 0x170   : > { %v1317_v20 = vor.u32 %v1316_v12, %v1315_v4  ;;  %v6095_v4 = vld [vmem:[#allocation31_spill] sm:$0xff] }
 0x171   : > { %1284 = vrot.lane.b32.xlu1 %v1248_v31, %s3531_s27  ;;  %1288 = vrot.lane.b32.xlu2 %v1254_v52, %s3531_s27  ;;  %v1298_v31 = vrot.slane %v4027_v57, 2  ;;  %v1257_v52 = vsel %vm1215_vm6, %v1255_v34, %v1256_v59  ;;  %v1311_v57 = vrot.slane %v4466_v41, 1  ;;  %v1321_v34 = vrot.slane %v4182_v54, 2 }
 0x172   : > { %v1263_v59 = vsel %vm1215_vm6, %v1261_v19, %v1262_v25  ;;  %v1324_v54 = vrot.slane %v4059_v36, 1  ;;  %v1330_v25 = vrot.slane %v4054_v42, 2  ;;  %vm2413_vm6 = vcmask 293888  }
 0x173   : > { %v1313_v41 = vor.u32 %v1312_v56, %v1311_v57  ;;  %v1322_v11 = vor.u32 %v1321_v34, %v1320_v17  ;;  %v1333_v57 = vrot.slane %v4191_v55, 1  ;;  %v1334_v56 = vrot.slane %v6095_v4, 2  ;;  %v6100_v55 = vld [vmem:[#allocation39_spill] sm:$0xff] }
 0x174   : > { %v4515_v17 = vshrl.u32 %v4166_v30, 16  ;;  %v1342_v34 = vrot.slane %v4095_v13, 1  ;;  %v1352_v4 = vrot.slane %v6099_v44, 2  ;;  %v1357_v13 = vrot.slane %v6100_v55, 2  ;;  %v6105_v55 = vld [vmem:[#allocation43_spill] sm:$0xff] }
 0x175   : > { %v1323_v12 = vsel %vm1296_vm7, %v1317_v20, %v1322_v11  ;;  %v6098_v11 = vld [vmem:[#allocation40_spill] sm:$0xff]  ;;  %v6127_v44 = vld [vmem:[#allocation63_spill] sm:$0xff] }
 0x176   : > { %1292 = vrot.lane.b32.xlu0 %v1260_v39, %s3531_s27  ;;  %v4499_v39 = vshrl.u32 %v4078_v50, 16  ;;  %6097 = vst [vmem:[#allocation83_spill] sm:$0xff] %v4515_v17  ;;  %v1351_v20 = vrot.slane %v6098_v11, 1  ;;  %v1411_v11 = vrot.slane %v6127_v44, 2 }
 0x178   : > { %6093 = vst [vmem:[#allocation81_spill] sm:$0xff] %v4499_v39 }
 0x179   : > { %1290 = vrot.lane.b32.xlu1 %v1257_v52, %s3531_s27  ;;  %1294 = vrot.lane.b32.xlu2 %v1263_v59, %s3531_s27  ;;  %v1299_v52 = vor.u32 %v1298_v31, %v1297_v53  ;;  %v4506_v14 = vpop.permute.xlu2 %1153  ;;  %v6096_v53 = vld [vmem:[#allocation33_spill] sm:$0xff]  ;;  %v1343_v59 = vrot.slane %v4081_v16, 2  ;;  %v4528_v16 = vshrl.u32 %v4202_v60, 16  ;;  %s5990_s27 = smov 52  }
 0x17a   : > { %6094 = vst [vmem:[#allocation82_spill] sm:$0xff] %v4506_v14  ;;  %v1339_v31 = vrot.slane %v6096_v53, 2  ;;  %v1326_v14 = vor.u32 %v1325_v51, %v1324_v54  ;;  %v1331_v53 = vor.u32 %v1330_v25, %v1329_v40  ;;  %v1353_v40 = vor.u32 %v1352_v4, %v1351_v20  ;;  %v6103_v25 = vld [vmem:[#allocation42_spill] sm:$0xff] }
 0x17b   : > { %v1305_v19 = vsel %vm1296_vm7, %v1299_v52, %v1304_v63  ;;  %v1314_v63 = vsel %vm1296_vm7, %v1308_v9, %v1313_v41  ;;  %v1347_v52 = vrot.slane %v4499_v39, 1  ;;  %v1335_v9 = vor.u32 %v1334_v56, %v1333_v57  ;;  %6101 = vst [vmem:[#allocation84_spill] sm:$0xff] %v4528_v16  ;;  %v6104_v56 = vld [vmem:[#allocation41_spill] sm:$0xff] }
 0x17c   : > { %v1340_v41 = vor.u32 %v1339_v31, %v1338_v43  ;;  %v1344_v39 = vor.u32 %v1343_v59, %v1342_v34  ;;  %v1332_v54 = vsel %vm1296_vm7, %v1326_v14, %v1331_v53  ;;  %v1360_v57 = vrot.slane %v6103_v25, 1  ;;  %v6106_v59 = vld [vmem:[#allocation45_spill] sm:$0xff]  ;;  %v6116_v25 = vld [vmem:[#allocation56_spill] sm:$0xff] }
 0x17d   : > { %v1361_v43 = vrot.slane %v6104_v56, 2  ;;  %v1366_v34 = vrot.slane %v6105_v55, 2 }
 0x17e   : > { %1443 = vrot.lane.b32.xlu0 %v1314_v63, %s3532_s30  ;;  %v1356_v63 = vrot.slane %v4515_v17, 1  ;;  %v1341_v51 = vsel %vm1296_vm7, %v1335_v9, %v1340_v41  ;;  %v6109_v41 = vld [vmem:[#allocation47_spill] sm:$0xff] }
 0x17f   : > { %v1375_v20 = vrot.slane %v6109_v41, 2  ;;  %v6114_v41 = vld [vmem:[#allocation52_spill] sm:$0xff] }
 0x180   : > { %v1358_v31 = vor.u32 %v1357_v13, %v1356_v63  ;;  %v4550_v13 = vshrl.u32 %v4218_v24, 16  ;;  %v4553_v63 = vshrl.u32 %v4225_v2, 16  ;;  %v1379_v55 = vrot.slane %v6114_v41, 2 }
 0x181   : > { %1441 = vrot.lane.b32.xlu1 %v1305_v19, %s3532_s30  ;;  %v1348_v19 = vrot.slane %v4086_v10, 2  ;;  %1445 = vrot.lane.b32.xlu2 %v1323_v12, %s3532_s30  ;;  %v4531_v10 = vshrl.u32 %v4112_v37, 16  ;;  %v1365_v12 = vrot.slane %v4528_v16, 1  ;;  %v6115_v16 = vld [vmem:[#allocation53_spill] sm:$0xff] }
 0x182   : > { %6110 = vst [vmem:[#allocation87_spill] sm:$0xff] %v4550_v13  ;;  %v1384_v56 = vrot.slane %v6115_v16, 2 }
 0x183   : > { %v1349_v42 = vor.u32 %v1348_v19, %v1347_v52  ;;  %6102 = vst [vmem:[#allocation85_spill] sm:$0xff] %v4531_v10  ;;  %v1369_v52 = vrot.slane %v6106_v59, 1  ;;  %v4543_v53 = vpop.permute.xlu2 %1159  ;;  %v6108_v19 = vld [vmem:[#allocation46_spill] sm:$0xff]  ;;  %v1374_v4 = vrot.slane %v4531_v10, 1  ;;  %v6113_v10 = vld [vmem:[#allocation51_spill] sm:$0xff] }
 0x184   : > { %6107 = vst [vmem:[#allocation86_spill] sm:$0xff] %v4543_v53  ;;  %v1370_v9 = vrot.slane %v6108_v19, 2  ;;  %v4557_v19 = vshrl.u32 %v4144_v22, 16  ;;  %v1378_v59 = vrot.slane %v6113_v10, 1 }
 0x185   : > { %v1350_v14 = vsel %vm1296_vm7, %v1344_v39, %v1349_v42  ;;  %6111 = vst [vmem:[#allocation88_spill] sm:$0xff] %v4553_v63  ;;  %v1359_v42 = vsel %vm1296_vm7, %v1353_v40, %v1358_v31  ;;  %v1376_v53 = vor.u32 %v1375_v20, %v1374_v4  ;;  %v1392_v40 = vrot.slane %v4553_v63, 1  ;;  %v6118_v31 = vld [vmem:[#allocation55_spill] sm:$0xff]  ;;  %v6120_v20 = vld [vmem:[#allocation58_spill] sm:$0xff] }
 0x186   : > { %1449 = vrot.lane.b32.xlu0 %v1341_v51, %s3532_s30  ;;  %v1367_v51 = vor.u32 %v1366_v34, %v1365_v12  ;;  %v1371_v39 = vor.u32 %v1370_v9, %v1369_v52  ;;  %6112 = vst [vmem:[#allocation89_spill] sm:$0xff] %v4557_v19  ;;  %v1393_v34 = vrot.slane %v6118_v31, 2  ;;  %v6119_v9 = vld [vmem:[#allocation57_spill] sm:$0xff]  ;;  %v1397_v41 = vrot.slane %v6120_v20, 2  ;;  %v6124_v20 = vld [vmem:[#allocation62_spill] sm:$0xff] }
 0x187   : > { %v1396_v4 = vrot.slane %v6119_v9, 1  ;;  %v1380_v31 = vor.u32 %v1379_v55, %v1378_v59  ;;  %v1405_v10 = vrot.slane %v6124_v20, 1 }
 0x188   : > { %v1377_v16 = vsel %vm1296_vm7, %v1371_v39, %v1376_v53  ;;  %v1394_v9 = vor.u32 %v1393_v34, %v1392_v40  ;;  %v4584_v39 = vshrl.u32 %v4286_v45, 16 }
 0x189   : > { %1447 = vrot.lane.b32.xlu1 %v1332_v54, %s3532_s30  ;;  %1451 = vrot.lane.b32.xlu2 %v1350_v14, %s3532_s30  ;;  %v1362_v54 = vor.u32 %v1361_v43, %v1360_v57  ;;  %v1383_v14 = vrot.slane %v4550_v13, 1  ;;  %v1387_v57 = vrot.slane %v6116_v25, 1  ;;  %v6117_v43 = vld [vmem:[#allocation54_spill] sm:$0xff]  ;;  %v6121_v13 = vld [vmem:[#allocation59_spill] sm:$0xff]  ;;  %v1398_v53 = vor.u32 %v1397_v41, %v1396_v4 }
 0x18a   : > { %v1388_v12 = vrot.slane %v6117_v43, 2  ;;  %v1402_v25 = vrot.slane %v6121_v13, 2  ;;  %v4576_v43 = vshrl.u32 %v4280_v18, 16  ;;  %6126 = vst [vmem:[#allocation92_spill] sm:$0xff] %v4584_v39  ;;  %v1419_v34 = vrot.slane %v4584_v39, 1  ;;  %v6131_v4 = vld [vmem:[#allocation66_spill] sm:$0xff] }
 0x18b   : > { %v1368_v52 = vsel %vm1296_vm7, %v1362_v54, %v1367_v51  ;;  %v1385_v63 = vor.u32 %v1384_v56, %v1383_v14  ;;  %v6129_v14 = vld [vmem:[#allocation68_spill] sm:$0xff] }
 0x18c   : > { %6122 = vst [vmem:[#allocation90_spill] sm:$0xff] %v4576_v43  ;;  %v1389_v51 = vor.u32 %v1388_v12, %v1387_v57  ;;  %v1414_v41 = vrot.slane %v6129_v14, 1  ;;  %v1423_v57 = vrot.slane %v4383_v8, 1  ;;  %v4596_v12 = vpop.permute.xlu0 %1151 }
 0x18d   : > { %v1386_v55 = vsel %vm1296_vm7, %v1380_v31, %v1385_v63 }
 0x18e   : > { %1455 = vrot.lane.b32.xlu0 %v1368_v52, %s3532_s30  ;;  %v4579_v54 = vpop.permute.xlu2 %1165  ;;  %v6125_v52 = vld [vmem:[#allocation60_spill] sm:$0xff]  ;;  %v1395_v56 = vsel %vm1296_vm7, %v1389_v51, %v1394_v9  ;;  %v4608_v9 = vshrl.u32 %v4371_v62, 16 }
 0x18f   : > { %6123 = vst [vmem:[#allocation91_spill] sm:$0xff] %v4579_v54  ;;  %v1406_v17 = vrot.slane %v6125_v52, 2  ;;  %v6132_v54 = vld [vmem:[#allocation67_spill] sm:$0xff] }
 0x190   : > { %v1424_v44 = vrot.slane %v6132_v54, 2  ;;  %6133 = vst [vmem:[#allocation94_spill] sm:$0xff] %v4608_v9 }
 0x191   : > { %1453 = vrot.lane.b32.xlu1 %v1359_v42, %s3532_s30  ;;  %v1401_v42 = vrot.slane %v4557_v19, 1  ;;  %1457 = vrot.lane.b32.xlu2 %v1377_v16, %s3532_s30  ;;  %v1410_v19 = vrot.slane %v4576_v43, 1  ;;  %v4589_v16 = vshrl.u32 %v4368_v48, 16  ;;  %v1407_v59 = vor.u32 %v1406_v17, %v1405_v10 }
 0x192   : > { %v1429_v17 = vrot.slane %v4388_v15, 2  ;;  %v1438_v15 = vrot.slane %v4394_v6, 2 }
 0x193   : > { %v1403_v13 = vor.u32 %v1402_v25, %v1401_v42  ;;  %6128 = vst [vmem:[#allocation93_spill] sm:$0xff] %v4589_v16  ;;  %v6130_v25 = vld [vmem:[#allocation65_spill] sm:$0xff]  ;;  %v1420_v42 = vrot.slane %v6131_v4, 2  ;;  %v1412_v31 = vor.u32 %v1411_v11, %v1410_v19  ;;  %v1428_v10 = vrot.slane %v4589_v16, 1  ;;  %v6135_v11 = vld [vmem:[#allocation71_spill] sm:$0xff] }
 0x194   : > { %v1415_v40 = vrot.slane %v6130_v25, 2  ;;  %v1425_v4 = vor.u32 %v1424_v44, %v1423_v57  ;;  %v1433_v19 = vrot.slane %v6135_v11, 2  ;;  %v4623_v44 = vpop.permute.xlu0 %1157 }
 0x195   : > { %v1404_v63 = vsel %vm1296_vm7, %v1398_v53, %v1403_v13  ;;  %v1421_v8 = vor.u32 %v1420_v42, %v1419_v34  ;;  %v1413_v54 = vsel %vm1296_vm7, %v1407_v59, %v1412_v31  ;;  %v1432_v13 = vrot.slane %v4391_v49, 1  ;;  %6137 = vst [vmem:[#allocation97_spill] sm:$0xff] %v4623_v44  ;;  %v6153_v44 = vld [vmem:[#allocation9_spill] sm:$0xff] }
 0x196   : > { %1461 = vrot.lane.b32.xlu0 %v1395_v56, %s3532_s30  ;;  %v1430_v56 = vor.u32 %v1429_v17, %v1428_v10  ;;  %v1437_v53 = vrot.slane %v4608_v9, 1  ;;  %v1474_v34 = vrot.slane %v4019_v32, 2  ;;  %v1478_v42 = vrot.slane %v4117_v27, 2 }
 0x198   : > { %v4610_v51 = vpop.permute.xlu2 %1171  ;;  %v1431_v59 = vsel %vm1296_vm7, %v1425_v4, %v1430_v56  ;;  %v1439_v57 = vor.u32 %v1438_v15, %v1437_v53  ;;  %v1481_v56 = vrot.slane %v4138_v5, 2 }
 0x199   : > { %1459 = vrot.lane.b32.xlu1 %v1386_v55, %s3532_s30  ;;  %1463 = vrot.lane.b32.xlu2 %v1404_v63, %s3532_s30  ;;  %6134 = vst [vmem:[#allocation95_spill] sm:$0xff] %v4610_v51  ;;  %v1416_v55 = vor.u32 %v1415_v40, %v1414_v41  ;;  %v1434_v41 = vor.u32 %v1433_v19, %v1432_v13  ;;  %v6141_v19 = vld [vmem:[#allocation10_spill] sm:$0xff] }
 0x19a   : > { %v4619_v16 = vpop.permute.xlu1 %1155  ;;  %v1483_v53 = vrot.slane %v6141_v19, 2  ;;  %v6205_v51 = vld [vmem:[#allocation58_spill] sm:$0xff] }
 0x19b   : > { %v1422_v63 = vsel %vm1296_vm7, %v1416_v55, %v1421_v8  ;;  %6136 = vst [vmem:[#allocation96_spill] sm:$0xff] %v4619_v16  ;;  %v1477_v8 = vrot.slane %v4103_v1, 2  ;;  %v1440_v31 = vsel %vm1296_vm7, %v1434_v41, %v1439_v57  ;;  %v1480_v55 = vrot.slane %v4125_v47, 2 }
 0x19c   : > { %v1487_v41 = vrot.slane %v4155_v29, 2  ;;  %vm2430_vm7 = vcmask 588800  }
 0x19d   : > { %v1479_v15 = vsel %vm1473_vm8, %v1477_v8, %v1478_v42  ;;  %v1482_v57 = vsel %vm1473_vm8, %v1480_v55, %v1481_v56  ;;  %v1489_v42 = vrot.slane %v4069_v7, 2  ;;  %v1492_v55 = vrot.slane %v4163_v28, 2 }
 0x19e   : > { %1467 = vrot.lane.b32.xlu0 %v1422_v63, %s3532_s30  ;;  %v1484_v63 = vrot.slane %v4047_v3, 2  ;;  %v1493_v56 = vrot.slane %v4166_v30, 2  ;;  %v6154_v30 = vld [vmem:[#allocation7_spill] sm:$0xff] }
 0x19f   : > { %v1556_v28 = vrot.slane %v6154_v30, 3 }
 0x1a1   : > { %1465 = vrot.lane.b32.xlu1 %v1413_v54, %s3532_s30  ;;  %1469 = vrot.lane.b32.xlu2 %v1431_v59, %s3532_s30  ;;  %v1475_v54 = vrot.slane %v4022_v33, 2  ;;  %v1486_v59 = vrot.slane %v4147_v35, 2  ;;  %v6165_v35 = vld [vmem:[#allocation78_spill] sm:$0xff] }
 0x1a2   : > { %v4635_v10 = vpop.permute.xlu1 %1161 }
 0x1a3   : > { %v4626_v40 = vpop.permute.xlu2 %1177  ;;  %v1476_v4 = vsel %vm1473_vm8, %v1474_v34, %v1475_v54  ;;  %6139 = vst [vmem:[#allocation99_spill] sm:$0xff] %v4635_v10  ;;  %v1485_v34 = vsel %vm1473_vm8, %v1483_v53, %v1484_v63  ;;  %v1488_v8 = vsel %vm1473_vm8, %v1486_v59, %v1487_v41  ;;  %v1495_v53 = vrot.slane %v4188_v46, 2 }
 0x1a4   : > { %6138 = vst [vmem:[#allocation98_spill] sm:$0xff] %v4626_v40  ;;  %v1496_v63 = vrot.slane %v4202_v60, 2  ;;  %v1494_v41 = vsel %vm1473_vm8, %v1492_v55, %v1493_v56  ;;  %v1504_v55 = vrot.slane %v4221_v21, 2  ;;  %v1505_v56 = vrot.slane %v4225_v2, 2  ;;  %v6203_v21 = vld [vmem:[#allocation55_spill] sm:$0xff] }
 0x1a5   : > { %v4639_v17 = vpop.permute.xlu0 %1163 }
 0x1a6   : > { %1522 = vrot.lane.b32.xlu0 %v1476_v4, %s5988_s8  ;;  %6140 = vst [vmem:[#allocation100_spill] sm:$0xff] %v4639_v17 }
 0x1a9   : > { %1471 = vrot.lane.b32.xlu1 %v1440_v31, %s3532_s30  ;;  %1524 = vrot.lane.b32.xlu2 %v1479_v15, %s5988_s8  ;;  %v1490_v31 = vrot.slane %v4078_v50, 2  ;;  %s5986_s30 = smov 88  }
 0x1ab   : > { %v4644_v13 = vpop.permute.xlu2 %1264  ;;  %v4654_v54 = vpop.permute.xlu1 %1167  ;;  %v1491_v59 = vsel %vm1473_vm8, %v1489_v42, %v1490_v31  ;;  %v1501_v42 = vrot.slane %v4205_v26, 2  ;;  %v1502_v31 = vrot.slane %v4218_v24, 2  ;;  %v1572_v24 = vrot.slane %v6165_v35, 2  ;;  %v6166_v26 = vld [vmem:[#allocation30_spill] sm:$0xff] }
 0x1ac   : > { %6142 = vst [vmem:[#allocation10_spill] sm:$0xff] %v4654_v54  ;;  %v1499_v54 = vrot.slane %v4112_v37, 2 }
 0x1ae   : > { %1528 = vrot.lane.b32.xlu0 %v1485_v34, %s5988_s8  ;;  %v4660_v4 = vpop.permute.xlu0 %1169  ;;  %v1497_v34 = vsel %vm1473_vm8, %v1495_v53, %v1496_v63  ;;  %v1503_v63 = vsel %vm1473_vm8, %v1501_v42, %v1502_v31  ;;  %v1511_v42 = vrot.slane %v4280_v18, 2  ;;  %v6151_v31 = vld [vmem:[#allocation49_spill] sm:$0xff] }
 0x1af   : > { %6143 = vst [vmem:[#allocation101_spill] sm:$0xff] %v4660_v4 }
 0x1b1   : > { %1526 = vrot.lane.b32.xlu1 %v1482_v57, %s5988_s8  ;;  %1530 = vrot.lane.b32.xlu2 %v1488_v8, %s5988_s8  ;;  %v1498_v8 = vrot.slane %v4099_v0, 2 }
 0x1b3   : > { %v4662_v15 = vpop.permute.xlu2 %1270  ;;  %v1500_v53 = vsel %vm1473_vm8, %v1498_v8, %v1499_v54  ;;  %v6150_v54 = vld [vmem:[#allocation44_spill] sm:$0xff] }
 0x1b4   : > { %6144 = vst [vmem:[#allocation102_spill] sm:$0xff] %v4662_v15  ;;  %v1510_v8 = vrot.slane %v6150_v54, 2  ;;  %v6201_v54 = vld [vmem:[#allocation54_spill] sm:$0xff] }
 0x1b5   : > { %v4672_v57 = vpop.permute.xlu1 %1173 }
 0x1b6   : > { %1534 = vrot.lane.b32.xlu0 %v1494_v41, %s5988_s8  ;;  %v1506_v41 = vsel %vm1473_vm8, %v1504_v55, %v1505_v56  ;;  %v6152_v56 = vld [vmem:[#allocation61_spill] sm:$0xff]  ;;  %v1512_v15 = vsel %vm1473_vm8, %v1510_v8, %v1511_v42 }
 0x1b8   : > { %v4678_v10 = vpop.permute.xlu0 %1175 }
 0x1b9   : > { %1532 = vrot.lane.b32.xlu1 %v1491_v59, %s5988_s8  ;;  %1536 = vrot.lane.b32.xlu2 %v1497_v34, %s5988_s8  ;;  %6145 = vst [vmem:[#allocation103_spill] sm:$0xff] %v4678_v10  ;;  %v6147_v34 = vld [vmem:[#allocation22_spill] sm:$0xff]  ;;  %v6202_v10 = vld [vmem:[#allocation88_spill] sm:$0xff] }
 0x1ba   : > { %v1507_v4 = vrot.slane %v6147_v34, 2 }
 0x1bb   : > { %v4680_v16 = vpop.permute.xlu2 %1276 }
 0x1bc   : > { %6146 = vst [vmem:[#allocation104_spill] sm:$0xff] %v4680_v16  ;;  %v1508_v16 = vrot.slane %v4144_v22, 2  ;;  %v1517_v22 = vrot.slane %v4368_v48, 2  ;;  %v6158_v48 = vld [vmem:[#allocation64_spill] sm:$0xff] }
 0x1bd   : > { %v1519_v30 = vrot.slane %v6158_v48, 2  ;;  %v1573_v48 = vrot.slane %v6166_v26, 3 }
 0x1be   : > { %1540 = vrot.lane.b32.xlu0 %v1503_v63, %s5988_s8  ;;  %v1514_v63 = vrot.slane %v4286_v45, 2  ;;  %v1509_v55 = vsel %vm1473_vm8, %v1507_v4, %v1508_v16  ;;  %v1558_v16 = vrot.slane %v4463_v61, 2  ;;  %v1559_v4 = vrot.slane %v4030_v58, 3  ;;  %v6160_v61 = vld [vmem:[#allocation20_spill] sm:$0xff]  ;;  %v6161_v58 = vld [vmem:[#allocation77_spill] sm:$0xff] }
 0x1bf   : > { %v1563_v50 = vrot.slane %v6160_v61, 3  ;;  %v1565_v7 = vrot.slane %v6161_v58, 2 }
 0x1c0   : > { %v4696_v17 = vpop.permute.xlu0 %1181 }
 0x1c1   : > { %1538 = vrot.lane.b32.xlu1 %v1500_v53, %s5988_s8  ;;  %1542 = vrot.lane.b32.xlu2 %v1506_v41, %s5988_s8  ;;  %6148 = vst [vmem:[#allocation22_spill] sm:$0xff] %v4696_v17  ;;  %v1513_v53 = vrot.slane %v6151_v31, 2  ;;  %v1516_v41 = vrot.slane %v6152_v56, 2  ;;  %v6193_v31 = vld [vmem:[#allocation47_spill] sm:$0xff] }
 0x1c2   : > { %v1615_v40 = vrot.slane %v6193_v31, 3  ;;  %v1633_v31 = vrot.slane %v6205_v51, 3 }
 0x1c3   : > { %v4690_v59 = vpop.permute.xlu1 %1179  ;;  %v4698_v2 = vpop.permute.xlu2 %1282  ;;  %v1515_v45 = vsel %vm1473_vm8, %v1513_v53, %v1514_v63  ;;  %v1518_v8 = vsel %vm1473_vm8, %v1516_v41, %v1517_v22  ;;  %v1560_v63 = vor.u32 %v1559_v4, %v1558_v16  ;;  %v6164_v22 = vld [vmem:[#allocation29_spill] sm:$0xff]  ;;  %v1579_v16 = vrot.slane %v4492_v38, 2  ;;  %v6167_v4 = vld [vmem:[#allocation12_spill] sm:$0xff] }
 0x1c4   : > { %6149 = vst [vmem:[#allocation105_spill] sm:$0xff] %v4698_v2  ;;  %v1555_v2 = vrot.slane %v6153_v44, 2  ;;  %v1570_v41 = vrot.slane %v6164_v22, 3 }
 0x1c6   : > { %1546 = vrot.lane.b32.xlu0 %v1512_v15, %s5988_s8  ;;  %v1520_v15 = vrot.slane %v4371_v62, 2  ;;  %v1557_v44 = vor.u32 %v1556_v28, %v1555_v2  ;;  %v1576_v28 = vrot.slane %v4059_v36, 2  ;;  %v1577_v2 = vrot.slane %v4051_v23, 3 }
 0x1c7   : > { %v1580_v62 = vrot.slane %v6167_v4, 3  ;;  %v1574_v36 = vor.u32 %v1573_v48, %v1572_v24  ;;  %v6178_v48 = vld [vmem:[#allocation17_spill] sm:$0xff] }
 0x1c8   : > { %v1561_v35 = vsel %vm1554_vm9, %v1557_v44, %v1560_v63  ;;  %v1578_v38 = vor.u32 %v1577_v2, %v1576_v28  ;;  %v6174_v44 = vld [vmem:[#allocation33_spill] sm:$0xff] }
 0x1c9   : > { %1544 = vrot.lane.b32.xlu1 %v1509_v55, %s5988_s8  ;;  %1548 = vrot.lane.b32.xlu2 %v1515_v45, %s5988_s8  ;;  %v4718_v55 = vpop.permute.xlu0 %1268  ;;  %v6162_v45 = vld [vmem:[#allocation21_spill] sm:$0xff]  ;;  %v1581_v58 = vor.u32 %v1580_v62, %v1579_v16  ;;  %v1594_v62 = vrot.slane %v6178_v48, 3 }
 0x1ca   : > { %6156 = vst [vmem:[#allocation107_spill] sm:$0xff] %v4718_v55  ;;  %v1566_v17 = vrot.slane %v6162_v45, 3  ;;  %v6163_v55 = vld [vmem:[#allocation28_spill] sm:$0xff]  ;;  %v1521_v45 = vsel %vm1473_vm8, %v1519_v30, %v1520_v15  ;;  %vm2447_vm8 = vcmask 883712  }
 0x1cb   : > { %v4712_v18 = vpop.permute.xlu1 %1266  ;;  %v4721_v42 = vpop.permute.xlu2 %1288  ;;  %v1569_v29 = vrot.slane %v6163_v55, 2  ;;  %v6171_v30 = vld [vmem:[#allocation32_spill] sm:$0xff]  ;;  %v1582_v28 = vsel %vm1554_vm9, %v1578_v38, %v1581_v58  ;;  %v6185_v38 = vld [vmem:[#allocation41_spill] sm:$0xff] }
 0x1cc   : > { %6155 = vst [vmem:[#allocation106_spill] sm:$0xff] %v4712_v18  ;;  %v6159_v18 = vld [vmem:[#allocation19_spill] sm:$0xff]  ;;  %v1567_v26 = vor.u32 %v1566_v17, %v1565_v7  ;;  %v1583_v15 = vrot.slane %v6171_v30, 2  ;;  %v6175_v17 = vld [vmem:[#allocation18_spill] sm:$0xff]  ;;  %v6192_v30 = vld [vmem:[#allocation85_spill] sm:$0xff] }
 0x1cd   : > { %6157 = vst [vmem:[#allocation108_spill] sm:$0xff] %v4721_v42  ;;  %v1562_v53 = vrot.slane %v6159_v18, 2  ;;  %v1571_v23 = vor.u32 %v1570_v41, %v1569_v29  ;;  %v6177_v29 = vld [vmem:[#allocation81_spill] sm:$0xff]  ;;  %v6194_v42 = vld [vmem:[#allocation51_spill] sm:$0xff] }
 0x1ce   : > { %1552 = vrot.lane.b32.xlu0 %v1521_v45, %s5988_s8  ;;  %v6172_v45 = vld [vmem:[#allocation31_spill] sm:$0xff]  ;;  %v1593_v24 = vrot.slane %v6177_v29, 2 }
 0x1cf   : > { %v1564_v22 = vor.u32 %v1563_v50, %v1562_v53  ;;  %v1584_v61 = vrot.slane %v6172_v45, 3  ;;  %v1587_v50 = vrot.slane %v6174_v44, 3  ;;  %v6176_v53 = vld [vmem:[#allocation16_spill] sm:$0xff]  ;;  %v1575_v41 = vsel %vm1554_vm9, %v1571_v23, %v1574_v36  ;;  %v6182_v44 = vld [vmem:[#allocation83_spill] sm:$0xff]  ;;  %v6184_v36 = vld [vmem:[#allocation42_spill] sm:$0xff] }
 0x1d0   : > { %v1591_v63 = vrot.slane %v6176_v53, 3  ;;  %v1600_v29 = vrot.slane %v6182_v44, 2  ;;  %v1595_v23 = vor.u32 %v1594_v62, %v1593_v24  ;;  %v1604_v58 = vrot.slane %v6184_v36, 2  ;;  %v6191_v45 = vld [vmem:[#allocation46_spill] sm:$0xff] }
 0x1d1   : > { %1550 = vrot.lane.b32.xlu1 %v1518_v8, %s5988_s8  ;;  %1667 = vrot.lane.b32.xlu2 %v1561_v35, %s3534_s9  ;;  %v4744_v8 = vpop.permute.xlu0 %1274  ;;  %v1568_v7 = vsel %vm1554_vm9, %v1564_v22, %v1567_v26  ;;  %v1590_v35 = vrot.slane %v6175_v17, 2  ;;  %v1585_v2 = vor.u32 %v1584_v61, %v1583_v15  ;;  %v6180_v26 = vld [vmem:[#allocation40_spill] sm:$0xff]  ;;  %v6181_v17 = vld [vmem:[#allocation38_spill] sm:$0xff] }
 0x1d2   : > { %6169 = vst [vmem:[#allocation110_spill] sm:$0xff] %v4744_v8  ;;  %v1597_v22 = vrot.slane %v6180_v26, 2  ;;  %v1598_v53 = vrot.slane %v6181_v17, 3  ;;  %v6187_v15 = vld [vmem:[#allocation84_spill] sm:$0xff] }
 0x1d3   : > { %v4740_v55 = vpop.permute.xlu1 %1272  ;;  %v4746_v4 = vpop.permute.xlu2 %1294 }
 0x1d4   : > { %6168 = vst [vmem:[#allocation109_spill] sm:$0xff] %v4740_v55  ;;  %v6173_v55 = vld [vmem:[#allocation80_spill] sm:$0xff]  ;;  %v1599_v17 = vor.u32 %v1598_v53, %v1597_v22 }
 0x1d5   : > { %6170 = vst [vmem:[#allocation111_spill] sm:$0xff] %v4746_v4  ;;  %v1586_v18 = vrot.slane %v6173_v55, 2  ;;  %v6183_v55 = vld [vmem:[#allocation39_spill] sm:$0xff]  ;;  %v1614_v4 = vrot.slane %v6192_v30, 2  ;;  %v6195_v53 = vld [vmem:[#allocation52_spill] sm:$0xff] }
 0x1d6   : > { %1671 = vrot.lane.b32.xlu0 %v1575_v41, %s3534_s9  ;;  %v1601_v48 = vrot.slane %v6183_v55, 3  ;;  %v6188_v41 = vld [vmem:[#allocation43_spill] sm:$0xff] }
 0x1d7   : > { %v1588_v16 = vor.u32 %v1587_v50, %v1586_v18  ;;  %v1605_v18 = vrot.slane %v6185_v38, 3  ;;  %v1607_v50 = vrot.slane %v6187_v15, 2 }
 0x1d8   : > { %v1602_v44 = vor.u32 %v1601_v48, %v1600_v29  ;;  %v1619_v29 = vrot.slane %v6195_v53, 3  ;;  %v6196_v48 = vld [vmem:[#allocation87_spill] sm:$0xff] }
 0x1d9   : > { %1669 = vrot.lane.b32.xlu1 %v1568_v7, %s3534_s9  ;;  %1673 = vrot.lane.b32.xlu2 %v1582_v28, %s3534_s9  ;;  %v1592_v7 = vor.u32 %v1591_v63, %v1590_v35  ;;  %v4770_v61 = vpop.permute.xlu0 %1280  ;;  %v1589_v55 = vsel %vm1554_vm9, %v1585_v2, %v1588_v16  ;;  %v1606_v35 = vor.u32 %v1605_v18, %v1604_v58  ;;  %v6190_v63 = vld [vmem:[#allocation45_spill] sm:$0xff]  ;;  %v1621_v2 = vrot.slane %v6196_v48, 2 }
 0x1da   : > { %6186 = vst [vmem:[#allocation42_spill] sm:$0xff] %v4770_v61  ;;  %v1611_v24 = vrot.slane %v6190_v63, 2  ;;  %v1612_v61 = vrot.slane %v6191_v45, 3  ;;  %v6197_v16 = vld [vmem:[#allocation53_spill] sm:$0xff] }
 0x1db   : > { %v4761_v8 = vpop.permute.xlu1 %1278  ;;  %v4774_v26 = vpop.permute.xlu2 %1445  ;;  %v1596_v28 = vsel %vm1554_vm9, %v1592_v7, %v1595_v23  ;;  %v1622_v22 = vrot.slane %v6197_v16, 3 }
 0x1dc   : > { %6179 = vst [vmem:[#allocation112_spill] sm:$0xff] %v4761_v8  ;;  %v1608_v8 = vrot.slane %v6188_v41, 3  ;;  %v1613_v23 = vor.u32 %v1612_v61, %v1611_v24  ;;  %v6206_v61 = vld [vmem:[#allocation89_spill] sm:$0xff] }
 0x1dd   : > { %6189 = vst [vmem:[#allocation41_spill] sm:$0xff] %v4774_v26  ;;  %v1618_v26 = vrot.slane %v6194_v42, 2  ;;  %v1623_v48 = vor.u32 %v1622_v22, %v1621_v2  ;;  %v6200_v42 = vld [vmem:[#allocation56_spill] sm:$0xff]  ;;  %v1635_v24 = vrot.slane %v6206_v61, 2 }
 0x1de   : > { %v1609_v62 = vor.u32 %v1608_v8, %v1607_v50  ;;  %1677 = vrot.lane.b32.xlu0 %v1596_v28, %s3534_s9  ;;  %v1616_v50 = vor.u32 %v1615_v40, %v1614_v4  ;;  %v1625_v16 = vrot.slane %v6200_v42, 2  ;;  %v1626_v28 = vrot.slane %v6201_v54, 3 }
 0x1df   : > { %v1620_v53 = vor.u32 %v1619_v29, %v1618_v26  ;;  %v1639_v40 = vrot.slane %v6124_v20, 2  ;;  %v1640_v4 = vrot.slane %v6125_v52, 3  ;;  %v1642_v26 = vrot.slane %v4576_v43, 2 }
 0x1e0   : > { %v1610_v18 = vsel %vm1554_vm9, %v1606_v35, %v1609_v62  ;;  %v6208_v35 = vld [vmem:[#allocation63_spill] sm:$0xff]  ;;  %v1617_v29 = vsel %vm1554_vm9, %v1613_v23, %v1616_v50  ;;  %v1627_v61 = vor.u32 %v1626_v28, %v1625_v16  ;;  %v2008_v23 = vsel %vm2006_vm10, %v4019_v32, %v4596_v12 }
 0x1e1   : > { %1675 = vrot.lane.b32.xlu1 %v1589_v55, %s3534_s9  ;;  %v1603_v55 = vsel %vm1554_vm9, %v1599_v17, %v1602_v44  ;;  %v4792_v8 = vpop.permute.xlu0 %1286  ;;  %v1629_v44 = vrot.slane %v6203_v21, 3  ;;  %v6204_v17 = vld [vmem:[#allocation57_spill] sm:$0xff]  ;;  %v1643_v62 = vrot.slane %v6208_v35, 3  ;;  %v1624_v22 = vsel %vm1554_vm9, %v1620_v53, %v1623_v48  ;;  %v6211_v12 = vld [vmem:[#allocation67_spill] sm:$0xff] }
 0x1e2   : > { %1679 = vrot.lane.b32.xlu2 %v1603_v55, %s3534_s9  ;;  %v1632_v55 = vrot.slane %v6204_v17, 2  ;;  %v1641_v51 = vor.u32 %v1640_v4, %v1639_v40  ;;  %v1646_v53 = vrot.slane %v6129_v14, 2  ;;  %v1647_v48 = vrot.slane %v6130_v25, 3  ;;  %v6212_v40 = vld [vmem:[#allocation93_spill] sm:$0xff]  ;;  %v6238_v35 = vld [vmem:[#allocation111_spill] sm:$0xff] }
 0x1e3   : > { %v4788_v7 = vpop.permute.xlu1 %1284  ;;  %v4794_v58 = vpop.permute.xlu2 %1451  ;;  %v1644_v43 = vor.u32 %v1643_v62, %v1642_v26  ;;  %v1649_v16 = vrot.slane %v4584_v39, 2  ;;  %v1660_v26 = vrot.slane %v4391_v49, 2  ;;  %v1661_v62 = vrot.slane %v6135_v11, 3  ;;  %v6236_v39 = vld [vmem:[#allocation87_spill] sm:$0xff]  ;;  %v6237_v25 = vld [vmem:[#allocation53_spill] sm:$0xff] }
 0x1e4   : > { %6198 = vst [vmem:[#allocation84_spill] sm:$0xff] %v4788_v7  ;;  %v1628_v7 = vrot.slane %v6202_v10, 2  ;;  %v1634_v20 = vor.u32 %v1633_v31, %v1632_v55  ;;  %v2030_v11 = vsel %vm2006_vm10, %v6147_v34, %v4672_v57 }
 0x1e5   : > { %6199 = vst [vmem:[#allocation43_spill] sm:$0xff] %v4794_v58  ;;  %v6207_v58 = vld [vmem:[#allocation59_spill] sm:$0xff]  ;;  %v1645_v28 = vsel %vm1554_vm9, %v1641_v51, %v1644_v43  ;;  %v1663_v43 = vrot.slane %v4608_v9, 2 }
 0x1e6   : > { %v1636_v30 = vrot.slane %v6207_v58, 3  ;;  %1683 = vrot.lane.b32.xlu0 %v1617_v29, %s3534_s9  ;;  %v1630_v58 = vor.u32 %v1629_v44, %v1628_v7  ;;  %v6209_v7 = vld [vmem:[#allocation66_spill] sm:$0xff]  ;;  %v6210_v44 = vld [vmem:[#allocation72_spill] sm:$0xff]  ;;  %v2041_v29 = vsel %vm2039_vm11, %v2008_v23, %v4644_v13  ;;  %v2063_v23 = vsel %vm2039_vm11, %v2030_v11, %v4792_v8 }
 0x1e7   : > { %v1650_v31 = vrot.slane %v6209_v7, 3  ;;  %v1653_v55 = vrot.slane %v6210_v44, 2  ;;  %v1700_v8 = vrot.slane %v4019_v32, 3  ;;  %v6235_v7 = vld [vmem:[#allocation52_spill] sm:$0xff] }
 0x1e8   : > { %v1637_v52 = vor.u32 %v1636_v30, %v1635_v24  ;;  %v1631_v50 = vsel %vm1554_vm9, %v1627_v61, %v1630_v58  ;;  %v1654_v24 = vrot.slane %v6211_v12, 3  ;;  %v1656_v58 = vrot.slane %v6212_v40, 2  ;;  %v6213_v61 = vld [vmem:[#allocation73_spill] sm:$0xff]  ;;  %v6233_v40 = vld [vmem:[#allocation22_spill] sm:$0xff]  ;;  %v6234_v12 = vld [vmem:[#allocation64_spill] sm:$0xff] }
 0x1e9   : > { %1681 = vrot.lane.b32.xlu1 %v1610_v18, %s3534_s9  ;;  %v1293_v18 = vpop.permute.xlu0 %1292  ;;  %v1657_v4 = vrot.slane %v6213_v61, 3  ;;  %v2038_v44 = vsel %vm2006_vm10, %v6234_v12, %v6233_v40 }
 0x1ea   : > { %1685 = vrot.lane.b32.xlu2 %v1624_v22, %s3534_s9  ;;  %v1638_v30 = vsel %vm1554_vm9, %v1634_v20, %v1637_v52  ;;  %v1664_v52 = vrot.slane %v4394_v6, 3  ;;  %v1648_v22 = vor.u32 %v1647_v48, %v1646_v53  ;;  %v1655_v9 = vor.u32 %v1654_v24, %v1653_v55 }
 0x1eb   : > { %v4812_v2 = vpop.permute.xlu1 %1290  ;;  %v4816_v17 = vpop.permute.xlu2 %1457  ;;  %v1658_v49 = vor.u32 %v1657_v4, %v1656_v58  ;;  %v1703_v55 = vrot.slane %v4103_v1, 3  ;;  %v1704_v24 = vrot.slane %v4117_v27, 3  ;;  %v1706_v4 = vrot.slane %v4125_v47, 3 }
 0x1ed   : > { %v1659_v48 = vsel %vm1554_vm9, %v1655_v9, %v1658_v49 }
 0x1ee   : > { %1689 = vrot.lane.b32.xlu0 %v1638_v30, %s3534_s9 }
 0x1f1   : > { %1687 = vrot.lane.b32.xlu1 %v1631_v50, %s3534_s9  ;;  %v1651_v50 = vor.u32 %v1650_v31, %v1649_v16  ;;  %v4847_v13 = vpop.permute.xlu0 %1443  ;;  %v1701_v16 = vrot.slane %v4022_v33, 3  ;;  %v2036_v31 = vsel %vm2006_vm10, %v6152_v56, %v4690_v59  ;;  %v1705_v59 = vsel %vm1699_vm13, %v1703_v55, %v1704_v24  ;;  %v6214_v24 = vld [vmem:[#allocation85_spill] sm:$0xff] }
 0x1f2   : > { %1691 = vrot.lane.b32.xlu2 %v1645_v28, %s3534_s9  ;;  %v2069_v49 = vsel %vm2039_vm11, %v2036_v31, %v1293_v18  ;;  %v1834_v31 = vrot.slane %v6188_v41, 4  ;;  %v1838_v55 = vrot.slane %v6191_v45, 4  ;;  %v6217_v41 = vld [vmem:[#allocation36_spill] sm:$0xff] }
 0x1f3   : > { %v1442_v20 = vpop.permute.xlu1 %1441  ;;  %v1464_v30 = vpop.permute.xlu2 %1463  ;;  %v1652_v53 = vsel %vm1554_vm9, %v1648_v22, %v1651_v50  ;;  %v1710_v22 = vrot.slane %v4047_v3, 3 }
 0x1f4   : > { %v4841_v51 = vsel %vm2072_vm12, %v2041_v29, %v1442_v20  ;;  %v4852_v6 = vsel %vm2072_vm12, %v2063_v23, %v1464_v30  ;;  %v1662_v29 = vor.u32 %v1661_v62, %v1660_v26  ;;  %v1665_v20 = vor.u32 %v1664_v52, %v1663_v43 }
 0x1f5   : > { %v1707_v26 = vrot.slane %v4138_v5, 3  ;;  %v1702_v62 = vsel %vm1699_vm13, %v1700_v8, %v1701_v16  ;;  %v1709_v52 = vrot.slane %v6141_v19, 3  ;;  %v1721_v30 = vrot.slane %v4188_v46, 3 }
 0x1f6   : > { %1695 = vrot.lane.b32.xlu0 %v1659_v48, %s3534_s9  ;;  %v1666_v11 = vsel %vm1554_vm9, %v1662_v29, %v1665_v20  ;;  %v1722_v29 = vrot.slane %v4202_v60, 3  ;;  %v1725_v48 = vrot.slane %v4112_v37, 3  ;;  %v1831_v8 = vrot.slane %v6185_v38, 4 }
 0x1f7   : > { %v1708_v43 = vsel %vm1699_vm13, %v1706_v4, %v1707_v26  ;;  %v1711_v20 = vsel %vm1699_vm13, %v1709_v52, %v1710_v22  ;;  %v1833_v16 = vrot.slane %v6187_v15, 3  ;;  %v1840_v4 = vrot.slane %v6214_v24, 3  ;;  %v6215_v26 = vld [vmem:[#allocation47_spill] sm:$0xff]  ;;  %v6218_v52 = vld [vmem:[#allocation84_spill] sm:$0xff] }
 0x1f8   : > { %v6216_v15 = vld [vmem:[#allocation95_spill] sm:$0xff]  ;;  %vm2488_vm9 = vcmask 424960  }
 0x1f9   : > { %1693 = vrot.lane.b32.xlu1 %v1652_v53, %s3534_s9  ;;  %v4867_v28 = vpop.permute.xlu0 %1449  ;;  %v1724_v53 = vrot.slane %v4099_v0, 3 }
 0x1fa   : > { %1697 = vrot.lane.b32.xlu2 %v1666_v11, %s3534_s9  ;;  %v1830_v11 = vrot.slane %v6184_v36, 3 }
 0x1fb   : > { %v4858_v57 = vpop.permute.xlu1 %1447  ;;  %v1470_v9 = vpop.permute.xlu2 %1469  ;;  %v1726_v38 = vsel %vm1699_vm13, %v1724_v53, %v1725_v48  ;;  %v1947_v53 = vrot.slane %v4188_v46, 4  ;;  %v1948_v48 = vrot.slane %v4202_v60, 4 }
 0x1fc   : > { %v4873_v58 = vsel %vm2072_vm12, %v2069_v49, %v1470_v9  ;;  %v1837_v49 = vrot.slane %v6190_v63, 3  ;;  %v1723_v9 = vsel %vm1699_vm13, %v1721_v30, %v1722_v29  ;;  %v1832_v63 = vor.u32 %v1831_v8, %v1830_v11  ;;  %v6219_v11 = vld [vmem:[#allocation103_spill] sm:$0xff]  ;;  %v6220_v8 = vld [vmem:[#allocation44_spill] sm:$0xff] }
 0x1fd   : > { %v1949_v60 = vsel %vm1925_vm15, %v1947_v53, %v1948_v48 }
 0x1fe   : > { %1750 = vrot.lane.b32.xlu0 %v1705_v59, %s5982_s12  ;;  %v2028_v59 = vsel %vm2006_vm10, %v6217_v41, %v6216_v15 }
 0x1ff   : > { %v2061_v45 = vsel %vm2039_vm11, %v2028_v59, %v6218_v52  ;;  %v1950_v59 = vrot.slane %v4099_v0, 4 }
 0x201   : > { %1748 = vrot.lane.b32.xlu1 %v1702_v62, %s5982_s12  ;;  %v4887_v50 = vpop.permute.xlu0 %1455  ;;  %v1841_v62 = vrot.slane %v6215_v26, 4  ;;  %v6221_v26 = vld [vmem:[#allocation108_spill] sm:$0xff] }
 0x202   : > { %1752 = vrot.lane.b32.xlu2 %v1708_v43, %s5982_s12  ;;  %v1835_v43 = vor.u32 %v1834_v31, %v1833_v16  ;;  %v2032_v16 = vsel %vm2006_vm10, %v6220_v8, %v6219_v11 }
 0x203   : > { %v4881_v18 = vpop.permute.xlu1 %1453  ;;  %v4889_v23 = vpop.permute.xlu2 %1524 }
 0x204   : > { %v1836_v24 = vsel %vm1780_vm14, %v1832_v63, %v1835_v43  ;;  %v1951_v63 = vrot.slane %v4112_v37, 4 }
 0x206   : > { %1762 = vrot.lane.b32.xlu0 %v1723_v9, %s5982_s12  ;;  %v1842_v9 = vor.u32 %v1841_v62, %v1840_v4  ;;  %v6222_v4 = vld [vmem:[#allocation98_spill] sm:$0xff]  ;;  %v6223_v62 = vld [vmem:[#allocation49_spill] sm:$0xff]  ;;  %v1952_v56 = vsel %vm1925_vm15, %v1950_v59, %v1951_v63 }
 0x209   : > { %1754 = vrot.lane.b32.xlu1 %v1711_v20, %s5982_s12  ;;  %v1462_v22 = vpop.permute.xlu0 %1461  ;;  %v1839_v20 = vor.u32 %v1838_v55, %v1837_v49  ;;  %v2065_v49 = vsel %vm2039_vm11, %v2032_v16, %v6221_v26  ;;  %v6227_v16 = vld [vmem:[#allocation25_spill] sm:$0xff]  ;;  %v6228_v26 = vld [vmem:[#allocation19_spill] sm:$0xff] }
 0x20a   : > { %1764 = vrot.lane.b32.xlu2 %v1726_v38, %s5982_s12  ;;  %v2094_v30 = vsel %vm2072_vm12, %v2061_v45, %v1462_v22  ;;  %v2034_v38 = vsel %vm2006_vm10, %v6223_v62, %v6222_v4  ;;  %v6224_v45 = vld [vmem:[#allocation34_spill] sm:$0xff]  ;;  %v6251_v62 = vld [vmem:[#allocation80_spill] sm:$0xff] }
 0x20b   : > { %v4907_v36 = vpop.permute.xlu1 %1459  ;;  %v4917_v29 = vpop.permute.xlu2 %1530  ;;  %v1843_v31 = vsel %vm1780_vm14, %v1839_v20, %v1842_v9  ;;  %v2067_v43 = vsel %vm2039_vm11, %v2034_v38, %v4812_v2  ;;  %v1727_v22 = vrot.slane %v6224_v45, 3  ;;  %v6225_v20 = vld [vmem:[#allocation35_spill] sm:$0xff]  ;;  %v6231_v2 = vld [vmem:[#allocation21_spill] sm:$0xff] }
 0x20c   : > { %v1728_v9 = vrot.slane %v6225_v20, 3  ;;  %v1792_v38 = vrot.slane %v6231_v2, 4  ;;  %v2071_v2 = vsel %vm2039_vm11, %v2038_v44, %v6238_v35 }
 0x20e   : > { %1909 = vrot.lane.b32.xlu0 %v1843_v31, %s5984_s13  ;;  %v1713_v31 = vrot.slane %v6227_v16, 3 }
 0x211   : > { %1907 = vrot.lane.b32.xlu1 %v1836_v24, %s5984_s13  ;;  %v1468_v52 = vpop.permute.xlu0 %1467  ;;  %v6226_v24 = vld [vmem:[#allocation24_spill] sm:$0xff] }
 0x212   : > { %1988 = vrot.lane.b32.xlu2 %v1949_v60, %s3537_s14  ;;  %v2100_v53 = vsel %vm2072_vm12, %v2067_v43, %v1468_v52  ;;  %v1712_v11 = vrot.slane %v6226_v24, 3  ;;  %v6230_v60 = vld [vmem:[#allocation77_spill] sm:$0xff]  ;;  %v1729_v43 = vsel %vm1699_vm13, %v1727_v22, %v1728_v9  ;;  %v6232_v52 = vld [vmem:[#allocation51_spill] sm:$0xff] }
 0x213   : > { %v1466_v55 = vpop.permute.xlu1 %1465  ;;  %v4945_v48 = vpop.permute.xlu2 %1536  ;;  %v1791_v4 = vrot.slane %v6230_v60, 3  ;;  %v1844_v61 = vrot.slane %v6232_v52, 3  ;;  %v1848_v60 = vrot.slane %v6237_v25, 4  ;;  %v6240_v25 = vld [vmem:[#allocation15_spill] sm:$0xff] }
 0x214   : > { %v4935_v15 = vsel %vm2072_vm12, %v2065_v49, %v1466_v55  ;;  %v1788_v49 = vrot.slane %v6228_v26, 3  ;;  %v6229_v55 = vld [vmem:[#allocation20_spill] sm:$0xff]  ;;  %v1845_v26 = vrot.slane %v6235_v7, 4  ;;  %v1714_v59 = vsel %vm1699_vm13, %v1712_v11, %v1713_v31 }
 0x215   : > { %v1789_v37 = vrot.slane %v6229_v55, 4  ;;  %v1847_v55 = vrot.slane %v6236_v39, 3  ;;  %v1793_v22 = vor.u32 %v1792_v38, %v1791_v4  ;;  %v6239_v39 = vld [vmem:[#allocation14_spill] sm:$0xff]  ;;  %v1716_v52 = vrot.slane %v6240_v25, 3  ;;  %v6242_v4 = vld [vmem:[#allocation29_spill] sm:$0xff] }
 0x216   : > { %1766 = vrot.lane.b32.xlu0 %v1729_v43, %s5982_s12  ;;  %v1715_v40 = vrot.slane %v6239_v39, 3  ;;  %v1846_v43 = vor.u32 %v1845_v26, %v1844_v61  ;;  %v1796_v38 = vrot.slane %v6242_v4, 4  ;;  %v6249_v4 = vld [vmem:[#allocation32_spill] sm:$0xff] }
 0x217   : > { %v1790_v63 = vor.u32 %v1789_v37, %v1788_v49  ;;  %v1849_v12 = vor.u32 %v1848_v60, %v1847_v55  ;;  %v6241_v49 = vld [vmem:[#allocation28_spill] sm:$0xff]  ;;  %v6247_v60 = vld [vmem:[#allocation79_spill] sm:$0xff] }
 0x218   : > { %v1795_v37 = vrot.slane %v6241_v49, 3 }
 0x219   : > { %1990 = vrot.lane.b32.xlu1 %v1952_v56, %s3537_s14  ;;  %v1523_v7 = vpop.permute.xlu0 %1522  ;;  %v1794_v31 = vsel %vm1780_vm14, %v1790_v63, %v1793_v22  ;;  %v1850_v26 = vsel %vm1780_vm14, %v1846_v43, %v1849_v12  ;;  %v1805_v63 = vrot.slane %v6247_v60, 3  ;;  %v6248_v22 = vld [vmem:[#allocation12_spill] sm:$0xff] }
 0x21a   : > { %1756 = vrot.lane.b32.xlu2 %v1714_v59, %s5982_s12  ;;  %v2107_v35 = vsel %vm2105_vm0, %v4841_v51, %v1523_v7  ;;  %v6244_v59 = vld [vmem:[#allocation30_spill] sm:$0xff]  ;;  %v1717_v51 = vsel %vm1699_vm13, %v1715_v40, %v1716_v52  ;;  %v6245_v7 = vld [vmem:[#allocation13_spill] sm:$0xff]  ;;  %v1812_v40 = vrot.slane %v6251_v62, 3  ;;  %v1797_v12 = vor.u32 %v1796_v38, %v1795_v37 }
 0x21b   : > { %v1472_v56 = vpop.permute.xlu1 %1471  ;;  %v1543_v44 = vpop.permute.xlu2 %1542  ;;  %v1799_v14 = vrot.slane %v6244_v59, 4  ;;  %v1802_v61 = vrot.slane %v6245_v7, 3  ;;  %v6250_v59 = vld [vmem:[#allocation31_spill] sm:$0xff]  ;;  %v6252_v52 = vld [vmem:[#allocation33_spill] sm:$0xff]  ;;  %v1929_v37 = vrot.slane %v4103_v1, 4  ;;  %v1930_v38 = vrot.slane %v4117_v27, 4 }
 0x21c   : > { %v4968_v9 = vsel %vm2072_vm12, %v2071_v2, %v1472_v56  ;;  %v4976_v11 = vsel %vm2105_vm0, %v2094_v30, %v1543_v44  ;;  %v6243_v2 = vld [vmem:[#allocation78_spill] sm:$0xff]  ;;  %v6246_v30 = vld [vmem:[#allocation11_spill] sm:$0xff]  ;;  %v1806_v44 = vrot.slane %v6248_v22, 4  ;;  %v1813_v7 = vrot.slane %v6252_v52, 4  ;;  %v6257_v52 = vld [vmem:[#allocation81_spill] sm:$0xff] }
 0x21d   : > { %v1798_v56 = vrot.slane %v6243_v2, 3  ;;  %v1803_v55 = vrot.slane %v6246_v30, 4  ;;  %v1809_v2 = vrot.slane %v6249_v4, 3 }
 0x21e   : > { %1911 = vrot.lane.b32.xlu0 %v1850_v26, %s5984_s13  ;;  %v1807_v22 = vor.u32 %v1806_v44, %v1805_v63  ;;  %v1814_v32 = vor.u32 %v1813_v7, %v1812_v40  ;;  %v1931_v63 = vsel %vm1925_vm15, %v1929_v37, %v1930_v38  ;;  %v6253_v44 = vld [vmem:[#allocation26_spill] sm:$0xff]  ;;  %v1819_v7 = vrot.slane %v6257_v52, 3 }
 0x21f   : > { %v1800_v43 = vor.u32 %v1799_v14, %v1798_v56  ;;  %v1804_v8 = vor.u32 %v1803_v55, %v1802_v61  ;;  %v1953_v61 = vrot.slane %v6224_v45, 4  ;;  %v1954_v55 = vrot.slane %v6225_v20, 4 }
 0x220   : > { %v1936_v52 = vrot.slane %v4047_v3, 4 }
 0x221   : > { %1895 = vrot.lane.b32.xlu1 %v1794_v31, %s5984_s13  ;;  %v1810_v31 = vrot.slane %v6250_v59, 4  ;;  %v1529_v30 = vpop.permute.xlu0 %1528  ;;  %v1801_v4 = vsel %vm1780_vm14, %v1797_v12, %v1800_v43  ;;  %v1808_v62 = vsel %vm1780_vm14, %v1804_v8, %v1807_v22  ;;  %v6255_v59 = vld [vmem:[#allocation18_spill] sm:$0xff]  ;;  %v6258_v12 = vld [vmem:[#allocation17_spill] sm:$0xff]  ;;  %v1955_v20 = vsel %vm1925_vm15, %v1953_v61, %v1954_v55 }
 0x222   : > { %1758 = vrot.lane.b32.xlu2 %v1717_v51, %s5982_s12  ;;  %v1816_v27 = vrot.slane %v6255_v59, 3  ;;  %v1820_v43 = vrot.slane %v6258_v12, 4  ;;  %v1932_v59 = vrot.slane %v4125_v47, 4 }
 0x223   : > { %v4991_v49 = vpop.permute.xlu1 %1526  ;;  %v1549_v60 = vpop.permute.xlu2 %1548  ;;  %v1811_v33 = vor.u32 %v1810_v31, %v1809_v2  ;;  %v6256_v31 = vld [vmem:[#allocation16_spill] sm:$0xff] }
 0x224   : > { %v4999_v26 = vsel %vm2105_vm0, %v2100_v53, %v1549_v60  ;;  %v1817_v40 = vrot.slane %v6256_v31, 4  ;;  %v1821_v38 = vor.u32 %v1820_v43, %v1819_v7  ;;  %v1933_v31 = vrot.slane %v4138_v5, 4  ;;  %v6262_v7 = vld [vmem:[#allocation38_spill] sm:$0xff]  ;;  %v6263_v43 = vld [vmem:[#allocation83_spill] sm:$0xff] }
 0x225   : > { %v1815_v14 = vsel %vm1780_vm14, %v1811_v33, %v1814_v32  ;;  %v1718_v32 = vrot.slane %v6253_v44, 3  ;;  %v6254_v33 = vld [vmem:[#allocation27_spill] sm:$0xff] }
 0x226   : > { %1899 = vrot.lane.b32.xlu0 %v1808_v62, %s5984_s13  ;;  %v1719_v2 = vrot.slane %v6254_v33, 3  ;;  %v6260_v62 = vld [vmem:[#allocation102_spill] sm:$0xff]  ;;  %v1818_v37 = vor.u32 %v1817_v40, %v1816_v27  ;;  %v1934_v12 = vsel %vm1925_vm15, %v1932_v59, %v1933_v31  ;;  %v6264_v5 = vld [vmem:[#allocation39_spill] sm:$0xff]  ;;  %v1941_v31 = vrot.slane %v6239_v39, 4 }
 0x228   : > { %v1822_v27 = vsel %vm1780_vm14, %v1818_v37, %v1821_v38  ;;  %v1938_v38 = vrot.slane %v6226_v24, 4 }
 0x229   : > { %1897 = vrot.lane.b32.xlu1 %v1801_v4, %s5984_s13  ;;  %v1535_v53 = vpop.permute.xlu0 %1534  ;;  %v1720_v4 = vsel %vm1699_vm13, %v1718_v32, %v1719_v2  ;;  %v1935_v2 = vrot.slane %v6141_v19, 4 }
 0x22a   : > { %1901 = vrot.lane.b32.xlu2 %v1815_v14, %s5984_s13 }
 0x22b   : > { %v5005_v51 = vpop.permute.xlu1 %1532  ;;  %v1668_v56 = vpop.permute.xlu2 %1667 }
 0x22c   : > { %v5014_v8 = vsel %vm2138_vm1, %v2107_v35, %v1668_v56  ;;  %v6259_v35 = vld [vmem:[#allocation97_spill] sm:$0xff] }
 0x22d   : > { %v2014_v60 = vsel %vm2006_vm10, %v6141_v19, %v6259_v35  ;;  %v1827_v35 = vrot.slane %v6264_v5, 4  ;;  %v6268_v5 = vld [vmem:[#allocation105_spill] sm:$0xff] }
 0x22e   : > { %1992 = vrot.lane.b32.xlu0 %v1955_v20, %s3537_s14  ;;  %v2047_v14 = vsel %vm2039_vm11, %v2014_v60, %v6260_v62  ;;  %v1826_v20 = vrot.slane %v6263_v43, 3  ;;  %v6265_v60 = vld [vmem:[#allocation100_spill] sm:$0xff]  ;;  %v1854_v43 = vrot.slane %v6202_v10, 3 }
 0x22f   : > { %v2080_v56 = vsel %vm2072_vm12, %v2047_v14, %v4858_v57  ;;  %v6261_v57 = vld [vmem:[#allocation40_spill] sm:$0xff]  ;;  %v2020_v19 = vsel %vm2006_vm10, %v6253_v44, %v6265_v60  ;;  %v1944_v60 = vrot.slane %v6253_v44, 4 }
 0x230   : > { %v2113_v55 = vsel %vm2105_vm0, %v2080_v56, %v1529_v30  ;;  %v1823_v40 = vrot.slane %v6261_v57, 3  ;;  %v1824_v30 = vrot.slane %v6262_v7, 4  ;;  %v6266_v62 = vld [vmem:[#allocation104_spill] sm:$0xff]  ;;  %v1939_v56 = vrot.slane %v6227_v16, 4 }
 0x231   : > { %1976 = vrot.lane.b32.xlu1 %v1931_v63, %s3537_s14  ;;  %v1541_v61 = vpop.permute.xlu0 %1540  ;;  %v2053_v14 = vsel %vm2039_vm11, %v2020_v19, %v6266_v62  ;;  %v1942_v57 = vrot.slane %v6240_v25, 4  ;;  %v1851_v25 = vrot.slane %v6200_v42, 3  ;;  %v1945_v19 = vrot.slane %v6254_v33, 4  ;;  %v6270_v33 = vld [vmem:[#allocation82_spill] sm:$0xff] }
 0x232   : > { %1760 = vrot.lane.b32.xlu2 %v1720_v4, %s5982_s12  ;;  %v1937_v4 = vsel %vm1925_vm15, %v1935_v2, %v1936_v52  ;;  %v1825_v59 = vor.u32 %v1824_v30, %v1823_v40  ;;  %v1940_v16 = vsel %vm1925_vm15, %v1938_v38, %v1939_v56 }
 0x233   : > { %v5029_v22 = vpop.permute.xlu1 %1538  ;;  %v1674_v63 = vpop.permute.xlu2 %1673  ;;  %v1943_v30 = vsel %vm1925_vm15, %v1941_v31, %v1942_v57  ;;  %v1946_v56 = vsel %vm1925_vm15, %v1944_v60, %v1945_v19 }
 0x234   : > { %v5041_v32 = vsel %vm2138_vm1, %v2113_v55, %v1674_v63  ;;  %v2086_v55 = vsel %vm2072_vm12, %v2053_v14, %v4881_v18  ;;  %v6267_v18 = vld [vmem:[#allocation101_spill] sm:$0xff] }
 0x235   : > { %v2119_v2 = vsel %vm2105_vm0, %v2086_v55, %v1535_v53  ;;  %v2026_v40 = vsel %vm2006_vm10, %v6224_v45, %v6267_v18 }
 0x236   : > { %1978 = vrot.lane.b32.xlu0 %v1934_v12, %s3537_s14  ;;  %v1852_v12 = vrot.slane %v6201_v54, 4 }
 0x238   : > { %v1853_v44 = vor.u32 %v1852_v12, %v1851_v25  ;;  %v6275_v12 = vld [vmem:[#allocation86_spill] sm:$0xff] }
 0x239   : > { %1903 = vrot.lane.b32.xlu1 %v1822_v27, %s5984_s13  ;;  %v1547_v63 = vpop.permute.xlu0 %1546  ;;  %v1828_v27 = vor.u32 %v1827_v35, %v1826_v20  ;;  %v1855_v20 = vrot.slane %v6203_v21, 4  ;;  %v2059_v35 = vsel %vm2039_vm11, %v2026_v40, %v6268_v5  ;;  %v6276_v5 = vld [vmem:[#allocation109_spill] sm:$0xff] }
 0x23a   : > { %1980 = vrot.lane.b32.xlu2 %v1937_v4, %s3537_s14  ;;  %v2131_v52 = vsel %vm2105_vm0, %v4935_v15, %v1547_v63  ;;  %v2092_v54 = vsel %vm2072_vm12, %v2059_v35, %v4907_v36  ;;  %v1730_v4 = vrot.slane %v6217_v41, 3  ;;  %v2010_v36 = vsel %vm2006_vm10, %v4103_v1, %v6270_v33  ;;  %v6277_v35 = vld [vmem:[#allocation99_spill] sm:$0xff]  ;;  %v6281_v33 = vld [vmem:[#allocation9_spill] sm:$0xff] }
 0x23b   : > { %v1545_v3 = vpop.permute.xlu1 %1544  ;;  %v1829_v53 = vsel %vm1780_vm14, %v1825_v59, %v1828_v27  ;;  %v2125_v10 = vsel %vm2105_vm0, %v2092_v54, %v1541_v61  ;;  %v1856_v38 = vor.u32 %v1855_v20, %v1854_v43  ;;  %v6271_v61 = vld [vmem:[#allocation106_spill] sm:$0xff]  ;;  %v2016_v43 = vsel %vm2006_vm10, %v6226_v24, %v6275_v12 }
 0x23c   : > { %v5061_v37 = vsel %vm2105_vm0, %v4852_v6, %v1545_v3  ;;  %v1680_v6 = vpop.permute.xlu2 %1679  ;;  %v2043_v55 = vsel %vm2039_vm11, %v2010_v36, %v6271_v61  ;;  %v1781_v36 = vrot.slane %v6281_v33, 3  ;;  %v6282_v61 = vld [vmem:[#allocation7_spill] sm:$0xff]  ;;  %v6290_v33 = vld [vmem:[#allocation89_spill] sm:$0xff] }
 0x23d   : > { %v5074_v7 = vsel %vm2138_vm1, %v2119_v2, %v1680_v6  ;;  %v2076_v59 = vsel %vm2072_vm12, %v2043_v55, %v4847_v13  ;;  %v6273_v2 = vld [vmem:[#allocation107_spill] sm:$0xff]  ;;  %v1857_v57 = vsel %vm1780_vm14, %v1853_v44, %v1856_v38  ;;  %v1956_v13 = vrot.slane %v6217_v41, 4 }
 0x23e   : > { %1905 = vrot.lane.b32.xlu0 %v1829_v53, %s5984_s13  ;;  %v2109_v1 = vsel %vm2105_vm0, %v2076_v59, %v4889_v23  ;;  %v2049_v41 = vsel %vm2039_vm11, %v2016_v43, %v6276_v5  ;;  %v1782_v55 = vrot.slane %v6282_v61, 4  ;;  %v6284_v59 = vld [vmem:[#allocation8_spill] sm:$0xff] }
 0x23f   : > { %v2082_v60 = vsel %vm2072_vm12, %v2049_v41, %v4867_v28 }
 0x240   : > { %v2115_v24 = vsel %vm2105_vm0, %v2082_v60, %v4917_v29  ;;  %v6286_v60 = vld [vmem:[#allocation112_spill] sm:$0xff] }
 0x241   : > { %1982 = vrot.lane.b32.xlu1 %v1940_v16, %s3537_s14  ;;  %v1553_v42 = vpop.permute.xlu0 %1552  ;;  %v6274_v16 = vld [vmem:[#allocation41_spill] sm:$0xff] }
 0x242   : > { %1984 = vrot.lane.b32.xlu2 %v1943_v30, %s3537_s14  ;;  %v2137_v21 = vsel %vm2105_vm0, %v4968_v9, %v1553_v42  ;;  %v6272_v9 = vld [vmem:[#allocation96_spill] sm:$0xff]  ;;  %v6279_v42 = vld [vmem:[#allocation43_spill] sm:$0xff] }
 0x243   : > { %v1551_v15 = vpop.permute.xlu1 %1550  ;;  %v2012_v63 = vsel %vm2006_vm10, %v4125_v47, %v6272_v9  ;;  %v6283_v9 = vld [vmem:[#allocation76_spill] sm:$0xff] }
 0x244   : > { %v5092_v45 = vsel %vm2105_vm0, %v4873_v58, %v1551_v15  ;;  %v1686_v3 = vpop.permute.xlu2 %1685  ;;  %v6269_v58 = vld [vmem:[#allocation37_spill] sm:$0xff]  ;;  %v2045_v6 = vsel %vm2039_vm11, %v2012_v63, %v6273_v2  ;;  %v1784_v63 = vrot.slane %v6283_v9, 3  ;;  %v1783_v2 = vor.u32 %v1782_v55, %v1781_v36  ;;  %v6292_v55 = vld [vmem:[#allocation42_spill] sm:$0xff] }
 0x245   : > { %v1731_v62 = vrot.slane %v6269_v58, 3  ;;  %v5105_v14 = vsel %vm2138_vm1, %v2125_v10, %v1686_v3  ;;  %v2078_v18 = vsel %vm2072_vm12, %v2045_v6, %v6274_v16  ;;  %v1957_v40 = vrot.slane %v6269_v58, 4  ;;  %v6280_v58 = vld [vmem:[#allocation23_spill] sm:$0xff] }
 0x246   : > { %v2111_v23 = vsel %vm2105_vm0, %v2078_v18, %v4991_v49  ;;  %v2018_v49 = vsel %vm2006_vm10, %v6239_v39, %v6277_v35  ;;  %v1734_v39 = vrot.slane %v6280_v58, 3  ;;  %v1861_v36 = vrot.slane %v6290_v33, 3 }
 0x247   : > { %v1732_v31 = vsel %vm1699_vm13, %v1730_v4, %v1731_v62  ;;  %v1958_v20 = vsel %vm1925_vm15, %v1956_v13, %v1957_v40  ;;  %v1733_v4 = vrot.slane %v6147_v34, 3 }
 0x248   : > { %1768 = vrot.lane.b32.xlu0 %v1732_v31, %s5982_s12  ;;  %v1785_v31 = vrot.slane %v6284_v59, 4 }
 0x249   : > { %1986 = vrot.lane.b32.xlu1 %v1946_v56, %s3537_s14  ;;  %v1672_v53 = vpop.permute.xlu0 %1671  ;;  %v1735_v56 = vsel %vm1699_vm13, %v1733_v4, %v1734_v39  ;;  %v6288_v39 = vld [vmem:[#allocation57_spill] sm:$0xff] }
 0x24a   : > { %1913 = vrot.lane.b32.xlu2 %v1857_v57, %s5984_s13  ;;  %v2144_v30 = vsel %vm2138_vm1, %v2111_v23, %v1672_v53  ;;  %v1786_v6 = vor.u32 %v1785_v31, %v1784_v63 }
 0x24b   : > { %v1670_v27 = vpop.permute.xlu1 %1669 }
 0x24c   : > { %v5129_v47 = vsel %vm2138_vm1, %v2109_v1, %v1670_v27  ;;  %v1692_v15 = vpop.permute.xlu2 %1691  ;;  %v1787_v57 = vsel %vm1780_vm14, %v1783_v2, %v1786_v6 }
 0x24d   : > { %v5138_v25 = vsel %vm2138_vm1, %v2131_v52, %v1692_v15  ;;  %v6278_v52 = vld [vmem:[#allocation110_spill] sm:$0xff] }
 0x24e   : > { %v2051_v19 = vsel %vm2039_vm11, %v2018_v49, %v6278_v52  ;;  %v6285_v49 = vld [vmem:[#allocation91_spill] sm:$0xff] }
 0x24f   : > { %v2084_v10 = vsel %vm2072_vm12, %v2051_v19, %v6279_v42 }
 0x250   : > { %v2117_v28 = vsel %vm2105_vm0, %v2084_v10, %v5005_v51  ;;  %v6287_v10 = vld [vmem:[#allocation10_spill] sm:$0xff] }
 0x251   : > { %1994 = vrot.lane.b32.xlu1 %v1958_v20, %s3537_s14  ;;  %v1678_v62 = vpop.permute.xlu0 %1677 }
 0x252   : > { %v5166_v44 = vsel %vm2138_vm1, %v2117_v28, %v1678_v62 }
 0x253   : > { %v1676_v54 = vpop.permute.xlu1 %1675 }
 0x254   : > { %v5159_v3 = vsel %vm2138_vm1, %v2115_v24, %v1676_v54  ;;  %v1698_v38 = vpop.permute.xlu2 %1697 }
 0x255   : > { %v5169_v29 = vsel %vm2138_vm1, %v2137_v21, %v1698_v38 }
 0x259   : > { %1770 = vrot.lane.b32.xlu1 %v1735_v56, %s5982_s12  ;;  %v1684_v1 = vpop.permute.xlu0 %1683  ;;  %v6291_v56 = vld [vmem:[#allocation59_spill] sm:$0xff] }
 0x25a   : > { %v1862_v61 = vrot.slane %v6291_v56, 4 }
 0x25b   : > { %v1682_v51 = vpop.permute.xlu1 %1681 }
 0x25c   : > { %v1753_v27 = vpop.permute.xlu2 %1752 }
 0x25d   : > { %v5178_v21 = vsel %vm2171_vm2, %v2144_v30, %v1753_v27 }
 0x261   : > { %1893 = vrot.lane.b32.xlu1 %v1787_v57, %s5984_s13  ;;  %v1690_v13 = vpop.permute.xlu0 %1689 }
 0x262   : > { %v5188_v40 = vsel %vm2138_vm1, %v5061_v37, %v1690_v13 }
 0x263   : > { %v1688_v16 = vpop.permute.xlu1 %1687 }
 0x264   : > { %v5184_v18 = vsel %vm2138_vm1, %v4976_v11, %v1688_v16  ;;  %v1765_v23 = vpop.permute.xlu2 %1764 }
 0x269   : > { %v1696_v15 = vpop.permute.xlu0 %1695 }
 0x26a   : > { %v5196_v12 = vsel %vm2138_vm1, %v5092_v45, %v1696_v15  ;;  %v6294_v15 = vld [vmem:[#allocation6_spill] sm:$0xff] }
 0x26b   : > { %v1694_v53 = vpop.permute.xlu1 %1693 }
 0x26c   : > { %v5192_v30 = vsel %vm2138_vm1, %v4999_v26, %v1694_v53  ;;  %v1989_v43 = vpop.permute.xlu2 %1988  ;;  %v2022_v26 = vsel %vm2006_vm10, %v4188_v46, %v6285_v49  ;;  %v2024_v46 = vsel %vm2006_vm10, %v4099_v0, %v6287_v10  ;;  %vm2505_vm10 = vcmask 719872  }
 0x26d   : > { %v2055_v52 = vsel %vm2039_vm11, %v2022_v26, %v6286_v60  ;;  %v2057_v9 = vsel %vm2039_vm11, %v2024_v46, %v6292_v55  ;;  %vm2522_vm11 = vcmask 1014784  }
 0x26e   : > { %v2088_v45 = vsel %vm2072_vm12, %v2055_v52, %v4887_v50  ;;  %v1858_v50 = vrot.slane %v6288_v39, 3  ;;  %v2090_v0 = vsel %vm2072_vm12, %v2057_v9, %v4816_v17  ;;  %v6296_v9 = vld [vmem:[#allocation48_spill] sm:$0xff]  ;;  %vm2930_vm12 = vcmask 519168  }
 0x26f   : > { %v2123_v63 = vsel %vm2105_vm0, %v2090_v0, %v5029_v22  ;;  %v1959_v22 = vrot.slane %v6147_v34, 4  ;;  %v6297_v0 = vld [vmem:[#allocation62_spill] sm:$0xff] }
 0x270   : > { %v2156_v59 = vsel %vm2138_vm1, %v2123_v63, %v1684_v1  ;;  %v1960_v1 = vrot.slane %v6280_v58, 4  ;;  %v1865_v63 = vrot.slane %v6297_v0, 3 }
 0x271   : > { %v1751_v5 = vpop.permute.xlu0 %1750  ;;  %v2189_v2 = vsel %vm2171_vm2, %v2156_v59, %v1765_v23  ;;  %v6293_v23 = vld [vmem:[#allocation5_spill] sm:$0xff] }
 0x272   : > { %v1926_v53 = vrot.slane %v6293_v23, 4  ;;  %v1961_v49 = vsel %vm1925_vm15, %v1959_v22, %v1960_v1  ;;  %v6301_v22 = vld [vmem:[#allocation68_spill] sm:$0xff]  ;;  %v6302_v23 = vld [vmem:[#allocation90_spill] sm:$0xff] }
 0x273   : > { %v1749_v20 = vpop.permute.xlu1 %1748  ;;  %v1872_v1 = vrot.slane %v6301_v22, 3 }
 0x274   : > { %v5200_v11 = vsel %vm2171_vm2, %v5014_v8, %v1749_v20  ;;  %v5202_v37 = vpop.permute.xlu2 %1756  ;;  %v2121_v8 = vsel %vm2105_vm0, %v2088_v45, %v4945_v48  ;;  %v6289_v48 = vld [vmem:[#allocation58_spill] sm:$0xff] }
 0x275   : > { %v2154_v24 = vsel %vm2138_vm1, %v2121_v8, %v1682_v51  ;;  %v1859_v38 = vrot.slane %v6289_v48, 4  ;;  %v1863_v51 = vor.u32 %v1862_v61, %v1861_v36  ;;  %v6295_v61 = vld [vmem:[#allocation44_spill] sm:$0xff] }
 0x276   : > { %v1736_v55 = vrot.slane %v6295_v61, 3 }
 0x277   : > { %v1860_v31 = vor.u32 %v1859_v38, %v1858_v50 }
 0x279   : > { %v1763_v35 = vpop.permute.xlu0 %1762  ;;  %v1864_v17 = vsel %vm1780_vm14, %v1860_v31, %v1863_v51  ;;  %v6298_v31 = vld [vmem:[#allocation49_spill] sm:$0xff] }
 0x27a   : > { %v2187_v54 = vsel %vm2171_vm2, %v2154_v24, %v1763_v35  ;;  %v1739_v51 = vrot.slane %v6298_v31, 3 }
 0x27b   : > { %v1755_v41 = vpop.permute.xlu1 %1754 }
 0x27c   : > { %v5211_v19 = vpop.permute.xlu2 %1758  ;;  %v2179_v34 = vsel %vm2171_vm2, %v5041_v32, %v1755_v41 }
 0x27d   : > { %v2183_v48 = vsel %vm2171_vm2, %v5166_v44, %v5211_v19 }
 0x281   : > { %v1910_v62 = vpop.permute.xlu0 %1909 }
 0x282   : > { %v2222_v27 = vsel %vm2204_vm5, %v2189_v2, %v1910_v62  ;;  %v2181_v62 = vsel %vm2171_vm2, %v5159_v3, %v5202_v37  ;;  %v1737_v3 = vrot.slane %v6296_v9, 3  ;;  %v6299_v2 = vld [vmem:[#allocation50_spill] sm:$0xff] }
 0x283   : > { %v1908_v42 = vpop.permute.xlu1 %1907 }
 0x284   : > { %v2220_v4 = vsel %vm2204_vm5, %v2187_v54, %v1908_v42  ;;  %v1902_v6 = vpop.permute.xlu2 %1901  ;;  %v2175_v54 = vsel %vm2171_vm2, %v5129_v47, %v1751_v5  ;;  %v1738_v19 = vsel %vm1699_vm13, %v1736_v55, %v1737_v3  ;;  %v3229_v3 = vld [vmem:[%s5810_s3 + $0x30] sm:$0xff] }
 0x285   : > { %v5223_v28 = vsel %vm2237_vm4, %v2220_v4, %v1989_v43  ;;  %v1927_v43 = vrot.slane %v6294_v15, 4  ;;  %v2214_v38 = vsel %vm2204_vm5, %v2181_v62, %v1902_v6  ;;  %v1740_v6 = vrot.slane %v6299_v2, 3  ;;  %v6303_v15 = vld [vmem:[#allocation63_spill] sm:$0xff] }
 0x286   : > { %2380 = vrot.lane.b32.xlu0 %v5223_v28, %s5994_s15 }
 0x287   : > { %v1928_v60 = vsel %vm1925_vm15, %v1926_v53, %v1927_v43  ;;  %v1868_v53 = vrot.slane %v6302_v23, 3  ;;  %v1869_v43 = vrot.slane %v6303_v15, 4 }
 0x289   : > { %v1767_v13 = vpop.permute.xlu0 %1766 }
 0x28a   : > { %v2191_v32 = vsel %vm2171_vm2, %v5105_v14, %v1767_v13 }
 0x28b   : > { %v1991_v57 = vpop.permute.xlu1 %1990 }
 0x28c   : > { %v5240_v16 = vsel %vm2237_vm4, %v2222_v27, %v1991_v57  ;;  %v1761_v35 = vpop.permute.xlu2 %1760  ;;  %v6300_v27 = vld [vmem:[#allocation60_spill] sm:$0xff] }
 0x28d   : > { %2382 = vrot.lane.b32.xlu1 %v5240_v16, %s5994_s15  ;;  %2397 = vrot.lane.b32.xlu2 %v5240_v16, %s3537_s14  ;;  %v2185_v59 = vsel %vm2171_vm2, %v5074_v7, %v1761_v35  ;;  %v1866_v57 = vrot.slane %v6300_v27, 4  ;;  %v6305_v35 = vld [vmem:[#allocation92_spill] sm:$0xff] }
 0x28e   : > { %1915 = vrot.lane.b32.xlu0 %v1864_v17, %s5984_s13 }
 0x291   : > { %v1912_v26 = vpop.permute.xlu0 %1911 }
 0x292   : > { %v2224_v46 = vsel %vm2204_vm5, %v2191_v32, %v1912_v26  ;;  %v1875_v26 = vrot.slane %v6305_v35, 3  ;;  %v6314_v35 = vld [vmem:[#allocation69_spill] sm:$0xff] }
 0x293   : > { %v1896_v20 = vpop.permute.xlu1 %1895 }
 0x294   : > { %v1981_v45 = vpop.permute.xlu2 %1980  ;;  %v2208_v42 = vsel %vm2204_vm5, %v2175_v54, %v1896_v20  ;;  %v1870_v54 = vor.u32 %v1869_v43, %v1868_v53  ;;  %v3225_v53 = vld [vmem:[%s5810_s3 + $0x10] sm:$0xff] }
 0x295   : > { %1996 = vrot.lane.b32.xlu2 %v1961_v49, %s3537_s14  ;;  %v6304_v49 = vld [vmem:[#allocation65_spill] sm:$0xff] }
 0x296   : > { %1974 = vrot.lane.b32.xlu0 %v1928_v60, %s3537_s14  ;;  %v1873_v7 = vrot.slane %v6304_v49, 4  ;;  %v6306_v60 = vld [vmem:[#allocation66_spill] sm:$0xff]  ;;  %v6313_v49 = vld [vmem:[#allocation61_spill] sm:$0xff] }
 0x299   : > { %v1900_v58 = vpop.permute.xlu0 %1899 }
 0x29a   : > { %v2212_v8 = vsel %vm2204_vm5, %v2179_v34, %v1900_v58  ;;  %v1741_v34 = vsel %vm1699_vm13, %v1739_v51, %v1740_v6  ;;  %v1874_v58 = vor.u32 %v1873_v7, %v1872_v1  ;;  %v6307_v6 = vld [vmem:[#allocation72_spill] sm:$0xff]  ;;  %v6310_v1 = vld [vmem:[#allocation73_spill] sm:$0xff]  ;;  %v1742_v7 = vrot.slane %v6313_v49, 3 }
 0x29b   : > { %v1898_v52 = vpop.permute.xlu1 %1897  ;;  %v5260_v24 = vsel %vm2237_vm4, %v2212_v8, %v1981_v45  ;;  %v1867_v8 = vor.u32 %v1866_v57, %v1865_v63  ;;  %v5387_v63 = vld [vmem:[%s5810_s3 + $0x80] sm:$0xff]  ;;  %v1879_v27 = vrot.slane %v6307_v6, 3  ;;  %v6308_v57 = vld [vmem:[#allocation67_spill] sm:$0xff]  ;;  %v1883_v23 = vrot.slane %v6310_v1, 4  ;;  %v6319_v6 = vld [vmem:[#allocation74_spill] sm:$0xff] }
 0x29c   : > { %2312 = vrot.lane.b32.xlu1 %v5260_v24, %s5992_s16  ;;  %v2210_v14 = vsel %vm2204_vm5, %v5178_v21, %v1898_v52  ;;  %v1985_v56 = vpop.permute.xlu2 %1984  ;;  %v1876_v52 = vrot.slane %v6306_v60, 4  ;;  %v1968_v60 = vrot.slane %v6313_v49, 4 }
 0x29e   : > { %v1877_v45 = vor.u32 %v1876_v52, %v1875_v26  ;;  %v1743_v26 = vrot.slane %v6314_v35, 3  ;;  %v1969_v52 = vrot.slane %v6314_v35, 4 }
 0x2a0   : > { %v1878_v32 = vsel %vm1780_vm14, %v1874_v58, %v1877_v45  ;;  %v1744_v45 = vsel %vm1699_vm13, %v1742_v7, %v1743_v26  ;;  %v3231_v7 = vld [vmem:[%s5810_s3 + $0x40] sm:$0xff] }
 0x2a1   : > { %v1993_v4 = vpop.permute.xlu0 %1992 }
 0x2a2   : > { %v5276_v39 = vsel %vm2237_vm4, %v2224_v46, %v1993_v4  ;;  %v1871_v46 = vsel %vm1780_vm14, %v1867_v8, %v1870_v54  ;;  %v1970_v54 = vsel %vm1925_vm15, %v1968_v60, %v1969_v52 }
 0x2a3   : > { %v1977_v10 = vpop.permute.xlu1 %1976  ;;  %2399 = vrot.lane.b32.xlu0 %v5276_v39, %s3537_s14 }
 0x2a4   : > { %v5270_v41 = vsel %vm2237_vm4, %v2208_v42, %v1977_v10  ;;  %v1962_v42 = vrot.slane %v6295_v61, 4  ;;  %v1963_v10 = vrot.slane %v6296_v9, 4  ;;  %v5364_v61 = vld [vmem:[%s5810_s3 + $0x90] sm:$0xff]  ;;  %v5374_v9 = vld [vmem:[%s5810_s3 + $0x88] sm:$0xff]  ;;  %v1914_v0 = vpop.permute.xlu2 %1913 }
 0x2a5   : > { %2278 = vrot.lane.b32.xlu2 %v5270_v41, %s3540_s17 }
 0x2a6   : > { %v1964_v4 = vsel %vm1925_vm15, %v1962_v42, %v1963_v10  ;;  %v3223_v42 = vld [vmem:[%s5810_s3] sm:$0xff]  ;;  %v3238_v10 = vld [vmem:[%s5810_s3 + $0x78] sm:$0xff] }
 0x2a7   : > { %2800 = vmatpush.bf16.msra.mxu1 %v3238_v10 }
 0x2a9   : > { %v1979_v5 = vpop.permute.xlu0 %1978 }
 0x2aa   : > { %v5283_v50 = vsel %vm2237_vm4, %v2210_v14, %v1979_v5  ;;  %v1965_v14 = vrot.slane %v6298_v31, 4  ;;  %v1966_v5 = vrot.slane %v6299_v2, 4  ;;  %v3226_v2 = vld [vmem:[%s5810_s3 + $0x18] sm:$0xff] }
 0x2ab   : > { %v1904_v47 = vpop.permute.xlu1 %1903 }
 0x2ac   : > { %v2216_v21 = vsel %vm2204_vm5, %v2183_v48, %v1904_v47  ;;  %v2603_v47 = vld [vmem:[%s5810_s3 + $0xa0] sm:$0x3] }
 0x2ad   : > { %2295 = vrot.lane.b32.xlu2 %v5283_v50, %s3541_s10  ;;  %v5303_v37 = vsel %vm2237_vm4, %v2216_v21, %v1985_v56  ;;  %v2689_v62 = vunpack.c.l.b16 %v2603_v47  ;;  %v3230_v56 = vld [vmem:[%s5810_s3 + $0x38] sm:$0xff] }
 0x2ae   : > { %2751 = vmatpush.bf16.msra.mxu0 %v3230_v56  ;;  %3244 = vmatpush.bf16.msra.mxu3 %v3230_v56 }
 0x2af   : > { %v2710_v48 = vpack.c.b16 %v2689_v62, %v2689_v62  ;;  %v3235_v62 = vld [vmem:[%s5810_s3 + $0x60] sm:$0xff] }
 0x2b1   : > { %v1906_v44 = vpop.permute.xlu0 %1905  ;;  %v5344_v21 = vsel %vm940_vm3, %v2710_v48, 0  ;;  %vm2731_vm3 = vcmask 556032  }
 0x2b2   : > { %v2218_v13 = vsel %vm2204_vm5, %v2185_v59, %v1906_v44  ;;  %2852 = vmatpush.bf16.msra.mxu2 %v5344_v21  ;;  %2752 = vmatpush.bf16.msra.mxu0 %v3229_v3  ;;  %v3228_v59 = vld [vmem:[%s5810_s3 + $0x28] sm:$0xff] }
 0x2b3   : > { %v1983_v33 = vpop.permute.xlu1 %1982  ;;  %3245 = vmatpush.bf16.msra.mxu3 %v3229_v3 }
 0x2b4   : > { %v5296_v36 = vsel %vm2237_vm4, %v2214_v38, %v1983_v33  ;;  %v1967_v38 = vsel %vm1925_vm15, %v1965_v14, %v1966_v5  ;;  %v5353_v33 = vld [vmem:[%s5810_s3 + $0x98] sm:$0xff]  ;;  %v3236_v5 = vld [vmem:[%s5810_s3 + $0x68] sm:$0xff] }
 0x2b5   : > { %2329 = vrot.lane.b32.xlu0 %v5296_v36, %s5988_s8  ;;  %2346 = vrot.lane.b32.xlu2 %v5303_v37, %s5990_s27  ;;  %s6316_s8 = smov 24  }
 0x2b6   : > { %2853 = vmatpush.bf16.msra.mxu2 %v5353_v33  ;;  %2753 = vmatpush.bf16.msra.mxu0 %v3228_v59 }
 0x2b7   : > { %3246 = vmatpush.bf16.msra.mxu3 %v3228_v59 }
 0x2ba   : > { %v1769_v55 = vpop.permute.xlu0 %1768  ;;  %2854 = vmatpush.bf16.msra.mxu2 %v5364_v61 }
 0x2bb   : > { %v1987_v17 = vpop.permute.xlu1 %1986  ;;  %v2193_v44 = vsel %vm2171_vm2, %v5184_v18, %v1769_v55  ;;  %v3227_v18 = vld [vmem:[%s5810_s3 + $0x20] sm:$0xff] }
 0x2bc   : > { %v5319_v20 = vsel %vm2237_vm4, %v2218_v13, %v1987_v17  ;;  %v2226_v31 = vsel %vm2204_vm5, %v2193_v44, %v1914_v0  ;;  %2754 = vmatpush.bf16.msra.mxu0 %v3227_v18  ;;  %3247 = vmatpush.bf16.msra.mxu3 %v3227_v18  ;;  %v1880_v13 = vrot.slane %v6308_v57, 4  ;;  %v6309_v17 = vld [vmem:[#allocation93_spill] sm:$0xff]  ;;  %v3232_v18 = vld [vmem:[%s5810_s3 + $0x48] sm:$0xff]  ;;  %v6320_v57 = vld [vmem:[#allocation71_spill] sm:$0xff] }
 0x2bd   : > { %1772 = vrot.lane.b32.xlu0 %v1738_v19, %s5982_s12  ;;  %2363 = vrot.lane.b32.xlu1 %v5319_v20, %s5986_s30  ;;  %v1882_v22 = vrot.slane %v6309_v17, 3  ;;  %s6312_s30 = smov 88  }
 0x2be   : > { %1774 = vrot.lane.b32.xlu2 %v1741_v34, %s5982_s12  ;;  %2855 = vmatpush.bf16.msra.mxu2 %v5374_v9  ;;  %s6311_s12 = smov 16   ;;  %v1881_v15 = vor.u32 %v1880_v13, %v1879_v27  ;;  %v3224_v34 = vld [vmem:[%s5810_s3 + $0x8] sm:$0xff]  ;;  %v1886_v27 = vrot.slane %v6319_v6, 3  ;;  %v1887_v13 = vrot.slane %v6320_v57, 4 }
 0x2bf   : > { %v1884_v43 = vor.u32 %v1883_v23, %v1882_v22  ;;  %v6321_v22 = vld [vmem:[#allocation94_spill] sm:$0xff]  ;;  %v6322_v23 = vld [vmem:[#allocation75_spill] sm:$0xff] }
 0x2c0   : > { %2755 = vmatpush.bf16.msra.mxu0 %v3226_v2  ;;  %3248 = vmatpush.bf16.msra.mxu3 %v3226_v2  ;;  %v1889_v1 = vrot.slane %v6321_v22, 3  ;;  %v1888_v52 = vor.u32 %v1887_v13, %v1886_v27 }
 0x2c1   : > { %v1885_v58 = vsel %vm1780_vm14, %v1881_v15, %v1884_v43  ;;  %v6325_v43 = vld [vmem:[#allocation70_spill] sm:$0xff] }
 0x2c2   : > { %2856 = vmatpush.bf16.msra.mxu2 %v5387_v63  ;;  %v1746_v49 = vrot.slane %v6325_v43, 3  ;;  %v1972_v60 = vrot.slane %v6325_v43, 4 }
 0x2c3   : > { %v1995_v19 = vpop.permute.xlu1 %1994 }
 0x2c4   : > { %v5394_v51 = vsel %vm2237_vm4, %v2226_v31, %v1995_v19  ;;  %2756 = vmatpush.bf16.msra.mxu0 %v3225_v53  ;;  %3249 = vmatpush.bf16.msra.mxu3 %v3225_v53  ;;  %v3234_v19 = vld [vmem:[%s5810_s3 + $0x58] sm:$0xff]  ;;  %v1890_v53 = vrot.slane %v6322_v23, 4 }
 0x2c5   : > { %1919 = vrot.lane.b32.xlu0 %v1878_v32, %s5984_s13  ;;  %1917 = vrot.lane.b32.xlu1 %v1871_v46, %s5984_s13  ;;  %s6315_s13 = smov 28   ;;  %v3237_v32 = vld [vmem:[%s5810_s3 + $0x70] sm:$0xff] }
 0x2c6   : > { %1998 = vrot.lane.b32.xlu2 %v1964_v4, %s3537_s14  ;;  %2801 = vmatpush.bf16.msra.mxu1 %v3237_v32 }
 0x2c8   : > { %2757 = vmatpush.bf16.msra.mxu0 %v3224_v34  ;;  %3250 = vmatpush.bf16.msra.mxu3 %v3224_v34  ;;  %v1891_v34 = vor.u32 %v1890_v53, %v1889_v1 }
 0x2ca   : > { %2802 = vmatpush.bf16.msra.mxu1 %v3236_v5 }
 0x2cb   : > { %v1771_v4 = vpop.permute.xlu1 %1770 }
 0x2cc   : > { %2758 = vmatpush.bf16.msra.mxu0 %v3223_v42  ;;  %3251 = vmatpush.bf16.msra.mxu3 %v3223_v42 }
 0x2cd   : > { %2290 = vrot.lane.b32.xlu0 %v5223_v28, %s3540_s17  ;;  %2000 = vrot.lane.b32.xlu1 %v1967_v38, %s3537_s14  ;;  %v2195_v38 = vsel %vm2171_vm2, %v5188_v40, %v1771_v4  ;;  %v3233_v40 = vld [vmem:[%s5810_s3 + $0x50] sm:$0xff] }
 0x2ce   : > { %2307 = vrot.lane.b32.xlu2 %v5240_v16, %s3541_s10  ;;  %2803 = vmatpush.bf16.msra.mxu1 %v3235_v62 }
 0x2d0   : > { %3252 = vmatpush.bf16.msrb.mxu3 %v3238_v10 }
 0x2d2   : > { %2804 = vmatpush.bf16.msra.mxu1 %v3234_v19 }
 0x2d3   : > { %v1894_v3 = vpop.permute.xlu1 %1893 }
 0x2d4   : > { %3253 = vmatpush.bf16.msrb.mxu3 %v3237_v32  ;;  %v2206_v2 = vsel %vm2204_vm5, %v5200_v11, %v1894_v3  ;;  %v6324_v11 = vld [vmem:[#allocation64_spill] sm:$0xff]  ;;  %v1892_v32 = vsel %vm1780_vm14, %v1888_v52, %v1891_v34 }
 0x2d5   : > { %2324 = vrot.lane.b32.xlu0 %v5276_v39, %s5992_s16  ;;  %2280 = vrot.lane.b32.xlu1 %v5283_v50, %s3540_s17  ;;  %v1745_v15 = vrot.slane %v6324_v11, 3  ;;  %v1971_v26 = vrot.slane %v6324_v11, 4 }
 0x2d6   : > { %2384 = vrot.lane.b32.xlu2 %v5276_v39, %s5994_s15  ;;  %s6318_s15 = smov 108   ;;  %2805 = vmatpush.bf16.msra.mxu1 %v3233_v40 }
 0x2d7   : > { %v1973_v10 = vsel %vm1925_vm15, %v1971_v26, %v1972_v60 }
 0x2d8   : > { %3254 = vmatpush.bf16.msrb.mxu3 %v3236_v5 }
 0x2da   : > { %2806 = vmatpush.bf16.msra.mxu1 %v3232_v18 }
 0x2dc   : > { %3255 = vmatpush.bf16.msrb.mxu3 %v3235_v62 }
 0x2dd   : > { %2297 = vrot.lane.b32.xlu0 %v5260_v24, %s3541_s10  ;;  %2401 = vrot.lane.b32.xlu1 %v5394_v51, %s3537_s14 }
 0x2de   : > { %2314 = vrot.lane.b32.xlu2 %v5296_v36, %s5992_s16  ;;  %2807 = vmatpush.bf16.msra.mxu1 %v3231_v7 }
 0x2e0   : > { %3256 = vmatpush.bf16.msrb.mxu3 %v3234_v19 }
 0x2e4   : > { %3257 = vmatpush.bf16.msrb.mxu3 %v3233_v40 }
 0x2e5   : > { %2348 = vrot.lane.b32.xlu0 %v5319_v20, %s5990_s27  ;;  %2331 = vrot.lane.b32.xlu1 %v5303_v37, %s6311_s12 }
 0x2e6   : > { %2365 = vrot.lane.b32.xlu2 %v5223_v28, %s6312_s30 }
 0x2e7   : > { %v2398_v8 = vpop.permute.xlu2 %2397 }
 0x2e8   : > { %3258 = vmatpush.bf16.msrb.mxu3 %v3232_v18 }
 0x2ec   : > { %3259 = vmatpush.bf16.msrb.mxu3 %v3231_v7 }
 0x2ed   : > { %1921 = vrot.lane.b32.xlu0 %v1885_v58, %s6315_s13  ;;  %1776 = vrot.lane.b32.xlu1 %v1744_v45, %s6316_s8 }
 0x2ee   : > { %2002 = vrot.lane.b32.xlu2 %v1970_v54, %s3537_s14  ;;  %v1747_v54 = vsel %vm1699_vm13, %v1745_v15, %v1746_v49 }
 0x2ef   : > { %v1997_v46 = vpop.permute.xlu2 %1996 }
 0x2f5   : > { %2309 = vrot.lane.b32.xlu0 %v5276_v39, %s3541_s10  ;;  %2292 = vrot.lane.b32.xlu1 %v5240_v16, %s3540_s17 }
 0x2f6   : > { %2282 = vrot.lane.b32.xlu2 %v5260_v24, %s3540_s17 }
 0x2f8   : > { %v5450_v47 = vpop.permute.xlu0 %2380 }
 0x2f9   : > { %v2548_v14 = vsel %vm2237_vm4, %v5450_v47, %v2398_v8 }
 0x2fa   : > { %3202 = vmatmul.msk.bf16.vlgmr.msra.gmra.mxu2 %vm2731_vm3, %v2548_v14 }
 0x2fd   : > { %2386 = vrot.lane.b32.xlu0 %v5394_v51, %s6317_s0  ;;  %2326 = vrot.lane.b32.xlu1 %v5394_v51, %s6318_s15 }
 0x2ff   : > { %v2279_v48 = vpop.permute.xlu2 %2278  ;;  %v5483_v31 = vpop.permute.xlu1 %2382 }
 0x300   : > { %v1916_v56 = vpop.permute.xlu0 %1915 }
 0x301   : > { %v2228_v55 = vsel %vm2204_vm5, %v2195_v38, %v1916_v56 }
 0x302   : > { %v5469_v44 = vsel %vm2237_vm4, %v2228_v55, %v1997_v46 }
 0x303   : > { %2403 = vrot.lane.b32.xlu2 %v5469_v44, %s3537_s14 }
 0x305   : > { %2316 = vrot.lane.b32.xlu0 %v5303_v37, %s6318_s15  ;;  %2299 = vrot.lane.b32.xlu1 %v5296_v36, %s3541_s10 }
 0x307   : > { %v2296_v0 = vpop.permute.xlu2 %2295 }
 0x308   : > { %v1975_v59 = vpop.permute.xlu0 %1974 }
 0x309   : > { %v2239_v17 = vsel %vm2237_vm4, %v2206_v2, %v1975_v59 }
 0x30a   : > { %v2415_v35 = vsel %vm2413_vm6, %v2239_v17, %v2279_v48 }
 0x30b   : > { %2333 = vrot.lane.b32.xlu2 %v5319_v20, %s6311_s12  ;;  %v2432_v8 = vsel %vm2430_vm7, %v2415_v35, %v2296_v0 }
 0x30d   : > { %2367 = vrot.lane.b32.xlu0 %v5240_v16, %s6312_s30  ;;  %2350 = vrot.lane.b32.xlu1 %v5223_v28, %s6323_s26 }
 0x30e   : > { %v2313_v45 = vpop.permute.xlu1 %2312 }
 0x30f   : > { %v2347_v58 = vpop.permute.xlu2 %2346  ;;  %v2449_v42 = vsel %vm2447_vm8, %v2432_v8, %v2313_v45 }
 0x310   : > { %2759 = vmatmul.bf16.vlgmr.msra.gmra.mxu0 %v2449_v42 }
 0x313   : > { %1778 = vrot.lane.b32.xlu2 %v1747_v54, %s6316_s8  ;;  %s3213_s8 = sshll.u32 %s3515_s22, 5 }
 0x315   : > { %2004 = vrot.lane.b32.xlu0 %v1973_v10, %s3537_s14  ;;  %1923 = vrot.lane.b32.xlu1 %v1892_v32, %s6315_s13  ;;  %v2400_v46 = vpop.permute.xlu0 %2399  ;;  %s3243_s13 = sshll.u32 %s3511_s21, 4 }
 0x316   : > { %v2550_v14 = vsel %vm2237_vm4, %v5483_v31, %v2400_v46 }
 0x317   : > { %3203 = vmatmul.msk.bf16.gmra.mxu2 %vm2731_vm3, %v2550_v14 }
 0x318   : > { %v1775_v4 = vpop.permute.xlu2 %1774 }
 0x31b   : > { %2341 = vrot.lane.b32.xlu2 %v5394_v51, %s6311_s12 }
 0x31d   : > { %2358 = vrot.lane.b32.xlu1 %v5469_v44, %s6323_s26 }
 0x320   : > { %v1999_v5 = vpop.permute.xlu2 %1998 }
 0x323   : > { %2284 = vrot.lane.b32.xlu2 %v5296_v36, %s3540_s17 }
 0x325   : > { %2388 = vrot.lane.b32.xlu1 %v5469_v44, %s6317_s0 }
 0x327   : > { %v2330_v62 = vpop.permute.xlu0 %2329 }
 0x328   : > { %v2308_v48 = vpop.permute.xlu2 %2307  ;;  %v2473_v38 = vsel %vm2105_vm0, %v2313_v45, %v2330_v62 }
 0x329   : > { %v2490_v3 = vsel %vm2488_vm9, %v2473_v38, %v2347_v58 }
 0x32d   : > { %2301 = vrot.lane.b32.xlu1 %v5303_v37, %s3541_s10 }
 0x32f   : > { %v1773_v56 = vpop.permute.xlu0 %1772  ;;  %v2364_v55 = vpop.permute.xlu1 %2363 }
 0x330   : > { %v2507_v19 = vsel %vm2505_vm10, %v2490_v3, %v2364_v55  ;;  %v5535_v0 = vpop.permute.xlu2 %2384  ;;  %v2197_v59 = vsel %vm2171_vm2, %v5138_v25, %v1773_v56 }
 0x331   : > { %v2524_v40 = vsel %vm2522_vm11, %v2507_v19, %v5450_v47  ;;  %v2199_v47 = vsel %vm2171_vm2, %v5192_v30, %v1775_v4 }
 0x332   : > { %2808 = vmatmul.bf16.vlgmr.msra.gmra.mxu1 %v2524_v40 }
 0x335   : > { %2352 = vrot.lane.b32.xlu1 %v5240_v16, %s6323_s26 }
 0x337   : > { %v1920_v18 = vpop.permute.xlu0 %1919  ;;  %v1918_v2 = vpop.permute.xlu1 %1917 }
 0x338   : > { %v2230_v6 = vsel %vm2204_vm5, %v2197_v59, %v1918_v2  ;;  %v2315_v57 = vpop.permute.xlu2 %2314  ;;  %v2232_v13 = vsel %vm2204_vm5, %v2199_v47, %v1920_v18 }
 0x339   : > { %v2263_v27 = vsel %vm2237_vm4, %v2230_v6, %v1999_v5 }
 0x33a   : > { %2405 = vrot.lane.b32.xlu2 %v2263_v27, %s3537_s14  ;;  %2375 = vrot.lane.b32.xlu0 %v2263_v27, %s6312_s30 }
 0x33d   : > { %2360 = vrot.lane.b32.xlu1 %v2263_v27, %s6323_s26 }
 0x33f   : > { %v2291_v17 = vpop.permute.xlu0 %2290  ;;  %v2001_v25 = vpop.permute.xlu1 %2000 }
 0x340   : > { %v2265_v22 = vsel %vm2237_vm4, %v2232_v13, %v2001_v25  ;;  %v2427_v1 = vsel %vm2413_vm6, %v5319_v20, %v2291_v17  ;;  %v2366_v11 = vpop.permute.xlu2 %2365 }
 0x341   : > { %v2444_v53 = vsel %vm2430_vm7, %v2427_v1, %v2308_v48 }
 0x342   : > { %2335 = vrot.lane.b32.xlu2 %v5223_v28, %s6311_s12  ;;  %2392 = vrot.lane.b32.xlu0 %v2265_v22, %s6317_s0 }
 0x345   : > { %2390 = vrot.lane.b32.xlu1 %v2263_v27, %s6317_s0 }
 0x347   : > { %v5556_v23 = vpop.permute.xlu0 %2324  ;;  %v2281_v30 = vpop.permute.xlu1 %2280 }
 0x348   : > { %v2467_v15 = vsel %vm2447_vm8, %v2444_v53, %v5556_v23  ;;  %v2417_v43 = vsel %vm2413_vm6, %v5270_v41, %v2281_v30 }
 0x349   : > { %2789 = vmatmul.bf16.vlgmr.msra.gmra.mxu3 %v2467_v15 }
 0x34a   : > { %2343 = vrot.lane.b32.xlu2 %v5469_v44, %s6311_s12  ;;  %2318 = vrot.lane.b32.xlu0 %v5319_v20, %s6318_s15 }
 0x34b   : > { %3260 = vmatpush.bf16.msra.mxu3 %v5344_v21  ;;  %v2003_v21 = vpop.permute.xlu2 %2002 }
 0x34d   : > { %2303 = vrot.lane.b32.xlu1 %v5319_v20, %s3541_s10 }
 0x34f   : > { %v2298_v49 = vpop.permute.xlu0 %2297  ;;  %v2402_v7 = vpop.permute.xlu1 %2401  ;;  %3261 = vmatpush.bf16.msra.mxu3 %v5353_v33 }
 0x350   : > { %v2434_v35 = vsel %vm2430_vm7, %v2417_v43, %v2298_v49  ;;  %v2552_v26 = vsel %vm2237_vm4, %v5535_v0, %v2402_v7 }
 0x351   : > { %3204 = vmatmul.msk.bf16.gmra.mxu2 %vm2731_vm3, %v2552_v26  ;;  %v2452_v60 = vsel %vm2447_vm8, %v2434_v35, %v2315_v57 }
 0x352   : > { %2286 = vrot.lane.b32.xlu2 %v5303_v37, %s3540_s17  ;;  %2369 = vrot.lane.b32.xlu0 %v5276_v39, %s6312_s30 }
 0x353   : > { %2764 = vmatmul.bf16.gmra.mxu0 %v2452_v60  ;;  %3262 = vmatpush.bf16.msra.mxu3 %v5364_v61  ;;  %v2283_v45 = vpop.permute.xlu2 %2282 }
 0x355   : > { %2354 = vrot.lane.b32.xlu1 %v5276_v39, %s6323_s26 }
 0x357   : > { %v2349_v41 = vpop.permute.xlu0 %2348  ;;  %v2332_v33 = vpop.permute.xlu1 %2331  ;;  %3263 = vmatpush.bf16.msra.mxu3 %v5374_v9 }
 0x358   : > { %v2475_v52 = vsel %vm2105_vm0, %v2315_v57, %v2332_v33 }
 0x359   : > { %v2492_v34 = vsel %vm2488_vm9, %v2475_v52, %v2349_v41 }
 0x35a   : > { %2407 = vrot.lane.b32.xlu2 %v2265_v22, %s3537_s14  ;;  %2377 = vrot.lane.b32.xlu0 %v2265_v22, %s6312_s30  ;;  %v2509_v58 = vsel %vm2505_vm10, %v2492_v34, %v2366_v11  ;;  %v5650_v11 = vld [vmem:[%s5811_s4] ss:$0 sm:$0xff] }
 0x35b   : > { %v2527_v61 = vsel %vm2522_vm11, %v2509_v58, %v5483_v31  ;;  %3264 = vmatpush.bf16.msra.mxu3 %v5387_v63 }
 0x35c   : > { %2813 = vmatmul.bf16.gmra.mxu1 %v2527_v61 }
 0x35d   : > { %v2404_v31 = vpop.permute.xlu2 %2403 }
 0x35f   : > { %v1922_v8 = vpop.permute.xlu0 %1921  ;;  %v1777_v54 = vpop.permute.xlu1 %1776 }
 0x360   : > { %v2201_v9 = vsel %vm2171_vm2, %v5196_v12, %v1777_v54 }
 0x361   : > { %v2234_v42 = vsel %vm2204_vm5, %v2201_v9, %v1922_v8 }
 0x362   : > { %2337 = vrot.lane.b32.xlu2 %v5240_v16, %s6311_s12  ;;  %v2267_v10 = vsel %vm2237_vm4, %v2234_v42, %v2003_v21 }
 0x363   : > { %2409 = vrot.lane.b32.xlu1 %v2267_v10, %s3537_s14  ;;  %2394 = vrot.lane.b32.xlu0 %v2267_v10, %s6317_s0  ;;  %s2960_s0 = sadd.s32 %s3243_s13, %s3213_s8  ;;  %s3453_s8 = scalar_lea.hbm %s5812_s5, 256 }
 0x365   : > { %v2334_v46 = vpop.permute.xlu2 %2333 }
 0x367   : > { %v2310_v63 = vpop.permute.xlu0 %2309  ;;  %v2293_v32 = vpop.permute.xlu1 %2292 }
 0x368   : > { %v2429_v12 = vsel %vm2413_vm6, %v5223_v28, %v2293_v32 }
 0x369   : > { %v2446_v5 = vsel %vm2430_vm7, %v2429_v12, %v2310_v63 }
 0x36a   : > { %2288 = vrot.lane.b32.xlu2 %v5319_v20, %s3540_s17 }
 0x36b   : > { %2322 = vrot.lane.b32.xlu1 %v5240_v16, %s6318_s15  ;;  %2320 = vrot.lane.b32.xlu0 %v5223_v28, %s6318_s15  ;;  %v2419_v16 = vsel %vm2413_vm6, %v5283_v50, %v2283_v45  ;;  %s3214_s15 = sshll.u32 %s2960_s0, 2 }
 0x36c   : > { %s2962_s27 = scalar_lea.hbm %s5812_s5, %s3214_s15 }
 0x36d   : > { %v1779_v56 = vpop.permute.xlu2 %1778  ;;  %s2965_s9 = sshll.u32 %s2962_s27, 4  ;;  %s2966_s9 = int_to_ptr.hbm [resolvable:$true] %s2965_s9 }
 0x36e   : > { %v2203_v2 = vsel %vm2171_vm2, %v5169_v29, %v1779_v56 }
 0x36f   : > { %v5608_v4 = vpop.permute.xlu0 %2386  ;;  %v5610_v14 = vpop.permute.xlu1 %2326 }
 0x370   : > { %v2470_v62 = vsel %vm2447_vm8, %v2446_v5, %v5610_v14  ;;  %v2554_v20 = vsel %vm2237_vm4, %v5608_v4, %v2404_v31 }
 0x371   : > { %2794 = vmatmul.bf16.gmra.mxu3 %v2470_v62  ;;  %3205 = vmatmul.msk.bf16.gmra.mxu2 %vm2731_vm3, %v2554_v20 }
 0x372   : > { %2305 = vrot.lane.b32.xlu2 %v5223_v28, %s3541_s10  ;;  %s338_s10 = sand.u32 1, %s3503_s19  }
 0x373   : > { %2373 = vrot.lane.b32.xlu1 %v5469_v44, %s6312_s30  ;;  %2371 = vrot.lane.b32.xlu0 %v5394_v51, %s6312_s30  ;;  %s2948_s16 = scalar_lea.sflag [#allocation3], %s338_s10 }
 0x375   : > { %v2342_v50 = vpop.permute.xlu2 %2341 }
 0x376   : > { %v2485_v60 = vsel %vm2105_vm0, %v5556_v23, %v2342_v50 }
 0x377   : > { %v2317_v48 = vpop.permute.xlu0 %2316  ;;  %v2300_v38 = vpop.permute.xlu1 %2299 }
 0x378   : > { %v2436_v55 = vsel %vm2430_vm7, %v2419_v16, %v2300_v38  ;;  %v2477_v28 = vsel %vm2105_vm0, %v2317_v48, %v2334_v46 }
 0x379   : > { %v2455_v3 = vsel %vm2447_vm8, %v2436_v55, %v2317_v48 }
 0x37a   : > { %2356 = vrot.lane.b32.xlu2 %v5394_v51, %s6323_s26  ;;  %2769 = vmatmul.bf16.gmra.mxu0 %v2455_v3 }
 0x37d   : > { %v2285_v57 = vpop.permute.xlu2 %2284  ;;  %v2858_v43 = vpop.f32.mrf.mxu2 }
 0x37e   : > { %v2421_v32 = vsel %vm2413_vm6, %v5260_v24, %v2285_v57 }
 0x37f   : > { %v2368_v44 = vpop.permute.xlu0 %2367  ;;  %v2351_v19 = vpop.permute.xlu1 %2350 }
 0x380   : > { %v2494_v40 = vsel %vm2488_vm9, %v2477_v28, %v2351_v19 }
 0x381   : > { %v2511_v59 = vsel %vm2505_vm10, %v2494_v40, %v2368_v44 }
 0x382   : > { %v2530_v18 = vsel %vm2522_vm11, %v2511_v59, %v5535_v0 }
 0x383   : > { %2818 = vmatmul.bf16.gmra.mxu1 %v2530_v18 }
 0x385   : > { %v2860_v31 = vpop.f32.mrf.mxu2 }
 0x387   : > { %v2005_v6 = vpop.permute.xlu0 %2004  ;;  %v1924_v27 = vpop.permute.xlu1 %1923 }
 0x388   : > { %v2236_v51 = vsel %vm2204_vm5, %v2203_v2, %v1924_v27 }
 0x389   : > { %v2269_v47 = vsel %vm2237_vm4, %v2236_v51, %v2005_v6 }
 0x38a   : > { %2411 = vrot.lane.b32.xlu0 %v2269_v47, %s3537_s14  ;;  %s3447_s14 = sshra.s32 %s2966_s9, 4  ;;  %s3448_s14 = int_to_ptr.hbm [resolvable:$true] %s3447_s14 }
 0x38b   : > { %s3449_s17 = scalar_lea.hbm %s3448_s14, 64  ;;  %p3454_p9 = scmp.lt.s32.totalorder %s3448_s14, %s5812_s5 }
 0x38c   : > { %p3450_p5 = scmp.ne.s32.totalorder %s3448_s14, %s3449_s17  ;;  %p3455_p10 = scmp.lt.s32.totalorder %s3453_s8, %s3449_s17 }
 0x38d   : > { %v2760_v53 = vpop.f32.mrf.mxu0 }
 0x38e   : > { %v2761_v49 = vadd.f32 %v5650_v11, %v2760_v53  ;;  %p3451_p6 = pnand %p3450_p5, %p3626_p3  ;;  %p3456_p11 = por %p3455_p10, %p3454_p9 }
 0x38f   : > { %v2359_v13 = vpop.permute.xlu1 %2358 }
 0x390   : > { %v2502_v41 = vsel %vm2488_vm9, %v2485_v60, %v2359_v13  ;;  %p3452_p7 = pneg %p3451_p6 }
 0x392   : > { %2339 = vrot.lane.b32.xlu0 %v5276_v39, %s6311_s12  ;;  %s3104_s12 = sshll.u32 %s338_s10, 6  ;;  %p3457_p12 = pnand %p3456_p11, %p3452_p7 }
 0x393   : > { %s5666_s30 = scalar_lea.vmem [#allocation2], %s3104_s12 }
 0x394   : > { %v2406_v17 = vpop.permute.xlu2 %2405  ;;  %s2963_s26 = sshll.u32 %s5666_s30, 4  ;;  %s2964_s26 = int_to_ptr.vmem [resolvable:$true] %s2963_s26 }
 0x395   : > { %v2762_v33 = vpop.f32.mrf.mxu0 }
 0x396   : > { %v2763_v45 = vadd.f32 %v5650_v11, %v2762_v33 }
 0x397   : > { %v5642_v0 = vpop.permute.xlu1 %2388 }
 0x398   : > { %v2556_v29 = vsel %vm2237_vm4, %v5642_v0, %v2406_v17 }
 0x399   : > { %3206 = vmatmul.msk.bf16.gmra.mxu2 %vm2731_vm3, %v2556_v29 }
 0x39a   : > { %v2863_v51 = vpop.f32.mrf.mxu2 }
 0x39c   : > { %v2336_v25 = vpop.permute.xlu2 %2335 }
 0x39f   : > { %v2302_v22 = vpop.permute.xlu1 %2301 }
 0x3a0   : > { %v2438_v12 = vsel %vm2430_vm7, %v2421_v32, %v2302_v22 }
 0x3a4   : > { %v2344_v1 = vpop.permute.xlu2 %2343 }
 0x3a5   : > { %v2487_v19 = vsel %vm2105_vm0, %v5610_v14, %v2344_v1 }
 0x3a7   : > { %v2353_v30 = vpop.permute.xlu1 %2352 }
 0x3ac   : > { %v2376_v39 = vpop.permute.xlu0 %2375  ;;  %v5652_v15 = vpop.permute.xlu2 %2286 }
 0x3ad   : > { %v2519_v52 = vsel %vm2505_vm10, %v2502_v41, %v2376_v39  ;;  %v2423_v13 = vsel %vm2413_vm6, %v5296_v36, %v5652_v15 }
 0x3af   : > { %v2809_v7 = vpop.f32.mrf.mxu1  ;;  %v2361_v35 = vpop.permute.xlu1 %2360 }
 0x3b0   : > { %v2810_v26 = vadd.f32 %v2809_v7, %v2761_v49  ;;  %v2504_v40 = vsel %vm2488_vm9, %v2487_v19, %v2361_v35  ;;  %v2865_v7 = vpop.f32.mrf.mxu2 }
 0x3b2   : > { %v2859_v21 = vadd.f32 %v2858_v43, %v2810_v26 }
 0x3b4   : > { %v2898_v34 = vmax.f32 %v2859_v21, 0.0  ;;  %v2393_v58 = vpop.permute.xlu0 %2392  ;;  %v2408_v54 = vpop.permute.xlu2 %2407 }
 0x3b5   : > { %v2542_v61 = vsel %vm2522_vm11, %v2519_v52, %v2393_v58 }
 0x3b6   : > { %v2914_v8 = vpack.c.bf16 %v2898_v34, %v2898_v34  ;;  %2838 = vmatmul.bf16.vlgmr.msrb.gmra.mxu3 %v2542_v61 }
 0x3b7   : > { %v2811_v9 = vpop.f32.mrf.mxu1  ;;  %v5664_v23 = vpop.permute.xlu1 %2390 }
 0x3b8   : > { %2931 = vst.msk [vmem:[%s5666_s30] sm:$0xf] %vm2930_vm12, %v2914_v8  ;;  %v2812_v42 = vadd.f32 %v2811_v9, %v2763_v45  ;;  %v2558_v10 = vsel %vm2237_vm4, %v5664_v23, %v2408_v54 }
 0x3b9   : > { %3207 = vmatmul.msk.bf16.gmra.mxu2 %vm2731_vm3, %v2558_v10 }
 0x3ba   : > { %v2861_v63 = vadd.f32 %v2860_v31, %v2812_v42 }
 0x3bc   : > { %v2899_v46 = vmax.f32 %v2861_v63, 0.0  ;;  %v2319_v5 = vpop.permute.xlu0 %2318  ;;  %v2338_v6 = vpop.permute.xlu2 %2337 }
 0x3bd   : > { %v2458_v62 = vsel %vm2447_vm8, %v2438_v12, %v2319_v5  ;;  %v2479_v16 = vsel %vm2105_vm0, %v2319_v5, %v2336_v25 }
 0x3be   : > { %v2915_v20 = vpack.c.bf16 %v2899_v46, %v2899_v46  ;;  %2774 = vmatmul.bf16.gmra.mxu0 %v2458_v62  ;;  %v2496_v56 = vsel %vm2488_vm9, %v2479_v16, %v2353_v30 }
 0x3bf   : > { %v2304_v48 = vpop.permute.xlu1 %2303 }
 0x3c0   : > { %2932 = vst.msk [vmem:[%s5666_s30 + $0x4] sm:$0xf] %vm2930_vm12, %v2915_v20  ;;  %v2440_v29 = vsel %vm2430_vm7, %v2423_v13, %v2304_v48 }
 0x3c4   : > { %v2370_v38 = vpop.permute.xlu0 %2369  ;;  %v2289_v39 = vpop.permute.xlu2 %2288 }
 0x3c5   : > { %v2513_v55 = vsel %vm2505_vm10, %v2496_v56, %v2370_v38 }
 0x3c6   : > { %v2533_v24 = vsel %vm2522_vm11, %v2513_v55, %v5608_v4 }
 0x3c7   : > { %2823 = vmatmul.bf16.gmra.mxu1 %v2533_v24  ;;  %v2355_v28 = vpop.permute.xlu1 %2354 }
 0x3cc   : > { %v2378_v3 = vpop.permute.xlu0 %2377  ;;  %v2306_v52 = vpop.permute.xlu2 %2305 }
 0x3cd   : > { %v2521_v50 = vsel %vm2505_vm10, %v2504_v40, %v2378_v3 }
 0x3d0   : > { %v2765_v44 = vpop.f32.mrf.mxu0 }
 0x3d1   : > { %v2766_v4 = vadd.f32 %v5650_v11, %v2765_v44 }
 0x3d4   : > { %v2357_v46 = vpop.permute.xlu2 %2356 }
 0x3d5   : > { %v2410_v59 = vpop.permute.xlu1 %2409  ;;  %v2395_v18 = vpop.permute.xlu0 %2394 }
 0x3d6   : > { %v2560_v2 = vsel %vm2237_vm4, %v2393_v58, %v2410_v59  ;;  %v2545_v27 = vsel %vm2522_vm11, %v2521_v50, %v2395_v18  ;;  %v2425_v58 = vsel %vm2413_vm6, %v5303_v37, %v2289_v39  ;;  %v2790_v50 = vpop.f32.mrf.mxu3 }
 0x3d7   : > { %3208 = vmatmul.msk.bf16.gmra.mxu2 %vm2731_vm3, %v2560_v2  ;;  %2843 = vmatmul.bf16.gmra.mxu3 %v2545_v27  ;;  %v2442_v61 = vsel %vm2430_vm7, %v2425_v58, %v2306_v52 }
 0x3d8   : > { %v2767_v17 = vpop.f32.mrf.mxu0 }
 0x3d9   : > { %v2814_v47 = vpop.f32.mrf.mxu1  ;;  %v2768_v30 = vadd.f32 %v5650_v11, %v2767_v17 }
 0x3da   : > { %v2815_v14 = vadd.f32 %v2814_v47, %v2766_v4 }
 0x3dc   : > { %v2864_v57 = vadd.f32 %v2863_v51, %v2815_v14 }
 0x3dd   : > { %v2321_v22 = vpop.permute.xlu0 %2320  ;;  %v2323_v34 = vpop.permute.xlu1 %2322 }
 0x3de   : > { %v2900_v25 = vmax.f32 %v2864_v57, 0.0  ;;  %v2461_v1 = vsel %vm2447_vm8, %v2440_v29, %v2321_v22  ;;  %v2481_v36 = vsel %vm2105_vm0, %v2321_v22, %v2338_v6  ;;  %v2464_v45 = vsel %vm2447_vm8, %v2442_v61, %v2323_v34  ;;  %v2792_v2 = vpop.f32.mrf.mxu3 }
 0x3df   : > { %2779 = vmatmul.bf16.gmra.mxu0 %v2461_v1  ;;  %v2498_v60 = vsel %vm2488_vm9, %v2481_v36, %v2355_v28  ;;  %v2791_v36 = vadd.f32 %v5650_v11, %v2790_v50 }
 0x3e0   : > { %v2916_v53 = vpack.c.bf16 %v2900_v25, %v2900_v25 }
 0x3e1   : > { %v2816_v43 = vpop.f32.mrf.mxu1 }
 0x3e2   : > { %2933 = vst.msk [vmem:[%s5666_s30 + $0x8] sm:$0xf] %vm2930_vm12, %v2916_v53  ;;  %v2817_v49 = vadd.f32 %v2816_v43, %v2768_v30 }
 0x3e4   : > { %v2866_v15 = vadd.f32 %v2865_v7, %v2817_v49 }
 0x3e5   : > { %v2372_v26 = vpop.permute.xlu0 %2371  ;;  %v2374_v62 = vpop.permute.xlu1 %2373 }
 0x3e6   : > { %v2901_v35 = vmax.f32 %v2866_v15, 0.0  ;;  %v2515_v21 = vsel %vm2505_vm10, %v2498_v60, %v2372_v26 }
 0x3e7   : > { %v2536_v33 = vsel %vm2522_vm11, %v2515_v21, %v5642_v0  ;;  %v2868_v0 = vpop.f32.mrf.mxu2 }
 0x3e8   : > { %v2917_v41 = vpack.c.bf16 %v2901_v35, %v2901_v35  ;;  %2828 = vmatmul.bf16.gmra.mxu1 %v2536_v33 }
 0x3ea   : > { %2934 = vst.msk [vmem:[%s5666_s30 + $0xc] sm:$0xf] %vm2930_vm12, %v2917_v41  ;;  %v2793_v41 = vadd.f32 %v5650_v11, %v2792_v2 }
 0x3ef   : > { %2784 = vmatmul.bf16.gmra.mxu0 %v2464_v45  ;;  %v2870_v3 = vpop.f32.mrf.mxu2 }
 0x3f4   : > { %v2795_v4 = vpop.f32.mrf.mxu3 }
 0x3f7   : > { %v2770_v8 = vpop.f32.mrf.mxu0  ;;  %v2873_v40 = vpop.f32.mrf.mxu2 }
 0x3f8   : > { %v2771_v42 = vadd.f32 %v5650_v11, %v2770_v8 }
 0x3fc   : > { %v2412_v54 = vpop.permute.xlu0 %2411  ;;  %v2797_v22 = vpop.f32.mrf.mxu3 }
 0x3fd   : > { %v2562_v9 = vsel %vm2237_vm4, %v2395_v18, %v2412_v54 }
 0x3fe   : > { %3209 = vmatmul.msk.bf16.vlgmr.msra.gmra.mxu3 %vm2731_vm3, %v2562_v9 }
 0x3ff   : > { %v2772_v32 = vpop.f32.mrf.mxu0  ;;  %v2875_v59 = vpop.f32.mrf.mxu2 }
 0x400   : > { %v2819_v10 = vpop.f32.mrf.mxu1  ;;  %v2773_v20 = vadd.f32 %v5650_v11, %v2772_v32 }
 0x401   : > { %v2820_v31 = vadd.f32 %v2819_v10, %v2771_v42 }
 0x403   : > { %v2869_v63 = vadd.f32 %v2868_v0, %v2820_v31 }
 0x404   : > { %v2340_v12 = vpop.permute.xlu0 %2339 }
 0x405   : > { %v2902_v37 = vmax.f32 %v2869_v63, 0.0  ;;  %v2483_v5 = vsel %vm2105_vm0, %v2323_v34, %v2340_v12 }
 0x406   : > { %v2500_v48 = vsel %vm2488_vm9, %v2483_v5, %v2357_v46 }
 0x407   : > { %v2918_v16 = vpack.c.bf16 %v2902_v37, %v2902_v37  ;;  %v2517_v56 = vsel %vm2505_vm10, %v2500_v48, %v2374_v62  ;;  %v2796_v48 = vadd.f32 %v5650_v11, %v2795_v4 }
 0x408   : > { %v2821_v38 = vpop.f32.mrf.mxu1  ;;  %v2539_v24 = vsel %vm2522_vm11, %v2517_v56, %v5664_v23 }
 0x409   : > { %2935 = vst.msk [vmem:[%s5666_s30 + $0x10] sm:$0xf] %vm2930_vm12, %v2918_v16  ;;  %v2822_v55 = vadd.f32 %v2821_v38, %v2773_v20  ;;  %2833 = vmatmul.bf16.gmra.mxu1 %v2539_v24 }
 0x40b   : > { %v2871_v28 = vadd.f32 %v2870_v3, %v2822_v55 }
 0x40d   : > { %v2903_v44 = vmax.f32 %v2871_v28, 0.0 }
 0x40f   : > { %v2919_v19 = vpack.c.bf16 %v2903_v44, %v2903_v44  ;;  %v2798_v44 = vadd.f32 %v5650_v11, %v2797_v22 }
 0x411   : > { %2936 = vst.msk [vmem:[%s5666_s30 + $0x14] sm:$0xf] %vm2930_vm12, %v2919_v19 }
 0x41c   : > { %v2878_v18 = vpop.f32.mrf.mxu2 }
 0x424   : > { %v2880_v27 = vpop.f32.mrf.mxu2 }
 0x439   : > { %v2839_v7 = vpop.f32.mrf.mxu3 }
 0x43a   : > { %v2840_v15 = vadd.f32 %v2839_v7, %v2791_v36 }
 0x43b   : > { %v2775_v6 = vpop.f32.mrf.mxu0 }
 0x43c   : > { %v2776_v51 = vadd.f32 %v5650_v11, %v2775_v6  ;;  %v5725_v57 = vpop.f32.mrf.mxu2 }
 0x441   : > { %v2841_v21 = vpop.f32.mrf.mxu3 }
 0x442   : > { %v2842_v34 = vadd.f32 %v2841_v21, %v2793_v41 }
 0x443   : > { %v2777_v13 = vpop.f32.mrf.mxu0 }
 0x444   : > { %v2824_v47 = vpop.f32.mrf.mxu1  ;;  %v2778_v29 = vadd.f32 %v5650_v11, %v2777_v13  ;;  %v5730_v43 = vpop.f32.mrf.mxu2 }
 0x445   : > { %v2825_v23 = vadd.f32 %v2824_v47, %v2776_v51 }
 0x447   : > { %v2874_v14 = vadd.f32 %v2873_v40, %v2825_v23 }
 0x449   : > { %v2904_v17 = vmax.f32 %v2874_v14, 0.0 }
 0x44b   : > { %v2920_v25 = vpack.c.bf16 %v2904_v17, %v2904_v17 }
 0x44c   : > { %v2826_v1 = vpop.f32.mrf.mxu1 }
 0x44d   : > { %2937 = vst.msk [vmem:[%s5666_s30 + $0x18] sm:$0xf] %vm2930_vm12, %v2920_v25  ;;  %v2827_v30 = vadd.f32 %v2826_v1, %v2778_v29 }
 0x44f   : > { %v2876_v53 = vadd.f32 %v2875_v59, %v2827_v30 }
 0x451   : > { %v2905_v39 = vmax.f32 %v2876_v53, 0.0 }
 0x453   : > { %v2921_v49 = vpack.c.bf16 %v2905_v39, %v2905_v39 }
 0x455   : > { %2938 = vst.msk [vmem:[%s5666_s30 + $0x1c] sm:$0xf] %vm2930_vm12, %v2921_v49 }
 0x45a   : > { %v2888_v35 = vpop.f32.mrf.mxu2  ;;  %v2844_v46 = vpop.f32.mrf.mxu3 }
 0x45b   : > { %v2889_v26 = vadd.f32 %v2888_v35, %v2840_v15  ;;  %v2845_v38 = vadd.f32 %v2844_v46, %v2796_v48 }
 0x45c   : > { %v2780_v52 = vpop.f32.mrf.mxu0 }
 0x45d   : > { %v2910_v60 = vmax.f32 %v2889_v26, 0.0  ;;  %v2781_v45 = vadd.f32 %v5650_v11, %v2780_v52 }
 0x45f   : > { %v2926_v33 = vpack.c.bf16 %v2910_v60, %v2910_v60 }
 0x461   : > { %2943 = vst.msk [vmem:[%s5666_s30 + $0x30] sm:$0xf] %vm2930_vm12, %v2926_v33 }
 0x462   : > { %v2890_v58 = vpop.f32.mrf.mxu2  ;;  %v2846_v16 = vpop.f32.mrf.mxu3 }
 0x463   : > { %v2891_v61 = vadd.f32 %v2890_v58, %v2842_v34  ;;  %v2847_v50 = vadd.f32 %v2846_v16, %v2798_v44 }
 0x464   : > { %v2782_v10 = vpop.f32.mrf.mxu0 }
 0x465   : > { %v2911_v8 = vmax.f32 %v2891_v61, 0.0  ;;  %v2829_v54 = vpop.f32.mrf.mxu1  ;;  %v2783_v63 = vadd.f32 %v5650_v11, %v2782_v10 }
 0x466   : > { %v2830_v42 = vadd.f32 %v2829_v54, %v2781_v45 }
 0x467   : > { %v2927_v9 = vpack.c.bf16 %v2911_v8, %v2911_v8 }
 0x468   : > { %v2879_v0 = vadd.f32 %v2878_v18, %v2830_v42 }
 0x469   : > { %2944 = vst.msk [vmem:[%s5666_s30 + $0x34] sm:$0xf] %vm2930_vm12, %v2927_v9 }
 0x46a   : > { %v2906_v31 = vmax.f32 %v2879_v0, 0.0 }
 0x46c   : > { %v2922_v32 = vpack.c.bf16 %v2906_v31, %v2906_v31  ;;  %v2785_v56 = vpop.f32.mrf.mxu0 }
 0x46d   : > { %v2831_v37 = vpop.f32.mrf.mxu1  ;;  %v2786_v28 = vadd.f32 %v5650_v11, %v2785_v56 }
 0x46e   : > { %2939 = vst.msk [vmem:[%s5666_s30 + $0x20] sm:$0xf] %vm2930_vm12, %v2922_v32  ;;  %v2832_v12 = vadd.f32 %v2831_v37, %v2783_v63 }
 0x470   : > { %v2881_v5 = vadd.f32 %v2880_v27, %v2832_v12 }
 0x472   : > { %v2907_v62 = vmax.f32 %v2881_v5, 0.0 }
 0x474   : > { %v2923_v20 = vpack.c.bf16 %v2907_v62, %v2907_v62  ;;  %v2787_v6 = vpop.f32.mrf.mxu0 }
 0x475   : > { %v2788_v47 = vadd.f32 %v5650_v11, %v2787_v6 }
 0x476   : > { %2940 = vst.msk [vmem:[%s5666_s30 + $0x24] sm:$0xf] %vm2930_vm12, %v2923_v20 }
 0x481   : > { %v2893_v55 = vpop.f32.mrf.mxu3 }
 0x482   : > { %v2894_v24 = vadd.f32 %v2893_v55, %v2845_v38 }
 0x484   : > { %v2912_v3 = vmax.f32 %v2894_v24, 0.0 }
 0x486   : > { %v2928_v19 = vpack.c.bf16 %v2912_v3, %v2912_v3  ;;  %v2834_v40 = vpop.f32.mrf.mxu1 }
 0x487   : > { %v2835_v59 = vadd.f32 %v2834_v40, %v2786_v28 }
 0x488   : > { %2945 = vst.msk [vmem:[%s5666_s30 + $0x38] sm:$0xf] %vm2930_vm12, %v2928_v19 }
 0x489   : > { %v2884_v18 = vadd.f32 %v5725_v57, %v2835_v59  ;;  %v2895_v2 = vpop.f32.mrf.mxu3 }
 0x48a   : > { %v2896_v27 = vadd.f32 %v2895_v2, %v2847_v50 }
 0x48b   : > { %v2908_v4 = vmax.f32 %v2884_v18, 0.0 }
 0x48c   : > { %v2913_v51 = vmax.f32 %v2896_v27, 0.0 }
 0x48d   : > { %v2924_v23 = vpack.c.bf16 %v2908_v4, %v2908_v4 }
 0x48e   : > { %v2929_v14 = vpack.c.bf16 %v2913_v51, %v2913_v51  ;;  %v2836_v13 = vpop.f32.mrf.mxu1 }
 0x48f   : > { %2941 = vst.msk [vmem:[%s5666_s30 + $0x28] sm:$0xf] %vm2930_vm12, %v2924_v23  ;;  %v2837_v17 = vadd.f32 %v2836_v13, %v2788_v47 }
 0x490   : > { %2946 = vst.msk [vmem:[%s5666_s30 + $0x3c] sm:$0xf] %vm2930_vm12, %v2929_v14 }
 0x491   : > { %v2886_v57 = vadd.f32 %v5730_v43, %v2837_v17 }
 0x493   : > { %v2909_v29 = vmax.f32 %v2886_v57, 0.0 }
 0x495   : > { %v2925_v11 = vpack.c.bf16 %v2909_v29, %v2909_v29 }
 0x497   : > { %2942 = vst.msk [vmem:[%s5666_s30 + $0x2c] sm:$0xf] %vm2930_vm12, %v2925_v11 }
 0x498   : > { %3460 = shalt.err (!%p3457_p12)
}
 0x499   : > { %s3544_s10 = smov 64   ;;  %s6326_s30 = smov 4  }
 0x49a   : > { %3265 = dma.vmem_to_hbm [thread:$0]  (%p3626_p3), %s2964_s26, 1024, %s2966_s9, %s2948_s16, %s3544_s10, %s3544_s10, %s6326_s30  }
 0x49b PF: > { %p3271_p13 = scmp.ge.s32.totalorder %s3527_s25, 2  ;;  %s2980_s21 = sand.u32 1, %s3499_s18  }
 0x49c   : > { %s2981_s22 = scalar_lea.sflag [#allocation3], %s2980_s21 }
 0x49d   : > { %p3268_p0 = pnand %p3271_p13, %p3635_p8 }
 0x49f   : > { %p3269_p1 = pneg %p3268_p0 }
 0x4a1   : > { %3494 = dma.done.wait (%p3269_p1), %s2981_s22, 1024  }
 0x4a2   : > { %3496 = vsyncadd (%p3269_p1), %s2981_s22, 4294966272  ;;  %s18_s25 = sadd.s32 1, %s3527_s25   ;;  %s6327_s18 = smov %s3503_s19 }
 0x4a3   : > { %p15_p2 = scmp.ge.s32.totalorder %s18_s25, 6   ;;  %s6328_s19 = smov %s3507_s20 }
 0x4a4   : > { %s6329_s20 = smov %s3644_s11  ;;  %s6330_s21 = smov %s3519_s23 }
 0x4a5   : > { %s6331_s22 = smov %s3523_s24  ;;  %s6332_s23 = smov %s6335_s28 }
 0x4a6   : > { %s6333_s24 = smov %s6339_s29  ;;  %17 = sbr.rel (!%p15_p2) target bundleno = 7 (0x7), region = 81 }
 0x4ab   :  { %2987 = vsyncpa [#allocation3], 1 }
 0x4ac   :  { %2989 = vsyncpa [#allocation3 + $0x1], 1 }

</bundles_post_ra>
